<compile_context>
chip_gen: v6e
topology: v6e:2x2x1
jax: 0.10.0
libtpu: 0.0.40
codegen_flags: <defaults>
</compile_context>

<pallas_src>
import functools

import jax
import jax.numpy as jnp
from jax.experimental import pallas as pl
from jax.experimental.pallas import tpu as pltpu

BN_EPS = 1e-5
COLLECT_AT = frozenset({2, 5, 8, 11, 14, 17, 20, 23, 26, 29, 32, 35, 38})


# ----------------------------------------------------------------------------
# Fused [conv3x3 -> BN -> ReLU] * n_blocks kernel (whole stack, one invocation)
# ----------------------------------------------------------------------------
def _make_fused_stack_kernel(N, H, W, cins, couts):
    n_blk = len(couts)
    max_wci = W * max(cins)

    def kernel(*refs):
        # refs: x, (wt, gamma_t, beta_t, fold) * n_blk, out * n_blk, pad_scratch
        x_ref = refs[0]
        prm = refs[1:1 + 4 * n_blk]
        out_refs = refs[1 + 4 * n_blk:1 + 5 * n_blk]
        pad_ref = refs[1 + 5 * n_blk]

        # Zero ONLY the two halo rows, once, at full width.  Interior writes
        # below never touch rows 0 / H+1, and each block reads lanes [0:wci]
        # only, so the halos stay valid for every block.
        pad_ref[:, 0:1, :] = jnp.zeros((N, 1, max_wci), jnp.bfloat16)
        pad_ref[:, H + 1:H + 2, :] = jnp.zeros((N, 1, max_wci), jnp.bfloat16)

        # Hoisted constants (JAX does not CSE broadcasts inside the loop).
        ones_row = jnp.ones((1, N * H), jnp.float32)
        cnt = jnp.float32(N * H * W)

        y = x_ref[...].astype(jnp.float32)              # (N, H, W*Cin0)
        for b in range(n_blk):
            wt_ref, g_ref, beta_ref, fold_ref = prm[4 * b:4 * b + 4]
            cin, cout = cins[b], couts[b]
            wci, wco = W * cin, W * cout

            # Interior rows of the padded activation, stored as the bf16 MXU
            # operand (halves scratch footprint + load bandwidth).
            pad_ref[:, 1:H + 1, 0:wci] = y.astype(jnp.bfloat16)

            # --- 3x3 conv (pad=1) as 3 Toeplitz matmuls, bf16 x bf16 -> f32 --
            acc = jnp.zeros((N * H, wco), jnp.float32)
            for dy in range(3):
                lhs = pad_ref[:, dy:dy + H, 0:wci].reshape(N * H, wci)
                acc = acc + jnp.dot(lhs, wt_ref[dy],
                                    preferred_element_type=jnp.float32)

            # --- BatchNorm (batch stats, biased var, f32) + ReLU, fused ------
            # Row reduction on the MXU; channel fold via precomputed 0/1
            # same-channel matrix (also MXU) instead of in-kernel iota / %.
            s1 = jnp.dot(ones_row, acc, preferred_element_type=jnp.float32)
            s2 = jnp.dot(ones_row, acc * acc,
                         preferred_element_type=jnp.float32)
            sum1 = jnp.dot(s1, fold_ref[...],
                           preferred_element_type=jnp.float32)  # (1, W*Cout)
            sum2 = jnp.dot(s2, fold_ref[...],
                           preferred_element_type=jnp.float32)
            mean = sum1 / cnt
            var = jnp.maximum(sum2 / cnt - mean * mean, 0.0)    # clamped 1-pass
            inv = jax.lax.rsqrt(var + BN_EPS)
            scale = g_ref[...] * inv                            # (1, W*Cout)
            shift = beta_ref[...] - mean * scale
            y = jnp.maximum(acc * scale + shift, 0.0)           # ReLU, f32
            y = y.reshape(N, H, wco)

            out_refs[b][...] = y.astype(out_refs[b].dtype)      # lane-dense store

    return kernel


# ----------------------------------------------------------------------------
# Wrapper-side layout plumbing (host / trace time)
# ----------------------------------------------------------------------------
def _toeplitz_weights(w, width):
    """(3, 3, Cin, Cout) conv kernel -> (3, W*Cin, W*Cout) banded bf16 matrices.

    wt[dy, xi*Cin + ci, xo*Cout + co] = w[dy, xi - xo + 1, ci, co] when the tap
    is in range, else 0: x-taps and x-padding fold into one lane-dense matmul
    per dy.  Cast to bf16 for the fast MXU path (accumulation stays f32).
    """
    _, _, cin, cout = w.shape
    xi = jnp.arange(width)[:, None]
    xo = jnp.arange(width)[None, :]
    dx = xi - xo + 1                                        # (W, W)
    valid = (dx >= 0) & (dx <= 2)
    wt = w[:, jnp.clip(dx, 0, 2)]                           # (3, W, W, Cin, Cout)
    wt = jnp.where(valid[None, :, :, None, None], wt, 0.0)
    wt = wt.transpose(0, 1, 3, 2, 4).reshape(3, width * cin, width * cout)
    return wt.astype(jnp.bfloat16)


def _fold_matrix(width, cout):
    """(W*Cout, W*Cout) 0/1 matrix: 1 iff two lanes hold the same channel."""
    ch = jnp.arange(width * cout) % cout
    return (ch[:, None] == ch[None, :]).astype(jnp.float32)


def vgg_features_fused(x_lane_dense, block_params, *, H, W, cins, couts):
    """Runs the whole [conv3x3 -> BN -> ReLU] * n_blocks stack in one pallas_call."""
    N = x_lane_dense.shape[0]
    kernel = _make_fused_stack_kernel(N, H, W, cins, couts)
    flat_inputs = [x_lane_dense]
    for wt, g_t, b_t, fold in block_params:
        flat_inputs += [wt, g_t, b_t, fold]
    out_shape = tuple(jax.ShapeDtypeStruct((N, H, W * c), jnp.float32)
                      for c in couts)
    # One shared, max-sized bf16 H-pad scratch reused by every block:
    # peak VMEM = max over blocks, not the sum (region-0 flat-sum avoided).
    scratch = [pltpu.VMEM((N, H + 2, W * max(cins)), jnp.bfloat16)]
    # No grid: the toy problem (<2 MiB weights + activations) fits VMEM and BN
    # batch statistics couple the whole batch.
    # TODO(synk): at real VGG sizes use an H-strip grid with
    # dimension_semantics=("parallel",) (v7x 2nd TensorCore) + two-pass BN
    # stats and set pltpu.CompilerParams(vmem_limit_bytes=...) explicitly.
    return pl.pallas_call(
        kernel,
        out_shape=out_shape,
        scratch_shapes=scratch,
    )(*flat_inputs)


# ----------------------------------------------------------------------------
# Parameters + VGG forward (mirrors the PyTorch module's collection logic)
# ----------------------------------------------------------------------------
def init_params(key, in_ch, block_channels):
    """[Conv2d(3x3, pad=1, bias=False) -> BatchNorm2d -> ReLU] parameters.

    Conv bias is omitted: VGG-BN convs use bias=False, and any bias added
    before training-mode BN is cancelled exactly by the batch-mean subtraction.
    """
    params = []
    for cout in block_channels:
        key, kw, kg, kb = jax.random.split(key, 4)
        bound = 1.0 / jnp.sqrt(in_ch * 9)
        w = jax.random.uniform(kw, (3, 3, in_ch, cout), jnp.float32, -bound, bound)
        gamma = 1.0 + 0.1 * jax.random.normal(kg, (cout,), jnp.float32)
        beta = 0.1 * jax.random.normal(kb, (cout,), jnp.float32)
        params.append((w, gamma, beta))
        in_ch = cout
    return params


@functools.partial(jax.jit, static_argnames=("target_layer",))
def vgg_forward(params, x_nchw, target_layer=11):
    """Mirrors VGG.forward.

    Returns (result list, activation at target_layer).  Collected tensors are
    kept in the kernel's lane-dense channel-last layout (N, H, W, C); transpose
    to NCHW downstream only where actually required (saves 4 extra HBM
    read+write round trips per the perf review).
    """
    N, cin0, H, W = x_nchw.shape
    # Pad input channels to a multiple of 8 so block 0's lane dim is 128-dense.
    cin0_p = max(8, ((cin0 + 7) // 8) * 8)

    cins, couts, prepped = [], [], []
    cin = cin0_p
    for bi, (w, gamma, beta) in enumerate(params):
        cout = w.shape[-1]
        if bi == 0 and cin0_p != cin0:
            w = jnp.pad(w, ((0, 0), (0, 0), (0, cin0_p - cin0), (0, 0)))
        cins.append(cin)
        couts.append(cout)
        # Weight / affine / fold layout prep (tiny; could be hoisted to init).
        prepped.append((_toeplitz_weights(w, W),
                        jnp.tile(gamma, W).reshape(1, W * cout),
                        jnp.tile(beta, W).reshape(1, W * cout),
                        _fold_matrix(W, cout)))
        cin = cout

    # NCHW -> lane-dense (N, H, W*C): boundary layout plumbing only.
    x = jnp.transpose(x_nchw, (0, 2, 3, 1))                       # (N, H, W, C)
    if cin0_p != cin0:
        x = jnp.pad(x, ((0, 0), (0, 0), (0, 0), (0, cin0_p - cin0)))
    x = x.reshape(N, H, W * cin0_p)

    outs = vgg_features_fused(x, prepped, H=H, W=W,
                              cins=tuple(cins), couts=tuple(couts))

    result, activation = [], None
    for b, o in enumerate(outs):
        feat_idx = 3 * b + 2                     # index of this block's ReLU
        o_nhwc = o.reshape(N, H, W, couts[b])    # free reshape, layout kept
        if feat_idx == target_layer:
            activation = o_nhwc
            # TODO(synk): register_hook / activations_hook captures autograd
            # gradients; it has no effect on the forward result.
        if feat_idx in COLLECT_AT:
            result.append(o_nhwc)
    return result, activation


# Pure-JAX reference (NCHW), used only to validate the Pallas kernel.  It
# mirrors the kernel's mixed precision: bf16 conv operands, f32 accumulation
# and f32 BatchNorm math.
def ref_forward(params, x_nchw):
    x = x_nchw
    res = []
    for w, gamma, beta in params:
        xq = x.astype(jnp.bfloat16)
        wq = jnp.transpose(w, (3, 2, 0, 1)).astype(jnp.bfloat16)
        y = jax.lax.conv_general_dilated(
            xq, wq, window_strides=(1, 1), padding=((1, 1), (1, 1)),
            dimension_numbers=("NCHW", "OIHW", "NCHW"),
            preferred_element_type=jnp.float32)
        mean = jnp.mean(y, axis=(0, 2, 3), keepdims=True)
        var = jnp.mean(jnp.square(y - mean), axis=(0, 2, 3), keepdims=True)
        y = (y - mean) * jax.lax.rsqrt(var + BN_EPS)
        x = jnp.maximum(y * gamma[None, :, None, None]
                        + beta[None, :, None, None], 0.0)
        res.append(x)
    return res


if __name__ == "__main__":
    key = jax.random.PRNGKey(0)
    N, Cin, H, W = 2, 4, 16, 16
    block_channels = [8, 8, 16, 16]      # 4 conv-bn-relu blocks -> layers 0..11

    key, kx = jax.random.split(key)
    x = jax.random.normal(kx, (N, Cin, H, W), jnp.float32)
    params = init_params(key, Cin, block_channels)

    result, activation = vgg_forward(params, x, target_layer=11)
    result = [jax.block_until_ready(r) for r in result]
    activation = jax.block_until_ready(activation)

    ref = ref_forward(params, x)
    assert len(result) == len(ref)
    for r, rr in zip(result, ref):
        rr_nhwc = jnp.transpose(rr, (0, 2, 3, 1))       # NCHW -> NHWC for compare
        assert r.shape == rr_nhwc.shape and r.dtype == rr_nhwc.dtype
        if not jnp.allclose(r, rr_nhwc, atol=1e-2, rtol=1e-2):
            err = float(jnp.max(jnp.abs(r - rr_nhwc)))
            raise AssertionError(
                f"Pallas output mismatch vs reference (max abs err {err})")
    # activation (target_layer=11) equals the last collected result.
    if not jnp.allclose(activation, result[-1]):
        raise AssertionError("activation capture mismatch")

    print("KERNEL_OK")
</pallas_src>

<mosaic_0001>
module attributes {stable_mosaic.version = 11 : i64} {
  func.func @kernel(%arg0: memref<2x16x128xf32, #tpu.memory_space<vmem>>, %arg1: memref<3x128x128xbf16, #tpu.memory_space<vmem>>, %arg2: memref<1x128xf32, #tpu.memory_space<vmem>>, %arg3: memref<1x128xf32, #tpu.memory_space<vmem>>, %arg4: memref<128x128xf32, #tpu.memory_space<vmem>>, %arg5: memref<3x128x128xbf16, #tpu.memory_space<vmem>>, %arg6: memref<1x128xf32, #tpu.memory_space<vmem>>, %arg7: memref<1x128xf32, #tpu.memory_space<vmem>>, %arg8: memref<128x128xf32, #tpu.memory_space<vmem>>, %arg9: memref<3x128x256xbf16, #tpu.memory_space<vmem>>, %arg10: memref<1x256xf32, #tpu.memory_space<vmem>>, %arg11: memref<1x256xf32, #tpu.memory_space<vmem>>, %arg12: memref<256x256xf32, #tpu.memory_space<vmem>>, %arg13: memref<3x256x256xbf16, #tpu.memory_space<vmem>>, %arg14: memref<1x256xf32, #tpu.memory_space<vmem>>, %arg15: memref<1x256xf32, #tpu.memory_space<vmem>>, %arg16: memref<256x256xf32, #tpu.memory_space<vmem>>, %arg17: memref<2x16x128xf32, #tpu.memory_space<vmem>>, %arg18: memref<2x16x128xf32, #tpu.memory_space<vmem>>, %arg19: memref<2x16x256xf32, #tpu.memory_space<vmem>>, %arg20: memref<2x16x256xf32, #tpu.memory_space<vmem>>, %arg21: memref<2x18x256xbf16, #tpu.memory_space<vmem>>) attributes {dimension_semantics = [], scalar_prefetch = 0 : i64, scratch_operands = 1 : i64, tpu.core_type = #tpu.core_type<tc>} {
    %cst = arith.constant 0.000000e+00 : bf16
    %0 = vector.broadcast %cst : bf16 to vector<2x1x256xbf16>
    %c0 = arith.constant 0 : index
    %c0_0 = arith.constant 0 : index
    %c0_1 = arith.constant 0 : index
    %1 = vector.load %arg21[%c0, %c0_0, %c0_1] : memref<2x18x256xbf16, #tpu.memory_space<vmem>>, vector<2x1x256xbf16>
    tpu.vector_store %arg21[%c0, %c0_0, %c0_1], %0 {strides = array<i32>} : memref<2x18x256xbf16, #tpu.memory_space<vmem>>, vector<2x1x256xbf16>,
    %cst_2 = arith.constant 0.000000e+00 : bf16
    %2 = vector.broadcast %cst_2 : bf16 to vector<2x1x256xbf16>
    %c0_3 = arith.constant 0 : index
    %c17 = arith.constant 17 : index
    %c0_4 = arith.constant 0 : index
    %3 = vector.load %arg21[%c0_3, %c17, %c0_4] : memref<2x18x256xbf16, #tpu.memory_space<vmem>>, vector<2x1x256xbf16>
    tpu.vector_store %arg21[%c0_3, %c17, %c0_4], %2 {strides = array<i32>} : memref<2x18x256xbf16, #tpu.memory_space<vmem>>, vector<2x1x256xbf16>,
    %cst_5 = arith.constant 1.000000e+00 : f32
    %4 = vector.broadcast %cst_5 : f32 to vector<1x32xf32>
    %c0_6 = arith.constant 0 : index
    %c0_7 = arith.constant 0 : index
    %c0_8 = arith.constant 0 : index
    %5 = vector.load %arg0[%c0_6, %c0_7, %c0_8] : memref<2x16x128xf32, #tpu.memory_space<vmem>>, vector<2x16x128xf32>
    %6 = arith.truncf %5 : vector<2x16x128xf32> to vector<2x16x128xbf16>
    %c0_9 = arith.constant 0 : index
    %c1 = arith.constant 1 : index
    %c0_10 = arith.constant 0 : index
    %7 = vector.load %arg21[%c0_9, %c1, %c0_10] : memref<2x18x256xbf16, #tpu.memory_space<vmem>>, vector<2x16x128xbf16>
    tpu.vector_store %arg21[%c0_9, %c1, %c0_10], %6 {strides = array<i32>} : memref<2x18x256xbf16, #tpu.memory_space<vmem>>, vector<2x16x128xbf16>,
    %cst_11 = arith.constant 0.000000e+00 : f32
    %8 = vector.broadcast %cst_11 : f32 to vector<32x128xf32>
    %c0_12 = arith.constant 0 : index
    %c0_13 = arith.constant 0 : index
    %c0_14 = arith.constant 0 : index
    %9 = vector.load %arg21[%c0_12, %c0_13, %c0_14] : memref<2x18x256xbf16, #tpu.memory_space<vmem>>, vector<2x16x128xbf16>
    %10 = vector.shape_cast %9 : vector<2x16x128xbf16> to vector<32x128xbf16>
    %c0_15 = arith.constant 0 : index
    %c0_16 = arith.constant 0 : index
    %c0_17 = arith.constant 0 : index
    %11 = vector.load %arg1[%c0_15, %c0_16, %c0_17] : memref<3x128x128xbf16, #tpu.memory_space<vmem>>, vector<1x128x128xbf16>
    %12 = vector.shape_cast %11 : vector<1x128x128xbf16> to vector<128x128xbf16>
    %cst_18 = arith.constant dense<0.000000e+00> : vector<32x128xf32>
    %13 = tpu.matmul %10, %12, %cst_18 {dimension_numbers = #tpu.dot_dimension_numbers<[1], [0], [0], [1], [0, 0, 1, 1], [], []>} : vector<32x128xbf16>, vector<128x128xbf16>, vector<32x128xf32> -> vector<32x128xf32>
    %14 = arith.addf %8, %13 : vector<32x128xf32>
    %c0_19 = arith.constant 0 : index
    %c1_20 = arith.constant 1 : index
    %c0_21 = arith.constant 0 : index
    %15 = vector.load %arg21[%c0_19, %c1_20, %c0_21] : memref<2x18x256xbf16, #tpu.memory_space<vmem>>, vector<2x16x128xbf16>
    %16 = vector.shape_cast %15 : vector<2x16x128xbf16> to vector<32x128xbf16>
    %c1_22 = arith.constant 1 : index
    %c0_23 = arith.constant 0 : index
    %c0_24 = arith.constant 0 : index
    %17 = vector.load %arg1[%c1_22, %c0_23, %c0_24] : memref<3x128x128xbf16, #tpu.memory_space<vmem>>, vector<1x128x128xbf16>
    %18 = vector.shape_cast %17 : vector<1x128x128xbf16> to vector<128x128xbf16>
    %cst_25 = arith.constant dense<0.000000e+00> : vector<32x128xf32>
    %19 = tpu.matmul %16, %18, %cst_25 {dimension_numbers = #tpu.dot_dimension_numbers<[1], [0], [0], [1], [0, 0, 1, 1], [], []>} : vector<32x128xbf16>, vector<128x128xbf16>, vector<32x128xf32> -> vector<32x128xf32>
    %20 = arith.addf %14, %19 : vector<32x128xf32>
    %c0_26 = arith.constant 0 : index
    %c2 = arith.constant 2 : index
    %c0_27 = arith.constant 0 : index
    %21 = vector.load %arg21[%c0_26, %c2, %c0_27] : memref<2x18x256xbf16, #tpu.memory_space<vmem>>, vector<2x16x128xbf16>
    %22 = vector.shape_cast %21 : vector<2x16x128xbf16> to vector<32x128xbf16>
    %c2_28 = arith.constant 2 : index
    %c0_29 = arith.constant 0 : index
    %c0_30 = arith.constant 0 : index
    %23 = vector.load %arg1[%c2_28, %c0_29, %c0_30] : memref<3x128x128xbf16, #tpu.memory_space<vmem>>, vector<1x128x128xbf16>
    %24 = vector.shape_cast %23 : vector<1x128x128xbf16> to vector<128x128xbf16>
    %cst_31 = arith.constant dense<0.000000e+00> : vector<32x128xf32>
    %25 = tpu.matmul %22, %24, %cst_31 {dimension_numbers = #tpu.dot_dimension_numbers<[1], [0], [0], [1], [0, 0, 1, 1], [], []>} : vector<32x128xbf16>, vector<128x128xbf16>, vector<32x128xf32> -> vector<32x128xf32>
    %26 = arith.addf %20, %25 : vector<32x128xf32>
    %cst_32 = arith.constant dense<0.000000e+00> : vector<1x128xf32>
    %27 = tpu.matmul %4, %26, %cst_32 {dimension_numbers = #tpu.dot_dimension_numbers<[1], [0], [0], [1], [0, 0, 1, 1], [], []>} : vector<1x32xf32>, vector<32x128xf32>, vector<1x128xf32> -> vector<1x128xf32>
    %28 = arith.mulf %26, %26 : vector<32x128xf32>
    %cst_33 = arith.constant dense<0.000000e+00> : vector<1x128xf32>
    %29 = tpu.matmul %4, %28, %cst_33 {dimension_numbers = #tpu.dot_dimension_numbers<[1], [0], [0], [1], [0, 0, 1, 1], [], []>} : vector<1x32xf32>, vector<32x128xf32>, vector<1x128xf32> -> vector<1x128xf32>
    %c0_34 = arith.constant 0 : index
    %c0_35 = arith.constant 0 : index
    %30 = vector.load %arg4[%c0_34, %c0_35] : memref<128x128xf32, #tpu.memory_space<vmem>>, vector<128x128xf32>
    %cst_36 = arith.constant dense<0.000000e+00> : vector<1x128xf32>
    %31 = tpu.matmul %27, %30, %cst_36 {dimension_numbers = #tpu.dot_dimension_numbers<[1], [0], [0], [1], [0, 0, 1, 1], [], []>} : vector<1x128xf32>, vector<128x128xf32>, vector<1x128xf32> -> vector<1x128xf32>
    %c0_37 = arith.constant 0 : index
    %c0_38 = arith.constant 0 : index
    %32 = vector.load %arg4[%c0_37, %c0_38] : memref<128x128xf32, #tpu.memory_space<vmem>>, vector<128x128xf32>
    %cst_39 = arith.constant dense<0.000000e+00> : vector<1x128xf32>
    %33 = tpu.matmul %29, %32, %cst_39 {dimension_numbers = #tpu.dot_dimension_numbers<[1], [0], [0], [1], [0, 0, 1, 1], [], []>} : vector<1x128xf32>, vector<128x128xf32>, vector<1x128xf32> -> vector<1x128xf32>
    %cst_40 = arith.constant 5.120000e+02 : f32
    %34 = vector.broadcast %cst_40 : f32 to vector<1x128xf32>
    %35 = arith.divf %31, %34 : vector<1x128xf32>
    %cst_41 = arith.constant 5.120000e+02 : f32
    %36 = vector.broadcast %cst_41 : f32 to vector<1x128xf32>
    %37 = arith.divf %33, %36 : vector<1x128xf32>
    %38 = arith.mulf %35, %35 : vector<1x128xf32>
    %39 = arith.subf %37, %38 : vector<1x128xf32>
    %cst_42 = arith.constant 0.000000e+00 : f32
    %40 = vector.broadcast %cst_42 : f32 to vector<1x128xf32>
    %41 = arith.maximumf %39, %40 : vector<1x128xf32>
    %cst_43 = arith.constant 9.99999974E-6 : f32
    %42 = vector.broadcast %cst_43 : f32 to vector<1x128xf32>
    %43 = arith.addf %41, %42 : vector<1x128xf32>
    %44 = math.rsqrt %43 : vector<1x128xf32>
    %c0_44 = arith.constant 0 : index
    %c0_45 = arith.constant 0 : index
    %45 = vector.load %arg2[%c0_44, %c0_45] : memref<1x128xf32, #tpu.memory_space<vmem>>, vector<1x128xf32>
    %46 = arith.mulf %45, %44 : vector<1x128xf32>
    %c0_46 = arith.constant 0 : index
    %c0_47 = arith.constant 0 : index
    %47 = vector.load %arg3[%c0_46, %c0_47] : memref<1x128xf32, #tpu.memory_space<vmem>>, vector<1x128xf32>
    %48 = arith.mulf %35, %46 : vector<1x128xf32>
    %49 = arith.subf %47, %48 : vector<1x128xf32>
    %50 = vector.broadcast %46 : vector<1x128xf32> to vector<32x128xf32>
    %51 = arith.mulf %26, %50 : vector<32x128xf32>
    %52 = vector.broadcast %49 : vector<1x128xf32> to vector<32x128xf32>
    %53 = arith.addf %51, %52 : vector<32x128xf32>
    %cst_48 = arith.constant 0.000000e+00 : f32
    %54 = vector.broadcast %cst_48 : f32 to vector<32x128xf32>
    %55 = arith.maximumf %53, %54 : vector<32x128xf32>
    %56 = vector.shape_cast %55 : vector<32x128xf32> to vector<2x16x128xf32>
    %c0_49 = arith.constant 0 : index
    %c0_50 = arith.constant 0 : index
    %c0_51 = arith.constant 0 : index
    %57 = vector.load %arg17[%c0_49, %c0_50, %c0_51] : memref<2x16x128xf32, #tpu.memory_space<vmem>>, vector<2x16x128xf32>
    tpu.vector_store %arg17[%c0_49, %c0_50, %c0_51], %56 {strides = array<i32>} : memref<2x16x128xf32, #tpu.memory_space<vmem>>, vector<2x16x128xf32>,
    %58 = arith.truncf %56 : vector<2x16x128xf32> to vector<2x16x128xbf16>
    %c0_52 = arith.constant 0 : index
    %c1_53 = arith.constant 1 : index
    %c0_54 = arith.constant 0 : index
    %59 = vector.load %arg21[%c0_52, %c1_53, %c0_54] : memref<2x18x256xbf16, #tpu.memory_space<vmem>>, vector<2x16x128xbf16>
    tpu.vector_store %arg21[%c0_52, %c1_53, %c0_54], %58 {strides = array<i32>} : memref<2x18x256xbf16, #tpu.memory_space<vmem>>, vector<2x16x128xbf16>,
    %cst_55 = arith.constant 0.000000e+00 : f32
    %60 = vector.broadcast %cst_55 : f32 to vector<32x128xf32>
    %c0_56 = arith.constant 0 : index
    %c0_57 = arith.constant 0 : index
    %c0_58 = arith.constant 0 : index
    %61 = vector.load %arg21[%c0_56, %c0_57, %c0_58] : memref<2x18x256xbf16, #tpu.memory_space<vmem>>, vector<2x16x128xbf16>
    %62 = vector.shape_cast %61 : vector<2x16x128xbf16> to vector<32x128xbf16>
    %c0_59 = arith.constant 0 : index
    %c0_60 = arith.constant 0 : index
    %c0_61 = arith.constant 0 : index
    %63 = vector.load %arg5[%c0_59, %c0_60, %c0_61] : memref<3x128x128xbf16, #tpu.memory_space<vmem>>, vector<1x128x128xbf16>
    %64 = vector.shape_cast %63 : vector<1x128x128xbf16> to vector<128x128xbf16>
    %cst_62 = arith.constant dense<0.000000e+00> : vector<32x128xf32>
    %65 = tpu.matmul %62, %64, %cst_62 {dimension_numbers = #tpu.dot_dimension_numbers<[1], [0], [0], [1], [0, 0, 1, 1], [], []>} : vector<32x128xbf16>, vector<128x128xbf16>, vector<32x128xf32> -> vector<32x128xf32>
    %66 = arith.addf %60, %65 : vector<32x128xf32>
    %c0_63 = arith.constant 0 : index
    %c1_64 = arith.constant 1 : index
    %c0_65 = arith.constant 0 : index
    %67 = vector.load %arg21[%c0_63, %c1_64, %c0_65] : memref<2x18x256xbf16, #tpu.memory_space<vmem>>, vector<2x16x128xbf16>
    %68 = vector.shape_cast %67 : vector<2x16x128xbf16> to vector<32x128xbf16>
    %c1_66 = arith.constant 1 : index
    %c0_67 = arith.constant 0 : index
    %c0_68 = arith.constant 0 : index
    %69 = vector.load %arg5[%c1_66, %c0_67, %c0_68] : memref<3x128x128xbf16, #tpu.memory_space<vmem>>, vector<1x128x128xbf16>
    %70 = vector.shape_cast %69 : vector<1x128x128xbf16> to vector<128x128xbf16>
    %cst_69 = arith.constant dense<0.000000e+00> : vector<32x128xf32>
    %71 = tpu.matmul %68, %70, %cst_69 {dimension_numbers = #tpu.dot_dimension_numbers<[1], [0], [0], [1], [0, 0, 1, 1], [], []>} : vector<32x128xbf16>, vector<128x128xbf16>, vector<32x128xf32> -> vector<32x128xf32>
    %72 = arith.addf %66, %71 : vector<32x128xf32>
    %c0_70 = arith.constant 0 : index
    %c2_71 = arith.constant 2 : index
    %c0_72 = arith.constant 0 : index
    %73 = vector.load %arg21[%c0_70, %c2_71, %c0_72] : memref<2x18x256xbf16, #tpu.memory_space<vmem>>, vector<2x16x128xbf16>
    %74 = vector.shape_cast %73 : vector<2x16x128xbf16> to vector<32x128xbf16>
    %c2_73 = arith.constant 2 : index
    %c0_74 = arith.constant 0 : index
    %c0_75 = arith.constant 0 : index
    %75 = vector.load %arg5[%c2_73, %c0_74, %c0_75] : memref<3x128x128xbf16, #tpu.memory_space<vmem>>, vector<1x128x128xbf16>
    %76 = vector.shape_cast %75 : vector<1x128x128xbf16> to vector<128x128xbf16>
    %cst_76 = arith.constant dense<0.000000e+00> : vector<32x128xf32>
    %77 = tpu.matmul %74, %76, %cst_76 {dimension_numbers = #tpu.dot_dimension_numbers<[1], [0], [0], [1], [0, 0, 1, 1], [], []>} : vector<32x128xbf16>, vector<128x128xbf16>, vector<32x128xf32> -> vector<32x128xf32>
    %78 = arith.addf %72, %77 : vector<32x128xf32>
    %cst_77 = arith.constant dense<0.000000e+00> : vector<1x128xf32>
    %79 = tpu.matmul %4, %78, %cst_77 {dimension_numbers = #tpu.dot_dimension_numbers<[1], [0], [0], [1], [0, 0, 1, 1], [], []>} : vector<1x32xf32>, vector<32x128xf32>, vector<1x128xf32> -> vector<1x128xf32>
    %80 = arith.mulf %78, %78 : vector<32x128xf32>
    %cst_78 = arith.constant dense<0.000000e+00> : vector<1x128xf32>
    %81 = tpu.matmul %4, %80, %cst_78 {dimension_numbers = #tpu.dot_dimension_numbers<[1], [0], [0], [1], [0, 0, 1, 1], [], []>} : vector<1x32xf32>, vector<32x128xf32>, vector<1x128xf32> -> vector<1x128xf32>
    %c0_79 = arith.constant 0 : index
    %c0_80 = arith.constant 0 : index
    %82 = vector.load %arg8[%c0_79, %c0_80] : memref<128x128xf32, #tpu.memory_space<vmem>>, vector<128x128xf32>
    %cst_81 = arith.constant dense<0.000000e+00> : vector<1x128xf32>
    %83 = tpu.matmul %79, %82, %cst_81 {dimension_numbers = #tpu.dot_dimension_numbers<[1], [0], [0], [1], [0, 0, 1, 1], [], []>} : vector<1x128xf32>, vector<128x128xf32>, vector<1x128xf32> -> vector<1x128xf32>
    %c0_82 = arith.constant 0 : index
    %c0_83 = arith.constant 0 : index
    %84 = vector.load %arg8[%c0_82, %c0_83] : memref<128x128xf32, #tpu.memory_space<vmem>>, vector<128x128xf32>
    %cst_84 = arith.constant dense<0.000000e+00> : vector<1x128xf32>
    %85 = tpu.matmul %81, %84, %cst_84 {dimension_numbers = #tpu.dot_dimension_numbers<[1], [0], [0], [1], [0, 0, 1, 1], [], []>} : vector<1x128xf32>, vector<128x128xf32>, vector<1x128xf32> -> vector<1x128xf32>
    %cst_85 = arith.constant 5.120000e+02 : f32
    %86 = vector.broadcast %cst_85 : f32 to vector<1x128xf32>
    %87 = arith.divf %83, %86 : vector<1x128xf32>
    %cst_86 = arith.constant 5.120000e+02 : f32
    %88 = vector.broadcast %cst_86 : f32 to vector<1x128xf32>
    %89 = arith.divf %85, %88 : vector<1x128xf32>
    %90 = arith.mulf %87, %87 : vector<1x128xf32>
    %91 = arith.subf %89, %90 : vector<1x128xf32>
    %cst_87 = arith.constant 0.000000e+00 : f32
    %92 = vector.broadcast %cst_87 : f32 to vector<1x128xf32>
    %93 = arith.maximumf %91, %92 : vector<1x128xf32>
    %cst_88 = arith.constant 9.99999974E-6 : f32
    %94 = vector.broadcast %cst_88 : f32 to vector<1x128xf32>
    %95 = arith.addf %93, %94 : vector<1x128xf32>
    %96 = math.rsqrt %95 : vector<1x128xf32>
    %c0_89 = arith.constant 0 : index
    %c0_90 = arith.constant 0 : index
    %97 = vector.load %arg6[%c0_89, %c0_90] : memref<1x128xf32, #tpu.memory_space<vmem>>, vector<1x128xf32>
    %98 = arith.mulf %97, %96 : vector<1x128xf32>
    %c0_91 = arith.constant 0 : index
    %c0_92 = arith.constant 0 : index
    %99 = vector.load %arg7[%c0_91, %c0_92] : memref<1x128xf32, #tpu.memory_space<vmem>>, vector<1x128xf32>
    %100 = arith.mulf %87, %98 : vector<1x128xf32>
    %101 = arith.subf %99, %100 : vector<1x128xf32>
    %102 = vector.broadcast %98 : vector<1x128xf32> to vector<32x128xf32>
    %103 = arith.mulf %78, %102 : vector<32x128xf32>
    %104 = vector.broadcast %101 : vector<1x128xf32> to vector<32x128xf32>
    %105 = arith.addf %103, %104 : vector<32x128xf32>
    %cst_93 = arith.constant 0.000000e+00 : f32
    %106 = vector.broadcast %cst_93 : f32 to vector<32x128xf32>
    %107 = arith.maximumf %105, %106 : vector<32x128xf32>
    %108 = vector.shape_cast %107 : vector<32x128xf32> to vector<2x16x128xf32>
    %c0_94 = arith.constant 0 : index
    %c0_95 = arith.constant 0 : index
    %c0_96 = arith.constant 0 : index
    %109 = vector.load %arg18[%c0_94, %c0_95, %c0_96] : memref<2x16x128xf32, #tpu.memory_space<vmem>>, vector<2x16x128xf32>
    tpu.vector_store %arg18[%c0_94, %c0_95, %c0_96], %108 {strides = array<i32>} : memref<2x16x128xf32, #tpu.memory_space<vmem>>, vector<2x16x128xf32>,
    %110 = arith.truncf %108 : vector<2x16x128xf32> to vector<2x16x128xbf16>
    %c0_97 = arith.constant 0 : index
    %c1_98 = arith.constant 1 : index
    %c0_99 = arith.constant 0 : index
    %111 = vector.load %arg21[%c0_97, %c1_98, %c0_99] : memref<2x18x256xbf16, #tpu.memory_space<vmem>>, vector<2x16x128xbf16>
    tpu.vector_store %arg21[%c0_97, %c1_98, %c0_99], %110 {strides = array<i32>} : memref<2x18x256xbf16, #tpu.memory_space<vmem>>, vector<2x16x128xbf16>,
    %cst_100 = arith.constant 0.000000e+00 : f32
    %112 = vector.broadcast %cst_100 : f32 to vector<32x256xf32>
    %c0_101 = arith.constant 0 : index
    %c0_102 = arith.constant 0 : index
    %c0_103 = arith.constant 0 : index
    %113 = vector.load %arg21[%c0_101, %c0_102, %c0_103] : memref<2x18x256xbf16, #tpu.memory_space<vmem>>, vector<2x16x128xbf16>
    %114 = vector.shape_cast %113 : vector<2x16x128xbf16> to vector<32x128xbf16>
    %c0_104 = arith.constant 0 : index
    %c0_105 = arith.constant 0 : index
    %c0_106 = arith.constant 0 : index
    %115 = vector.load %arg9[%c0_104, %c0_105, %c0_106] : memref<3x128x256xbf16, #tpu.memory_space<vmem>>, vector<1x128x256xbf16>
    %116 = vector.shape_cast %115 : vector<1x128x256xbf16> to vector<128x256xbf16>
    %cst_107 = arith.constant dense<0.000000e+00> : vector<32x256xf32>
    %117 = tpu.matmul %114, %116, %cst_107 {dimension_numbers = #tpu.dot_dimension_numbers<[1], [0], [0], [1], [0, 0, 1, 1], [], []>} : vector<32x128xbf16>, vector<128x256xbf16>, vector<32x256xf32> -> vector<32x256xf32>
    %118 = arith.addf %112, %117 : vector<32x256xf32>
    %c0_108 = arith.constant 0 : index
    %c1_109 = arith.constant 1 : index
    %c0_110 = arith.constant 0 : index
    %119 = vector.load %arg21[%c0_108, %c1_109, %c0_110] : memref<2x18x256xbf16, #tpu.memory_space<vmem>>, vector<2x16x128xbf16>
    %120 = vector.shape_cast %119 : vector<2x16x128xbf16> to vector<32x128xbf16>
    %c1_111 = arith.constant 1 : index
    %c0_112 = arith.constant 0 : index
    %c0_113 = arith.constant 0 : index
    %121 = vector.load %arg9[%c1_111, %c0_112, %c0_113] : memref<3x128x256xbf16, #tpu.memory_space<vmem>>, vector<1x128x256xbf16>
    %122 = vector.shape_cast %121 : vector<1x128x256xbf16> to vector<128x256xbf16>
    %cst_114 = arith.constant dense<0.000000e+00> : vector<32x256xf32>
    %123 = tpu.matmul %120, %122, %cst_114 {dimension_numbers = #tpu.dot_dimension_numbers<[1], [0], [0], [1], [0, 0, 1, 1], [], []>} : vector<32x128xbf16>, vector<128x256xbf16>, vector<32x256xf32> -> vector<32x256xf32>
    %124 = arith.addf %118, %123 : vector<32x256xf32>
    %c0_115 = arith.constant 0 : index
    %c2_116 = arith.constant 2 : index
    %c0_117 = arith.constant 0 : index
    %125 = vector.load %arg21[%c0_115, %c2_116, %c0_117] : memref<2x18x256xbf16, #tpu.memory_space<vmem>>, vector<2x16x128xbf16>
    %126 = vector.shape_cast %125 : vector<2x16x128xbf16> to vector<32x128xbf16>
    %c2_118 = arith.constant 2 : index
    %c0_119 = arith.constant 0 : index
    %c0_120 = arith.constant 0 : index
    %127 = vector.load %arg9[%c2_118, %c0_119, %c0_120] : memref<3x128x256xbf16, #tpu.memory_space<vmem>>, vector<1x128x256xbf16>
    %128 = vector.shape_cast %127 : vector<1x128x256xbf16> to vector<128x256xbf16>
    %cst_121 = arith.constant dense<0.000000e+00> : vector<32x256xf32>
    %129 = tpu.matmul %126, %128, %cst_121 {dimension_numbers = #tpu.dot_dimension_numbers<[1], [0], [0], [1], [0, 0, 1, 1], [], []>} : vector<32x128xbf16>, vector<128x256xbf16>, vector<32x256xf32> -> vector<32x256xf32>
    %130 = arith.addf %124, %129 : vector<32x256xf32>
    %cst_122 = arith.constant dense<0.000000e+00> : vector<1x256xf32>
    %131 = tpu.matmul %4, %130, %cst_122 {dimension_numbers = #tpu.dot_dimension_numbers<[1], [0], [0], [1], [0, 0, 1, 1], [], []>} : vector<1x32xf32>, vector<32x256xf32>, vector<1x256xf32> -> vector<1x256xf32>
    %132 = arith.mulf %130, %130 : vector<32x256xf32>
    %cst_123 = arith.constant dense<0.000000e+00> : vector<1x256xf32>
    %133 = tpu.matmul %4, %132, %cst_123 {dimension_numbers = #tpu.dot_dimension_numbers<[1], [0], [0], [1], [0, 0, 1, 1], [], []>} : vector<1x32xf32>, vector<32x256xf32>, vector<1x256xf32> -> vector<1x256xf32>
    %c0_124 = arith.constant 0 : index
    %c0_125 = arith.constant 0 : index
    %134 = vector.load %arg12[%c0_124, %c0_125] : memref<256x256xf32, #tpu.memory_space<vmem>>, vector<256x256xf32>
    %cst_126 = arith.constant dense<0.000000e+00> : vector<1x256xf32>
    %135 = tpu.matmul %131, %134, %cst_126 {dimension_numbers = #tpu.dot_dimension_numbers<[1], [0], [0], [1], [0, 0, 1, 1], [], []>} : vector<1x256xf32>, vector<256x256xf32>, vector<1x256xf32> -> vector<1x256xf32>
    %c0_127 = arith.constant 0 : index
    %c0_128 = arith.constant 0 : index
    %136 = vector.load %arg12[%c0_127, %c0_128] : memref<256x256xf32, #tpu.memory_space<vmem>>, vector<256x256xf32>
    %cst_129 = arith.constant dense<0.000000e+00> : vector<1x256xf32>
    %137 = tpu.matmul %133, %136, %cst_129 {dimension_numbers = #tpu.dot_dimension_numbers<[1], [0], [0], [1], [0, 0, 1, 1], [], []>} : vector<1x256xf32>, vector<256x256xf32>, vector<1x256xf32> -> vector<1x256xf32>
    %cst_130 = arith.constant 5.120000e+02 : f32
    %138 = vector.broadcast %cst_130 : f32 to vector<1x256xf32>
    %139 = arith.divf %135, %138 : vector<1x256xf32>
    %cst_131 = arith.constant 5.120000e+02 : f32
    %140 = vector.broadcast %cst_131 : f32 to vector<1x256xf32>
    %141 = arith.divf %137, %140 : vector<1x256xf32>
    %142 = arith.mulf %139, %139 : vector<1x256xf32>
    %143 = arith.subf %141, %142 : vector<1x256xf32>
    %cst_132 = arith.constant 0.000000e+00 : f32
    %144 = vector.broadcast %cst_132 : f32 to vector<1x256xf32>
    %145 = arith.maximumf %143, %144 : vector<1x256xf32>
    %cst_133 = arith.constant 9.99999974E-6 : f32
    %146 = vector.broadcast %cst_133 : f32 to vector<1x256xf32>
    %147 = arith.addf %145, %146 : vector<1x256xf32>
    %148 = math.rsqrt %147 : vector<1x256xf32>
    %c0_134 = arith.constant 0 : index
    %c0_135 = arith.constant 0 : index
    %149 = vector.load %arg10[%c0_134, %c0_135] : memref<1x256xf32, #tpu.memory_space<vmem>>, vector<1x256xf32>
    %150 = arith.mulf %149, %148 : vector<1x256xf32>
    %c0_136 = arith.constant 0 : index
    %c0_137 = arith.constant 0 : index
    %151 = vector.load %arg11[%c0_136, %c0_137] : memref<1x256xf32, #tpu.memory_space<vmem>>, vector<1x256xf32>
    %152 = arith.mulf %139, %150 : vector<1x256xf32>
    %153 = arith.subf %151, %152 : vector<1x256xf32>
    %154 = vector.broadcast %150 : vector<1x256xf32> to vector<32x256xf32>
    %155 = arith.mulf %130, %154 : vector<32x256xf32>
    %156 = vector.broadcast %153 : vector<1x256xf32> to vector<32x256xf32>
    %157 = arith.addf %155, %156 : vector<32x256xf32>
    %cst_138 = arith.constant 0.000000e+00 : f32
    %158 = vector.broadcast %cst_138 : f32 to vector<32x256xf32>
    %159 = arith.maximumf %157, %158 : vector<32x256xf32>
    %160 = vector.shape_cast %159 : vector<32x256xf32> to vector<2x16x256xf32>
    %c0_139 = arith.constant 0 : index
    %c0_140 = arith.constant 0 : index
    %c0_141 = arith.constant 0 : index
    %161 = vector.load %arg19[%c0_139, %c0_140, %c0_141] : memref<2x16x256xf32, #tpu.memory_space<vmem>>, vector<2x16x256xf32>
    tpu.vector_store %arg19[%c0_139, %c0_140, %c0_141], %160 {strides = array<i32>} : memref<2x16x256xf32, #tpu.memory_space<vmem>>, vector<2x16x256xf32>,
    %162 = arith.truncf %160 : vector<2x16x256xf32> to vector<2x16x256xbf16>
    %c0_142 = arith.constant 0 : index
    %c1_143 = arith.constant 1 : index
    %c0_144 = arith.constant 0 : index
    %163 = vector.load %arg21[%c0_142, %c1_143, %c0_144] : memref<2x18x256xbf16, #tpu.memory_space<vmem>>, vector<2x16x256xbf16>
    tpu.vector_store %arg21[%c0_142, %c1_143, %c0_144], %162 {strides = array<i32>} : memref<2x18x256xbf16, #tpu.memory_space<vmem>>, vector<2x16x256xbf16>,
    %cst_145 = arith.constant 0.000000e+00 : f32
    %164 = vector.broadcast %cst_145 : f32 to vector<32x256xf32>
    %c0_146 = arith.constant 0 : index
    %c0_147 = arith.constant 0 : index
    %c0_148 = arith.constant 0 : index
    %165 = vector.load %arg21[%c0_146, %c0_147, %c0_148] : memref<2x18x256xbf16, #tpu.memory_space<vmem>>, vector<2x16x256xbf16>
    %166 = vector.shape_cast %165 : vector<2x16x256xbf16> to vector<32x256xbf16>
    %c0_149 = arith.constant 0 : index
    %c0_150 = arith.constant 0 : index
    %c0_151 = arith.constant 0 : index
    %167 = vector.load %arg13[%c0_149, %c0_150, %c0_151] : memref<3x256x256xbf16, #tpu.memory_space<vmem>>, vector<1x256x256xbf16>
    %168 = vector.shape_cast %167 : vector<1x256x256xbf16> to vector<256x256xbf16>
    %cst_152 = arith.constant dense<0.000000e+00> : vector<32x256xf32>
    %169 = tpu.matmul %166, %168, %cst_152 {dimension_numbers = #tpu.dot_dimension_numbers<[1], [0], [0], [1], [0, 0, 1, 1], [], []>} : vector<32x256xbf16>, vector<256x256xbf16>, vector<32x256xf32> -> vector<32x256xf32>
    %170 = arith.addf %164, %169 : vector<32x256xf32>
    %c0_153 = arith.constant 0 : index
    %c1_154 = arith.constant 1 : index
    %c0_155 = arith.constant 0 : index
    %171 = vector.load %arg21[%c0_153, %c1_154, %c0_155] : memref<2x18x256xbf16, #tpu.memory_space<vmem>>, vector<2x16x256xbf16>
    %172 = vector.shape_cast %171 : vector<2x16x256xbf16> to vector<32x256xbf16>
    %c1_156 = arith.constant 1 : index
    %c0_157 = arith.constant 0 : index
    %c0_158 = arith.constant 0 : index
    %173 = vector.load %arg13[%c1_156, %c0_157, %c0_158] : memref<3x256x256xbf16, #tpu.memory_space<vmem>>, vector<1x256x256xbf16>
    %174 = vector.shape_cast %173 : vector<1x256x256xbf16> to vector<256x256xbf16>
    %cst_159 = arith.constant dense<0.000000e+00> : vector<32x256xf32>
    %175 = tpu.matmul %172, %174, %cst_159 {dimension_numbers = #tpu.dot_dimension_numbers<[1], [0], [0], [1], [0, 0, 1, 1], [], []>} : vector<32x256xbf16>, vector<256x256xbf16>, vector<32x256xf32> -> vector<32x256xf32>
    %176 = arith.addf %170, %175 : vector<32x256xf32>
    %c0_160 = arith.constant 0 : index
    %c2_161 = arith.constant 2 : index
    %c0_162 = arith.constant 0 : index
    %177 = vector.load %arg21[%c0_160, %c2_161, %c0_162] : memref<2x18x256xbf16, #tpu.memory_space<vmem>>, vector<2x16x256xbf16>
    %178 = vector.shape_cast %177 : vector<2x16x256xbf16> to vector<32x256xbf16>
    %c2_163 = arith.constant 2 : index
    %c0_164 = arith.constant 0 : index
    %c0_165 = arith.constant 0 : index
    %179 = vector.load %arg13[%c2_163, %c0_164, %c0_165] : memref<3x256x256xbf16, #tpu.memory_space<vmem>>, vector<1x256x256xbf16>
    %180 = vector.shape_cast %179 : vector<1x256x256xbf16> to vector<256x256xbf16>
    %cst_166 = arith.constant dense<0.000000e+00> : vector<32x256xf32>
    %181 = tpu.matmul %178, %180, %cst_166 {dimension_numbers = #tpu.dot_dimension_numbers<[1], [0], [0], [1], [0, 0, 1, 1], [], []>} : vector<32x256xbf16>, vector<256x256xbf16>, vector<32x256xf32> -> vector<32x256xf32>
    %182 = arith.addf %176, %181 : vector<32x256xf32>
    %cst_167 = arith.constant dense<0.000000e+00> : vector<1x256xf32>
    %183 = tpu.matmul %4, %182, %cst_167 {dimension_numbers = #tpu.dot_dimension_numbers<[1], [0], [0], [1], [0, 0, 1, 1], [], []>} : vector<1x32xf32>, vector<32x256xf32>, vector<1x256xf32> -> vector<1x256xf32>
    %184 = arith.mulf %182, %182 : vector<32x256xf32>
    %cst_168 = arith.constant dense<0.000000e+00> : vector<1x256xf32>
    %185 = tpu.matmul %4, %184, %cst_168 {dimension_numbers = #tpu.dot_dimension_numbers<[1], [0], [0], [1], [0, 0, 1, 1], [], []>} : vector<1x32xf32>, vector<32x256xf32>, vector<1x256xf32> -> vector<1x256xf32>
    %c0_169 = arith.constant 0 : index
    %c0_170 = arith.constant 0 : index
    %186 = vector.load %arg16[%c0_169, %c0_170] : memref<256x256xf32, #tpu.memory_space<vmem>>, vector<256x256xf32>
    %cst_171 = arith.constant dense<0.000000e+00> : vector<1x256xf32>
    %187 = tpu.matmul %183, %186, %cst_171 {dimension_numbers = #tpu.dot_dimension_numbers<[1], [0], [0], [1], [0, 0, 1, 1], [], []>} : vector<1x256xf32>, vector<256x256xf32>, vector<1x256xf32> -> vector<1x256xf32>
    %c0_172 = arith.constant 0 : index
    %c0_173 = arith.constant 0 : index
    %188 = vector.load %arg16[%c0_172, %c0_173] : memref<256x256xf32, #tpu.memory_space<vmem>>, vector<256x256xf32>
    %cst_174 = arith.constant dense<0.000000e+00> : vector<1x256xf32>
    %189 = tpu.matmul %185, %188, %cst_174 {dimension_numbers = #tpu.dot_dimension_numbers<[1], [0], [0], [1], [0, 0, 1, 1], [], []>} : vector<1x256xf32>, vector<256x256xf32>, vector<1x256xf32> -> vector<1x256xf32>
    %cst_175 = arith.constant 5.120000e+02 : f32
    %190 = vector.broadcast %cst_175 : f32 to vector<1x256xf32>
    %191 = arith.divf %187, %190 : vector<1x256xf32>
    %cst_176 = arith.constant 5.120000e+02 : f32
    %192 = vector.broadcast %cst_176 : f32 to vector<1x256xf32>
    %193 = arith.divf %189, %192 : vector<1x256xf32>
    %194 = arith.mulf %191, %191 : vector<1x256xf32>
    %195 = arith.subf %193, %194 : vector<1x256xf32>
    %cst_177 = arith.constant 0.000000e+00 : f32
    %196 = vector.broadcast %cst_177 : f32 to vector<1x256xf32>
    %197 = arith.maximumf %195, %196 : vector<1x256xf32>
    %cst_178 = arith.constant 9.99999974E-6 : f32
    %198 = vector.broadcast %cst_178 : f32 to vector<1x256xf32>
    %199 = arith.addf %197, %198 : vector<1x256xf32>
    %200 = math.rsqrt %199 : vector<1x256xf32>
    %c0_179 = arith.constant 0 : index
    %c0_180 = arith.constant 0 : index
    %201 = vector.load %arg14[%c0_179, %c0_180] : memref<1x256xf32, #tpu.memory_space<vmem>>, vector<1x256xf32>
    %202 = arith.mulf %201, %200 : vector<1x256xf32>
    %c0_181 = arith.constant 0 : index
    %c0_182 = arith.constant 0 : index
    %203 = vector.load %arg15[%c0_181, %c0_182] : memref<1x256xf32, #tpu.memory_space<vmem>>, vector<1x256xf32>
    %204 = arith.mulf %191, %202 : vector<1x256xf32>
    %205 = arith.subf %203, %204 : vector<1x256xf32>
    %206 = vector.broadcast %202 : vector<1x256xf32> to vector<32x256xf32>
    %207 = arith.mulf %182, %206 : vector<32x256xf32>
    %208 = vector.broadcast %205 : vector<1x256xf32> to vector<32x256xf32>
    %209 = arith.addf %207, %208 : vector<32x256xf32>
    %cst_183 = arith.constant 0.000000e+00 : f32
    %210 = vector.broadcast %cst_183 : f32 to vector<32x256xf32>
    %211 = arith.maximumf %209, %210 : vector<32x256xf32>
    %212 = vector.shape_cast %211 : vector<32x256xf32> to vector<2x16x256xf32>
    %c0_184 = arith.constant 0 : index
    %c0_185 = arith.constant 0 : index
    %c0_186 = arith.constant 0 : index
    %213 = vector.load %arg20[%c0_184, %c0_185, %c0_186] : memref<2x16x256xf32, #tpu.memory_space<vmem>>, vector<2x16x256xf32>
    tpu.vector_store %arg20[%c0_184, %c0_185, %c0_186], %212 {strides = array<i32>} : memref<2x16x256xf32, #tpu.memory_space<vmem>>, vector<2x16x256xf32>,
    return
  }
}

</mosaic_0001>

<bundles_post_ra>
// kernel: tile.63
= control target key start
LH: loop header
LB: loop body
LE: loop exit
PB: predicated region body
PF: predicated region fallthrough
CT: control target
= control target key end

     0   :  { %s28_s0 = inlined_call_operand.vmem [shape: f32[16], index: 0, kind: input, shape index: {}]   ;;  %s29_s1 = inlined_call_operand.vmem [shape: f32[16,16], index: 1, kind: output, shape index: {}]  }
   0x1   :  { %v4_v0 = vld [vmem:[%s28_s0] ss:$0 sm:$0xff] }
   0x2   :  { %5 = vst [vmem:[%s29_s1] sm:$0xff] %v4_v0  ;;  %8 = vst [vmem:[%s29_s1 + $0x8] sm:$0xff] %v4_v0 }

// kernel: tile.64
= control target key start
LH: loop header
LB: loop body
LE: loop exit
PB: predicated region body
PF: predicated region fallthrough
CT: control target
= control target key end

     0   :  { %s7_s6 = smov 3  ;;  %s21_s9 = smov 3  ;;  %vm4_vm0 = vcmask 130048   ;;  %vm11_vm1 = vcmask 1048448   ;;  %vm18_vm2 = vcmask 917248   ;;  %vm25_vm3 = vcmask 786048   ;;  %s131_s0 = inlined_call_operand.vmem [shape: f32[16,16], index: 0, kind: input, shape index: {}]   ;;  %s132_s1 = inlined_call_operand.vmem [shape: f32[1,256], index: 1, kind: output, shape index: {}]  }
   0x1   :  { %v69_v0 = vld [vmem:[%s131_s0 + $0x7] ss:$8 sm:%s7_s6]   ;;  %s84_s10 = smov 112   ;;  %v71_v1 = vld [vmem:[%s131_s0 + $0x5] ss:$8 sm:%s21_s9]   ;;  %s14_s13 = smov 3 }
   0x2   :  { %9 = vrot.lane.b32.xlu0 %v69_v0, %s84_s10  ;;  %s85_s14 = smov 80   ;;  %v70_v2 = vld [vmem:[%s131_s0 + $0x6] ss:$8 sm:%s14_s13]   ;;  %s28_s17 = smov 3  ;;  %vm32_vm4 = vcmask 654848   ;;  %vm39_vm5 = vcmask 523648  }
   0x3   :  { %23 = vrot.lane.b32.xlu1 %v71_v1, %s85_s14  ;;  %v72_v3 = vld [vmem:[%s131_s0 + $0x4] ss:$8 sm:%s28_s17]   ;;  %s35_s20 = smov 3  ;;  %s42_s21 = smov 3  ;;  %vm46_vm6 = vcmask 392448   ;;  %vm53_vm7 = vcmask 261248  }
   0x4   :  { %s86_s22 = smov 96   ;;  %s87_s23 = smov 64   ;;  %v73_v4 = vld [vmem:[%s131_s0 + $0x3] ss:$8 sm:%s35_s20]   ;;  %v74_v5 = vld [vmem:[%s131_s0 + $0x2] ss:$8 sm:%s42_s21]  }
   0x5   :  { %s2_s26 = smov 3  ;;  %s49_s29 = smov 3 }
   0x6   :  { %16 = vrot.lane.b32.xlu0 %v70_v2, %s86_s22  ;;  %v3_v6 = vld [vmem:[%s131_s0] ss:$8 sm:%s2_s26]   ;;  %s88_s3 = smov 48   ;;  %s89_s4 = smov 32  }
   0x7   :  { %30 = vrot.lane.b32.xlu1 %v72_v3, %s87_s23  ;;  %5 = vst.msk [vmem:[#allocation0] ss:$8 sm:$0x3] %vm4_vm0, %v3_v6   ;;  %v75_v7 = vld [vmem:[%s131_s0 + $0x1] ss:$8 sm:%s49_s29]   ;;  %s90_s0 = smov 16  }
   0xa   :  { %37 = vrot.lane.b32.xlu0 %v73_v4, %s88_s3 }
   0xb   :  { %44 = vrot.lane.b32.xlu1 %v74_v5, %s89_s4 }
   0xe   :  { %51 = vrot.lane.b32.xlu0 %v75_v7, %s90_s0 }
  0x74   :  { %v10_v8 = vpop.permute.xlu0 %9  }
  0x75   :  { %12 = vst.msk [vmem:[#allocation0] ss:$8 sm:$0x3] %vm11_vm1, %v10_v8   ;;  %v24_v9 = vpop.permute.xlu1 %23  }
  0x78   :  { %v17_v10 = vpop.permute.xlu0 %16  }
  0x79   :  { %19 = vst.msk [vmem:[#allocation0] ss:$8 sm:$0x3] %vm18_vm2, %v17_v10   ;;  %v31_v11 = vpop.permute.xlu1 %30  }
  0x7a   :  { %26 = vst.msk [vmem:[#allocation0] ss:$8 sm:$0x3] %vm25_vm3, %v24_v9  }
  0x7b   :  { %33 = vst.msk [vmem:[#allocation0] ss:$8 sm:$0x3] %vm32_vm4, %v31_v11  }
  0x7c   :  { %v38_v12 = vpop.permute.xlu0 %37  }
  0x7d   :  { %40 = vst.msk [vmem:[#allocation0] ss:$8 sm:$0x3] %vm39_vm5, %v38_v12   ;;  %v45_v13 = vpop.permute.xlu1 %44  }
  0x7e   :  { %47 = vst.msk [vmem:[#allocation0] ss:$8 sm:$0x3] %vm46_vm6, %v45_v13  }
  0x80   :  { %v52_v14 = vpop.permute.xlu0 %51  }
  0x81   :  { %54 = vst.msk [vmem:[#allocation0] ss:$8 sm:$0x3] %vm53_vm7, %v52_v14  }
  0x88   :  { %v59_v15 = vld [vmem:[#allocation0] sm:$0x1]  ;;  %v64_v16 = vld [vmem:[#allocation0 + $0x8] sm:$0x1] }
  0x89   :  { %62 = vst [vmem:[%s132_s1] sm:$0x1] %v59_v15  ;;  %76 = vst [vmem:[%s132_s1 + $0x1] sm:$0x1] %v64_v16 }

// kernel: tile.43
= control target key start
LH: loop header
LB: loop body
LE: loop exit
PB: predicated region body
PF: predicated region fallthrough
CT: control target
= control target key end

     0   :  { %s28_s0 = inlined_call_operand.vmem [shape: f32[8], index: 0, kind: input, shape index: {}]   ;;  %s29_s1 = inlined_call_operand.vmem [shape: f32[16,8], index: 1, kind: output, shape index: {}]  }
   0x1   :  { %v4_v0 = vld [vmem:[%s28_s0] ss:$0 sm:$0xff] }
   0x2   :  { %5 = vst [vmem:[%s29_s1] sm:$0xff] %v4_v0  ;;  %8 = vst [vmem:[%s29_s1 + $0x8] sm:$0xff] %v4_v0 }

// kernel: tile.44
= control target key start
LH: loop header
LB: loop body
LE: loop exit
PB: predicated region body
PF: predicated region fallthrough
CT: control target
= control target key end

     0   :  { %s133_s10 = smov 120   ;;  %s134_s11 = smov 104   ;;  %vm3_vm0 = vcmask 64512   ;;  %vm9_vm1 = vcmask 1048512   ;;  %vm15_vm2 = vcmask 982912   ;;  %vm21_vm3 = vcmask 917312   ;;  %s209_s0 = inlined_call_operand.vmem [shape: f32[16,8], index: 0, kind: input, shape index: {}]   ;;  %s210_s1 = inlined_call_operand.vmem [shape: f32[1,128], index: 1, kind: output, shape index: {}]  }
   0x1   :  { %v103_v0 = vld [vmem:[%s209_s0 + $0xf] sm:$0x1]   ;;  %v105_v1 = vld [vmem:[%s209_s0 + $0xd] sm:$0x1]   ;;  %v104_v2 = vld [vmem:[%s209_s0 + $0xe] sm:$0x1]  }
   0x2   :  { %7 = vrot.lane.b32.xlu0 %v103_v0, %s133_s10  ;;  %19 = vrot.lane.b32.xlu1 %v105_v1, %s134_s11  ;;  %v106_v3 = vld [vmem:[%s209_s0 + $0xc] sm:$0x1]   ;;  %s135_s16 = smov 112   ;;  %s136_s17 = smov 96   ;;  %v107_v4 = vld [vmem:[%s209_s0 + $0xb] sm:$0x1]  }
   0x3   :  { %v108_v5 = vld [vmem:[%s209_s0 + $0xa] sm:$0x1]   ;;  %v2_v6 = vld [vmem:[%s209_s0] sm:$0x1]   ;;  %s137_s24 = smov 88   ;;  %s138_s25 = smov 80  }
   0x4   :  { %4 = vst.msk [vmem:[#allocation0] sm:$0x1] %vm3_vm0, %v2_v6   ;;  %v109_v7 = vld [vmem:[%s209_s0 + $0x9] sm:$0x1]   ;;  %v110_v8 = vld [vmem:[%s209_s0 + $0x8] sm:$0x1]  }
   0x5   :  { %s139_s30 = smov 72   ;;  %s140_s2 = smov 64   ;;  %v111_v9 = vld [vmem:[%s209_s0 + $0x7] sm:$0x1]   ;;  %v112_v10 = vld [vmem:[%s209_s0 + $0x6] sm:$0x1]  }
   0x6   :  { %13 = vrot.lane.b32.xlu0 %v104_v2, %s135_s16  ;;  %25 = vrot.lane.b32.xlu1 %v106_v3, %s136_s17  ;;  %s141_s7 = smov 56   ;;  %s142_s8 = smov 48   ;;  %v113_v11 = vld [vmem:[%s209_s0 + $0x5] sm:$0x1]   ;;  %v114_v12 = vld [vmem:[%s209_s0 + $0x4] sm:$0x1]  }
   0x7   :  { %s143_s13 = smov 40   ;;  %s144_s14 = smov 32   ;;  %v115_v13 = vld [vmem:[%s209_s0 + $0x3] sm:$0x1]   ;;  %v116_v14 = vld [vmem:[%s209_s0 + $0x2] sm:$0x1]  }
   0x8   :  { %s145_s19 = smov 24   ;;  %s146_s20 = smov 16   ;;  %v117_v15 = vld [vmem:[%s209_s0 + $0x1] sm:$0x1]   ;;  %vm27_vm4 = vcmask 851712   ;;  %vm33_vm5 = vcmask 786112  }
   0x9   :  { %s147_s0 = smov 8   ;;  %vm39_vm6 = vcmask 720512   ;;  %vm45_vm7 = vcmask 654912   ;;  %vm51_vm8 = vcmask 589312   ;;  %vm57_vm9 = vcmask 523712  }
   0xa   :  { %31 = vrot.lane.b32.xlu0 %v107_v4, %s137_s24  ;;  %37 = vrot.lane.b32.xlu1 %v108_v5, %s138_s25  ;;  %vm63_vm10 = vcmask 458112   ;;  %vm69_vm11 = vcmask 392512   ;;  %vm75_vm12 = vcmask 326912   ;;  %vm81_vm13 = vcmask 261312  }
   0xb   :  { %vm87_vm14 = vcmask 195712   ;;  %vm93_vm15 = vcmask 130112  }
   0xe   :  { %43 = vrot.lane.b32.xlu0 %v109_v7, %s139_s30  ;;  %49 = vrot.lane.b32.xlu1 %v110_v8, %s140_s2 }
  0x12   :  { %55 = vrot.lane.b32.xlu0 %v111_v9, %s141_s7  ;;  %61 = vrot.lane.b32.xlu1 %v112_v10, %s142_s8 }
  0x16   :  { %67 = vrot.lane.b32.xlu0 %v113_v11, %s143_s13  ;;  %73 = vrot.lane.b32.xlu1 %v114_v12, %s144_s14 }
  0x1a   :  { %79 = vrot.lane.b32.xlu0 %v115_v13, %s145_s19  ;;  %85 = vrot.lane.b32.xlu1 %v116_v14, %s146_s20 }
  0x1e   :  { %91 = vrot.lane.b32.xlu0 %v117_v15, %s147_s0 }
  0x74   :  { %v8_v16 = vpop.permute.xlu0 %7   ;;  %v20_v17 = vpop.permute.xlu1 %19  }
  0x75   :  { %10 = vst.msk [vmem:[#allocation0] sm:$0x1] %vm9_vm1, %v8_v16  }
  0x78   :  { %v14_v18 = vpop.permute.xlu0 %13   ;;  %v26_v19 = vpop.permute.xlu1 %25  }
  0x79   :  { %16 = vst.msk [vmem:[#allocation0] sm:$0x1] %vm15_vm2, %v14_v18  }
  0x7a   :  { %22 = vst.msk [vmem:[#allocation0] sm:$0x1] %vm21_vm3, %v20_v17  }
  0x7b   :  { %28 = vst.msk [vmem:[#allocation0] sm:$0x1] %vm27_vm4, %v26_v19  }
  0x7c   :  { %v32_v20 = vpop.permute.xlu0 %31   ;;  %v38_v21 = vpop.permute.xlu1 %37  }
  0x7d   :  { %34 = vst.msk [vmem:[#allocation0] sm:$0x1] %vm33_vm5, %v32_v20  }
  0x7e   :  { %40 = vst.msk [vmem:[#allocation0] sm:$0x1] %vm39_vm6, %v38_v21  }
  0x80   :  { %v44_v22 = vpop.permute.xlu0 %43   ;;  %v50_v23 = vpop.permute.xlu1 %49  }
  0x81   :  { %46 = vst.msk [vmem:[#allocation0] sm:$0x1] %vm45_vm7, %v44_v22  }
  0x82   :  { %52 = vst.msk [vmem:[#allocation0] sm:$0x1] %vm51_vm8, %v50_v23  }
  0x84   :  { %v56_v24 = vpop.permute.xlu0 %55   ;;  %v62_v25 = vpop.permute.xlu1 %61  }
  0x85   :  { %58 = vst.msk [vmem:[#allocation0] sm:$0x1] %vm57_vm9, %v56_v24  }
  0x86   :  { %64 = vst.msk [vmem:[#allocation0] sm:$0x1] %vm63_vm10, %v62_v25  }
  0x88   :  { %v68_v26 = vpop.permute.xlu0 %67   ;;  %v74_v27 = vpop.permute.xlu1 %73  }
  0x89   :  { %70 = vst.msk [vmem:[#allocation0] sm:$0x1] %vm69_vm11, %v68_v26  }
  0x8a   :  { %76 = vst.msk [vmem:[#allocation0] sm:$0x1] %vm75_vm12, %v74_v27  }
  0x8c   :  { %v80_v28 = vpop.permute.xlu0 %79   ;;  %v86_v29 = vpop.permute.xlu1 %85  }
  0x8d   :  { %82 = vst.msk [vmem:[#allocation0] sm:$0x1] %vm81_vm13, %v80_v28  }
  0x8e   :  { %88 = vst.msk [vmem:[#allocation0] sm:$0x1] %vm87_vm14, %v86_v29  }
  0x90   :  { %v92_v30 = vpop.permute.xlu0 %91  }
  0x91   :  { %94 = vst.msk [vmem:[#allocation0] sm:$0x1] %vm93_vm15, %v92_v30  }
  0x98   :  { %v99_v31 = vld [vmem:[#allocation0] sm:$0x1] }
  0x99   :  { %102 = vst [vmem:[%s210_s1] sm:$0x1] %v99_v31 }

// kernel: vgg_forward.1
= control target key start
LH: loop header
LB: loop body
LE: loop exit
PB: predicated region body
PF: predicated region fallthrough
CT: control target
= control target key end

     0   :  { %vm62_vm0 = vsmask.f32 256  ;;  %vm65_vm1 = vsmask.f32 4352  ;;  %vm61_vm2 = vcmask 1040384   ;;  %vm64_vm3 = vcmask 1044484   ;;  %s7925_s1 = inlined_call_operand.vmem [shape: bf16[3,128,128], index: 1, kind: input, shape index: {}]   ;;  %s7926_s0 = inlined_call_operand.vmem [shape: f32[2,16,128], index: 0, kind: input, shape index: {}]   ;;  %s7927_s4 = inlined_call_operand.vmem [shape: f32[128,128], index: 4, kind: input, shape index: {}, may-alias: {4,8}]   ;;  %s7928_s5 = inlined_call_operand.vmem [shape: bf16[3,128,128], index: 5, kind: input, shape index: {}]   ;;  %s7929_s2 = inlined_call_operand.vmem [shape: f32[1,128], index: 2, kind: input, shape index: {}]   ;;  %s7930_s3 = inlined_call_operand.vmem [shape: f32[1,128], index: 3, kind: input, shape index: {}]   ;;  %s7931_s17 = inlined_call_operand.vmem [shape: f32[2,16,128], index: 17, kind: output, shape index: {0}]   ;;  %s7932_s8 = inlined_call_operand.vmem [shape: f32[128,128], index: 8, kind: input, shape index: {}, may-alias: {4,8}]   ;;  %s7933_s9 = inlined_call_operand.vmem [shape: bf16[3,128,256], index: 9, kind: input, shape index: {}]   ;;  %s7934_s6 = inlined_call_operand.vmem [shape: f32[1,128], index: 6, kind: input, shape index: {}]   ;;  %s7935_s7 = inlined_call_operand.vmem [shape: f32[1,128], index: 7, kind: input, shape index: {}]   ;;  %s7936_s18 = inlined_call_operand.vmem [shape: f32[2,16,128], index: 18, kind: output, shape index: {1}]   ;;  %s7937_s12 = inlined_call_operand.vmem [shape: f32[256,256], index: 12, kind: input, shape index: {}, may-alias: {12,16}]   ;;  %s7938_s13 = inlined_call_operand.vmem [shape: bf16[3,256,256], index: 13, kind: input, shape index: {}]   ;;  %s7939_s10 = inlined_call_operand.vmem [shape: f32[1,256], index: 10, kind: input, shape index: {}]   ;;  %s7940_s11 = inlined_call_operand.vmem [shape: f32[1,256], index: 11, kind: input, shape index: {}]   ;;  %s7941_s19 = inlined_call_operand.vmem [shape: f32[2,16,256], index: 19, kind: output, shape index: {2}]   ;;  %s7942_s16 = inlined_call_operand.vmem [shape: f32[256,256], index: 16, kind: input, shape index: {}, may-alias: {12,16}]   ;;  %s7943_s14 = inlined_call_operand.vmem [shape: f32[1,256], index: 14, kind: input, shape index: {}]   ;;  %s7944_s15 = inlined_call_operand.vmem [shape: f32[1,256], index: 15, kind: input, shape index: {}]   ;;  %s7945_s20 = inlined_call_operand.vmem [shape: f32[2,16,256], index: 20, kind: output, shape index: {3}]  }
   0x1   :  { %8037 = sst [smem:[#allocation41_spill]] %s7925_s1  ;;  %vm5648_vm4 = vmand %vm61_vm2, %vm62_vm0  ;;  %v68_v13 = vld [vmem:[#allocation2 + $0x20] sm:$0x11]  ;;  %v71_v14 = vld [vmem:[#allocation2 + $0x10] sm:$0x11]  ;;  %v8045_v18 = vmov 0 }
   0x2   :  { %8038 = sst [smem:[#allocation42_spill]] %s7926_s0  ;;  %vm74_vm5 = vsmask.f32 7938  ;;  %vm66_vm6 = vmand %vm64_vm3, %vm65_vm1  ;;  %vm76_vm7 = vsmask.f32 7954  ;;  %vm143_vm9 = vcmask 1043456  }
   0x3   :  { %8039 = sst [smem:[#allocation43_spill]] %s7927_s4  ;;  %v79_v15 = vld [vmem:[#allocation2 + $0x18] sm:$0x11]  ;;  %v82_v16 = vld [vmem:[#allocation2] sm:$0x11]  ;;  %vm5659_vm8 = vmor %vm66_vm6, %vm5648_vm4  ;;  %v8051_v43 = vmov 0 }
   0x4   :  { %8040 = sst [smem:[#allocation44_spill]] %s7928_s5  ;;  %v8046_v18 = vsel %vm5659_vm8, 4294967295, %v8045_v18  ;;  %v69_v21 = vsel %vm5659_vm8, 0, %v68_v13  ;;  %v72_v22 = vsel %vm5659_vm8, 0, %v71_v14  ;;  %vm5675_vm10 = vmand %vm61_vm2, %vm74_vm5  ;;  %vm101_vm12 = vsmask.f32 4368 }
   0x5   :  { %8041 = sst [smem:[#allocation45_spill]] %s7929_s2  ;;  %8047 = vst [vmem:[#allocation3_spill] sm:$0xff] %v8046_v18  ;;  %70 = vst [vmem:[#allocation2 + $0x20] sm:$0x11] %v69_v21  ;;  %v8054_v50 = vmov 0  ;;  %vm470_vm1 = vcmask 1046532  }
   0x6   :  { %s8042_s23 = sld [smem:[#allocation41_spill]]  ;;  %vm77_vm11 = vmand %vm64_vm3, %vm76_vm7  ;;  %73 = vst [vmem:[#allocation2 + $0x10] sm:$0x11] %v72_v22  ;;  %vm181_vm2 = vsmask.f32 3328 }
   0x7   :  { %s8048_s0 = sld [smem:[#allocation42_spill]]  ;;  %vm78_vm13 = vmor %vm77_vm11, %vm5675_vm10  ;;  %vm182_vm3 = vsmask.f32 7440  ;;  %vm612_vm10 = vcmask 261120  }
   0x8   :  { %v80_v35 = vsel %vm78_vm13, 0, %v79_v15  ;;  %v83_v36 = vsel %vm78_vm13, 0, %v82_v16  ;;  %vm5697_vm14 = vmor %vm62_vm0, %vm101_vm12  ;;  %vm469_vm0 = vcmask 1042432   ;;  %s8063_s24 = sld [smem:[#allocation43_spill]] }
   0x9   :  { %81 = vst [vmem:[#allocation2 + $0x18] sm:$0x11] %v80_v35  ;;  %84 = vst [vmem:[#allocation2] sm:$0x11] %v83_v36  ;;  %v8052_v43 = vsel %vm5697_vm14, 4294967295, %v8051_v43  ;;  %s8064_s27 = sld [smem:[#allocation44_spill]] }
   0xa   :  { %8053 = vst [vmem:[#allocation4_spill] sm:$0xff] %v8052_v43  ;;  %vm5706_vm15 = vmand %vm143_vm9, %vm74_vm5  ;;  %vm5501_vm9 = vmmov 0   ;;  %s8066_s21 = sld [smem:[#allocation45_spill]]  ;;  %v6870_v43 = vld [vmem:[%s7937_s12 + $0x120] sm:$0xff] }
   0xb   :  { %v8055_v50 = vsel %vm5706_vm15, 4294967295, %v8054_v50  ;;  %vm5735_vm5 = vmor %vm181_vm2, %vm182_vm3  ;;  %8098 = vst [vmem:[#allocation40_spill] sm:$0xff] %v6870_v43 }
   0xc   :  { %v5218_v0 = vld [vmem:[%s8042_s23 + $0x78] sm:$0xff]   ;;  %v5220_v2 = vld [vmem:[%s8042_s23 + $0x70] sm:$0xff]   ;;  %v5222_v4 = vld [vmem:[%s8042_s23 + $0x68] sm:$0xff]   ;;  %8056 = vst [vmem:[#allocation5_spill] sm:$0xff] %v8055_v50 }
   0xd   :  { %v5219_v1 = vld [vmem:[%s8042_s23 + $0x38] sm:$0xff]   ;;  %4909 = vmatprep.subr.bf16.mxu0 %v5218_v0  ;;  %v5221_v3 = vld [vmem:[%s8042_s23 + $0x30] sm:$0xff]   ;;  %v5223_v5 = vld [vmem:[%s8042_s23 + $0x28] sm:$0xff]  }
   0xe   :  { %4929 = vmatprep.subr.bf16.mxu1 %v5219_v1  ;;  %4910 = vmatpush3.bf16.msra.mxu0 %v5218_v0  ;;  %v5224_v6 = vld [vmem:[%s8042_s23 + $0x60] sm:$0xff]   ;;  %v5226_v8 = vld [vmem:[%s8042_s23 + $0x58] sm:$0xff]   ;;  %v5228_v10 = vld [vmem:[%s8042_s23 + $0x50] sm:$0xff]  }
   0xf   :  { %4930 = vmatpush3.bf16.msra.mxu1 %v5219_v1  ;;  %4911 = vmatprep.subr.bf16.mxu0 %v5220_v2  ;;  %v5225_v7 = vld [vmem:[%s8042_s23 + $0x20] sm:$0xff]   ;;  %v5227_v9 = vld [vmem:[%s8042_s23 + $0x18] sm:$0xff]   ;;  %v5229_v11 = vld [vmem:[%s8042_s23 + $0x10] sm:$0xff]  }
  0x10   :  { %4931 = vmatprep.subr.bf16.mxu1 %v5221_v3  ;;  %v5230_v17 = vld [vmem:[%s8042_s23 + $0x48] sm:$0xff]   ;;  %v85_v19 = vld [vmem:[%s8048_s0] sm:$0xff]  ;;  %v87_v26 = vld [vmem:[%s8048_s0 + $0x10] sm:$0xff] }
  0x11   :  { %v86_v20 = vld [vmem:[%s8048_s0 + $0x8] sm:$0xff]  ;;  %v4745_v24 = vpack.c.bf16 %v85_v19, %v85_v19  ;;  %v88_v27 = vld [vmem:[%s8048_s0 + $0x18] sm:$0xff]  ;;  %v4747_v28 = vpack.c.bf16 %v87_v26, %v87_v26  ;;  %v5232_v39 = vld [vmem:[%s8042_s23 + $0x40] sm:$0xff]  }
  0x12   :  { %4912 = vmatpush3.bf16.msra.mxu0 %v5220_v2  ;;  %v4746_v25 = vpack.c.bf16 %v86_v20, %v86_v20  ;;  %v4748_v29 = vpack.c.bf16 %v88_v27, %v88_v27  ;;  %v5231_v30 = vld [vmem:[%s8042_s23 + $0x8] sm:$0xff]   ;;  %v5233_v46 = vld [vmem:[%s8042_s23] sm:$0xff]   ;;  %v152_v57 = vld [vmem:[#allocation2 + $0x10] sm:$0xf] }
  0x13   :  { %4932 = vmatpush3.bf16.msra.mxu1 %v5221_v3  ;;  %4913 = vmatprep.subr.bf16.mxu0 %v5222_v4  ;;  %v104_v31 = vshrl.u32 %v4745_v24, 16  ;;  %v107_v32 = vshll.u32 %v4745_v24, 16  ;;  %v121_v37 = vshrl.u32 %v4747_v28, 16  ;;  %v124_v38 = vshll.u32 %v4747_v28, 16  ;;  %v145_v56 = vld [vmem:[#allocation2 + $0x20] sm:$0xf]  ;;  %vm5744_vm6 = vmor %vm469_vm0, %vm470_vm1 }
  0x14   :  { %4933 = vmatprep.subr.bf16.mxu1 %v5223_v5  ;;  %v112_v33 = vshrl.u32 %v4746_v25, 16  ;;  %v115_v34 = vshll.u32 %v4746_v25, 16  ;;  %v129_v42 = vshrl.u32 %v4748_v29, 16  ;;  %v132_v45 = vshll.u32 %v4748_v29, 16  ;;  %v5719_v62 = vld [vmem:[%s8042_s23 + $0xb8] sm:$0xff]  }
  0x15   :  { %v106_v40 = vrot.slane %v104_v31, 7  ;;  %v123_v44 = vrot.slane %v121_v37, 7  ;;  %v149_v63 = vld [vmem:[#allocation2 + $0x18] sm:$0x1]  ;;  %v156_v1 = vld [vmem:[#allocation2] sm:$0x1] }
  0x16   :  { %4914 = vmatpush3.bf16.msra.mxu0 %v5222_v4  ;;  %v114_v41 = vrot.slane %v112_v33, 7  ;;  %v131_v54 = vrot.slane %v129_v42, 7  ;;  %v8060_v42 = vmov 0 }
  0x17   :  { %4934 = vmatpush3.bf16.msra.mxu1 %v5223_v5  ;;  %4915 = vmatprep.subr.bf16.mxu0 %v5224_v6  ;;  %v109_v47 = vor.u32 %v107_v32, %v106_v40  ;;  %v110_v48 = vrot.slane %v106_v40, 4  ;;  %v126_v52 = vor.u32 %v124_v38, %v123_v44  ;;  %v127_v53 = vrot.slane %v123_v44, 4 }
  0x18   :  { %4935 = vmatprep.subr.bf16.mxu1 %v5225_v7  ;;  %v117_v49 = vor.u32 %v115_v34, %v114_v41  ;;  %v119_v51 = vrot.slane %v114_v41, 4  ;;  %v134_v59 = vor.u32 %v132_v45, %v131_v54  ;;  %v136_v60 = vrot.slane %v131_v54, 4 }
  0x19   :  { %v146_v58 = vsel %vm5706_vm15, %v109_v47, %v145_v56  ;;  %v153_v61 = vsel %vm5706_vm15, %v126_v52, %v152_v57  ;;  %v8061_v42 = vsel %vm5744_vm6, 4294967295, %v8060_v42 }
  0x1a   :  { %4916 = vmatpush3.bf16.msra.mxu0 %v5224_v6  ;;  %v118_v55 = vsel %vm5697_vm14, %v110_v48, %v117_v49  ;;  %147 = vst [vmem:[#allocation2 + $0x20] sm:$0xf] %v146_v58  ;;  %154 = vst [vmem:[#allocation2 + $0x10] sm:$0xf] %v153_v61  ;;  %v135_v0 = vsel %vm5697_vm14, %v127_v53, %v134_v59  ;;  %v150_v2 = vsel %vm5648_vm4, %v119_v51, %v149_v63  ;;  %v5238_v61 = vld [vmem:[%s8042_s23 + $0xa8] sm:$0xff]   ;;  %v5239_v63 = vld [vmem:[%s8042_s23 + $0xa0] sm:$0xff]  }
  0x1b   :  { %4936 = vmatpush3.bf16.msra.mxu1 %v5225_v7  ;;  %4917 = vmatprep.subr.bf16.mxu0 %v5226_v8  ;;  %148 = vst [vmem:[#allocation2 + $0x28] sm:$0xf] %v118_v55  ;;  %155 = vst [vmem:[#allocation2 + $0x8] sm:$0xf] %v135_v0  ;;  %v157_v3 = vsel %vm5648_vm4, %v136_v60, %v156_v1  ;;  %v5237_v60 = vld [vmem:[%s8042_s23 + $0xb0] sm:$0xff]   ;;  %v5240_v0 = vld [vmem:[%s8042_s23 + $0x98] sm:$0xff]  }
  0x1c   :  { %4937 = vmatprep.subr.bf16.mxu1 %v5227_v9  ;;  %151 = vst [vmem:[#allocation2 + $0x18] sm:$0x1] %v150_v2  ;;  %158 = vst [vmem:[#allocation2] sm:$0x1] %v157_v3  ;;  %v5242_v2 = vld [vmem:[%s8042_s23 + $0x88] sm:$0xff]  }
  0x1d   :  { %8062 = vst [vmem:[#allocation7_spill] sm:$0xff] %v8061_v42  ;;  %v6858_v42 = vld [vmem:[%s7937_s12 + $0x130] sm:$0xff] }
  0x1e   :  { %4918 = vmatpush3.bf16.msra.mxu0 %v5226_v8  ;;  %8096 = vst [vmem:[#allocation38_spill] sm:$0xff] %v6858_v42 }
  0x1f   :  { %4938 = vmatpush3.bf16.msra.mxu1 %v5227_v9  ;;  %4919 = vmatprep.subr.bf16.mxu0 %v5228_v10 }
  0x20   :  { %4939 = vmatprep.subr.bf16.mxu1 %v5229_v11 }
  0x21   :  { %v159_v5 = vld [vmem:[#allocation2 + $0x20] sm:$0xf]  ;;  %v161_v8 = vld [vmem:[#allocation2 + $0x10] sm:$0xf] }
  0x22   :  { %4920 = vmatpush3.bf16.msra.mxu0 %v5228_v10  ;;  %v160_v4 = vld [vmem:[#allocation2 + $0x28] sm:$0xf]  ;;  %v185_v9 = vshrl.u32 %v159_v5, 16  ;;  %v188_v10 = vshll.u32 %v159_v5, 16  ;;  %v209_v13 = vshrl.u32 %v161_v8, 16  ;;  %v212_v19 = vshll.u32 %v161_v8, 16 }
  0x23   :  { %4940 = vmatpush3.bf16.msra.mxu1 %v5229_v11  ;;  %4921 = vmatprep.subr.bf16.mxu0 %v5230_v17  ;;  %v194_v6 = vshll.u32 %v160_v4, 16  ;;  %v198_v7 = vshrl.u32 %v160_v4, 16  ;;  %v4361_v11 = vcombine.low %v159_v5, %v160_v4  ;;  %v463_v14 = vld [vmem:[#allocation2 + $0x20] sm:$0xe]  ;;  %v179_v21 = vld [vmem:[#allocation2 + $0x18] sm:$0x1] }
  0x24   :  { %4941 = vmatprep.subr.bf16.mxu1 %v5231_v30  ;;  %v4371_v20 = vrot.slane %v463_v14, 9  ;;  %v187_v22 = vrot.slane %v185_v9, 4  ;;  %v190_v23 = vrot.slane %v188_v10, 5  ;;  %v5730_v24 = vld [vmem:[#allocation2] sm:$0x1]  ;;  %v204_v27 = vshll.u32 %v179_v21, 16 }
  0x25   :  { %v196_v15 = vrot.slane %v194_v6, 5  ;;  %v200_v16 = vrot.slane %v198_v7, 4  ;;  %4945 = vmatprep.mubr.bf16.mxu1 %v4361_v11  ;;  %v211_v28 = vrot.slane %v209_v13, 4  ;;  %v214_v29 = vrot.slane %v212_v19, 5  ;;  %v464_v3 = vld [vmem:[#allocation2 + $0x10] sm:$0xe] }
  0x26   :  { %4922 = vmatpush3.bf16.msra.mxu0 %v5230_v17  ;;  %v5728_v17 = vld [vmem:[#allocation2 + $0x8] sm:$0xf]  ;;  %v191_v31 = vor.u32 %v190_v23, %v187_v22  ;;  %v228_v34 = vshll.u32 %v5730_v24, 16  ;;  %v206_v36 = vrot.slane %v204_v27, 5  ;;  %v474_v38 = vrot.slane %v160_v4, 5  ;;  %v5243_v7 = vld [vmem:[%s8042_s23 + $0x80] sm:$0xff]  }
  0x27   :  { %4942 = vmatpush3.bf16.msra.mxu1 %v5231_v30  ;;  %4923 = vmatprep.subr.bf16.mxu0 %v5232_v39  ;;  %v4362_v25 = vcombine.low %v161_v8, %v5728_v17  ;;  %v201_v26 = vor.u32 %v200_v16, %v196_v15  ;;  %v8057_v30 = vmov 0  ;;  %v218_v32 = vshll.u32 %v5728_v17, 16  ;;  %v5797_v13 = vld [vmem:[%s8063_s24 + $0x78] sm:$0xff]  ;;  %v5802_v14 = vld [vmem:[%s8063_s24 + $0x70] sm:$0xff]  ;;  %v5816_v16 = vld [vmem:[%s8063_s24 + $0x60] sm:$0xff] }
  0x28   :  { %4943 = vmatprep.subr.bf16.mxu1 %v5233_v46  ;;  %v8058_v30 = vsel %vm5735_vm5, 4294967295, %v8057_v30  ;;  %v222_v33 = vshrl.u32 %v5728_v17, 16  ;;  %v215_v37 = vor.u32 %v214_v29, %v211_v28  ;;  %v230_v49 = vrot.slane %v228_v34, 5  ;;  %v5830_v19 = vld [vmem:[%s8063_s24 + $0x50] sm:$0xff]  ;;  %v5851_v22 = vld [vmem:[%s8063_s24 + $0x38] sm:$0xff]  ;;  %v5893_v28 = vld [vmem:[%s8063_s24 + $0x8] sm:$0xff] }
  0x29   :  { %8059 = vst [vmem:[#allocation6_spill] sm:$0xff] %v8058_v30  ;;  %v202_v35 = vrot.slane %v201_v26, 4  ;;  %v220_v40 = vrot.slane %v218_v32, 5  ;;  %v477_v51 = vrot.slane %v179_v21, 5  ;;  %v475_v53 = vsel %vm5744_vm6, %v4371_v20, %v474_v38  ;;  %v5837_v20 = vld [vmem:[%s8063_s24 + $0x48] sm:$0xff]  ;;  %v5844_v21 = vld [vmem:[%s8063_s24 + $0x40] sm:$0xff] }
  0x2a   :  { %4924 = vmatpush3.bf16.msra.mxu0 %v5232_v39  ;;  %v192_v39 = vrot.slane %v191_v31, 4  ;;  %v224_v41 = vrot.slane %v222_v33, 4  ;;  %v216_v45 = vrot.slane %v215_v37, 4  ;;  %v481_v1 = vrot.slane %v5728_v17, 5  ;;  %v5823_v17 = vld [vmem:[%s8063_s24 + $0x58] sm:$0xff]  ;;  %v5858_v23 = vld [vmem:[%s8063_s24 + $0x30] sm:$0xff] }
  0x2b   :  { %4944 = vmatpush3.bf16.msra.mxu1 %v5233_v46  ;;  %4949 = vmatprep.subr.bf16.mxu0 %v5719_v62  ;;  %v207_v44 = vsel %vm5735_vm5, %v202_v35, %v206_v36  ;;  %v476_v46 = vrot.slane %v474_v38, 4  ;;  %v4372_v4 = vrot.slane %v464_v3, 9  ;;  %v484_v6 = vrot.slane %v5730_v24, 5  ;;  %v5865_v24 = vld [vmem:[%s8063_s24 + $0x28] sm:$0xff]  ;;  %v5879_v26 = vld [vmem:[%s8063_s24 + $0x18] sm:$0xff]  ;;  %v5886_v27 = vld [vmem:[%s8063_s24 + $0x10] sm:$0xff] }
  0x2c   :  { %v197_v47 = vsel %vm5735_vm5, %v192_v39, %v196_v15  ;;  %v225_v48 = vor.u32 %v224_v41, %v220_v40  ;;  %v221_v54 = vsel %vm5735_vm5, %v216_v45, %v220_v40  ;;  %v483_v5 = vrot.slane %v481_v1, 4  ;;  %v5809_v15 = vld [vmem:[%s8063_s24 + $0x68] sm:$0xff]  ;;  %v5248_v3 = vld [vmem:[%s8064_s27 + $0x70] sm:$0xff]  }
  0x2d   :  { %v4351_v52 = vcombine.low %v197_v47, %v207_v44  ;;  %v478_v56 = vsel %vm5744_vm6, %v476_v46, %v477_v51  ;;  %v482_v8 = vsel %vm5744_vm6, %v4372_v4, %v481_v1  ;;  %v7950_v11 = vmov 0.0   ;;  %v5246_v1 = vld [vmem:[%s8064_s27 + $0x78] sm:$0xff]   ;;  %v5249_v4 = vld [vmem:[%s8064_s27 + $0x20] sm:$0xff]   ;;  %v6864_v30 = vld [vmem:[%s7937_s12 + $0x128] sm:$0xff] }
  0x2e   :  { %4946 = vmatmul.mubr.bf16.vlgmr.msra.gmra.mxu1 %v4362_v25  ;;  %v226_v55 = vrot.slane %v225_v48, 4  ;;  %v4389_v58 = vcombine.low %v475_v53, %v478_v56  ;;  %v485_v9 = vsel %vm5744_vm6, %v483_v5, %v484_v6  ;;  %4991 = vmatprep.subr.mxu1 %v7950_v11  ;;  %v5872_v25 = vld [vmem:[%s8063_s24 + $0x20] sm:$0xff]  ;;  %v5250_v5 = vld [vmem:[%s8064_s27 + $0x68] sm:$0xff]   ;;  %v5251_v6 = vld [vmem:[%s8064_s27 + $0x18] sm:$0xff]   ;;  %8097 = vst [vmem:[#allocation39_spill] sm:$0xff] %v6864_v30 }
  0x2f   :  { %4925 = vmatprep.mubr.bf16.mxu0 %v4351_v52  ;;  %v4390_v10 = vcombine.low %v482_v8, %v485_v9  ;;  %5023 = vmatprep.mubr.msk.f32.mxu1 %vm5501_vm9, %v7950_v11  ;;  %v5253_v8 = vld [vmem:[%s8064_s27 + $0x10] sm:$0xff]   ;;  %v5254_v9 = vld [vmem:[%s8064_s27 + $0x58] sm:$0xff]  }
  0x30   :  { %v231_v57 = vsel %vm5735_vm5, %v226_v55, %v230_v49  ;;  %4992 = vmatpush3.msra.mxu1 %v5797_v13 }
  0x31   :  { %v4352_v59 = vcombine.low %v221_v54, %v231_v57  ;;  %4993 = vmatprep.subr.mxu1 %v7950_v11  ;;  %v7952_v54 = vmov 1.0  }
  0x32   :  { %4994 = vmatpush3.msra.mxu1 %v5802_v14 }
  0x33   :  { %4926 = vmatmul.mubr.bf16.vlgmr.msra.gmra.mxu0 %v4352_v59  ;;  %4995 = vmatprep.subr.mxu1 %v7950_v11 }
  0x34   :  { %4950 = vmatpush3.bf16.msra.mxu0 %v5719_v62  ;;  %4965 = vmatprep.mubr.bf16.mxu0 %v4389_v58  ;;  %v5241_v62 = vld [vmem:[%s8042_s23 + $0x90] sm:$0xff]   ;;  %v760_v58 = vld [vmem:[%s8063_s24] sm:$0xff] }
  0x35   :  { %4951 = vmatprep.subr.bf16.mxu0 %v5237_v60  ;;  %4996 = vmatpush3.msra.mxu1 %v5809_v15 }
  0x36   :  { %4997 = vmatprep.subr.mxu1 %v7950_v11 }
  0x37   :  { %4998 = vmatpush3.msra.mxu1 %v5816_v16 }
  0x38   :  { %4952 = vmatpush3.bf16.msra.mxu0 %v5237_v60  ;;  %4999 = vmatprep.subr.mxu1 %v7950_v11 }
  0x39   :  { %4953 = vmatprep.subr.bf16.mxu0 %v5238_v61  ;;  %5000 = vmatpush3.msra.mxu1 %v5823_v17 }
  0x3a   :  { %5001 = vmatprep.subr.mxu1 %v7950_v11 }
  0x3b   :  { %5002 = vmatpush3.msra.mxu1 %v5830_v19 }
  0x3c   :  { %4954 = vmatpush3.bf16.msra.mxu0 %v5238_v61  ;;  %5003 = vmatprep.subr.mxu1 %v7950_v11 }
  0x3d   :  { %4955 = vmatprep.subr.bf16.mxu0 %v5239_v63  ;;  %5004 = vmatpush3.msra.mxu1 %v5837_v20 }
  0x3e   :  { %5005 = vmatprep.subr.mxu1 %v7950_v11 }
  0x3f   :  { %5006 = vmatpush3.msra.mxu1 %v5844_v21 }
  0x40   :  { %4956 = vmatpush3.bf16.msra.mxu0 %v5239_v63  ;;  %5007 = vmatprep.subr.mxu1 %v7950_v11 }
  0x41   :  { %4957 = vmatprep.subr.bf16.mxu0 %v5240_v0  ;;  %5008 = vmatpush3.msra.mxu1 %v5851_v22 }
  0x42   :  { %5009 = vmatprep.subr.mxu1 %v7950_v11 }
  0x43   :  { %5010 = vmatpush3.msra.mxu1 %v5858_v23 }
  0x44   :  { %4958 = vmatpush3.bf16.msra.mxu0 %v5240_v0  ;;  %5011 = vmatprep.subr.mxu1 %v7950_v11  ;;  %v5244_v0 = vld [vmem:[%s8064_s27 + $0x38] sm:$0xff]  }
  0x45   :  { %4959 = vmatprep.subr.bf16.mxu0 %v5241_v62  ;;  %5012 = vmatpush3.msra.mxu1 %v5865_v24 }
  0x46   :  { %5013 = vmatprep.subr.mxu1 %v7950_v11 }
  0x47   :  { %5014 = vmatpush3.msra.mxu1 %v5872_v25 }
  0x48   :  { %4960 = vmatpush3.bf16.msra.mxu0 %v5241_v62  ;;  %5015 = vmatprep.subr.mxu1 %v7950_v11  ;;  %v5245_v62 = vld [vmem:[%s8064_s27 + $0x30] sm:$0xff]  }
  0x49   :  { %4961 = vmatprep.subr.bf16.mxu0 %v5242_v2  ;;  %5016 = vmatpush3.msra.mxu1 %v5879_v26 }
  0x4a   :  { %5017 = vmatprep.subr.mxu1 %v7950_v11 }
  0x4b   :  { %5018 = vmatpush3.msra.mxu1 %v5886_v27 }
  0x4c   :  { %4962 = vmatpush3.bf16.msra.mxu0 %v5242_v2  ;;  %5019 = vmatprep.subr.mxu1 %v7950_v11  ;;  %v5247_v2 = vld [vmem:[%s8064_s27 + $0x28] sm:$0xff]  }
  0x4d   :  { %4963 = vmatprep.subr.bf16.mxu0 %v5243_v7  ;;  %5020 = vmatpush3.msra.mxu1 %v5893_v28 }
  0x4e   :  { %5021 = vmatprep.subr.mxu1 %v7950_v11 }
  0x4f   :  { %5022 = vmatpush3.msra.mxu1 %v760_v58 }
  0x50   :  { %4964 = vmatpush3.bf16.msra.mxu0 %v5243_v7  ;;  %5061 = vmatprep.subr.bf16.mxu1 %v5246_v1  ;;  %v5252_v7 = vld [vmem:[%s8064_s27 + $0x60] sm:$0xff]  }
  0x51   :  { %4969 = vmatprep.subr.mxu0 %v7950_v11 }
  0x53   :  { %4966 = vmatmul.mubr.bf16.vlgmr.msra.gmra.mxu0 %v4390_v10  ;;  %v5255_v10 = vld [vmem:[%s8064_s27 + $0x8] sm:$0xff]  }
  0x54   :  { %4977 = vmatprep.mubr.msk.f32.mxu0 %vm5501_vm9, %v7950_v11 }
  0xee   :  { %v4947_v32 = vpop.f32.mrf.mxu1 }
  0xf0   :  { %v448_v34 = vpop.f32.mrf.mxu1 }
  0xf2   :  { %v4948_v36 = vpop.f32.mrf.mxu1 }
  0xf3   :  { %v4927_v29 = vpop.f32.mrf.mxu0 }
  0xf4   :  { %v451_v40 = vpop.f32.mrf.mxu1  ;;  %v457_v44 = vadd.f32 %v4947_v32, %v4927_v29  ;;  %v930_v29 = vlaneseq  ;;  %v924_v32 = vld [vmem:[%s8066_s21] sm:$0x1] }
  0xf5   :  { %v339_v31 = vpop.f32.mrf.mxu0 }
  0xf6   :  { %v449_v49 = vadd.f32 %v448_v34, %v339_v31  ;;  %v6023_v31 = vshrl.u32 %v930_v29, 7 }
  0xf7   :  { %v4928_v33 = vpop.f32.mrf.mxu0 }
  0xf8   :  { %v460_v39 = vadd.f32 %v4948_v36, %v4928_v33  ;;  %8065 = vst [vmem:[#allocation8_spill] sm:$0xff] %v6023_v31  ;;  %v6029_v33 = vsub.s32 0, %v6023_v31  ;;  %v926_v36 = vld [vmem:[%s7930_s3] sm:$0x1] }
  0xf9   :  { %v342_v35 = vpop.f32.mrf.mxu0 }
  0xfa   :  { %v452_v47 = vadd.f32 %v451_v40, %v342_v35  ;;  %8067 = vst [vmem:[#allocation9_spill] sm:$0xff] %v6029_v33 }
 0x113   :  { %v4967_v37 = vpop.f32.mrf.mxu0 }
 0x114   :  { %v5901_v48 = vadd.f32 %v4967_v37, %v457_v44 }
 0x115   :  { %v593_v38 = vpop.f32.mrf.mxu0 }
 0x116   :  { %v5909_v52 = vadd.f32 %v593_v38, %v449_v49  ;;  %v688_v55 = vmul.f32 %v5901_v48, %v5901_v48 }
 0x117   :  { %v4968_v41 = vpop.f32.mrf.mxu0 }
 0x118   :  { %v5899_v45 = vadd.f32 %v4968_v41, %v460_v39  ;;  %v686_v57 = vmul.f32 %v5909_v52, %v5909_v52 }
 0x119   :  { %v596_v46 = vpop.f32.mrf.mxu0 }
 0x11a   :  { %4970 = vmatpush3.msra.mxu0 %v5899_v45  ;;  %v5905_v51 = vadd.f32 %v596_v46, %v452_v47  ;;  %v689_v53 = vmul.f32 %v5899_v45, %v5899_v45 }
 0x11b   :  { %4971 = vmatprep.subr.mxu0 %v7950_v11 }
 0x11c   :  { %4972 = vmatpush3.msra.mxu0 %v5901_v48  ;;  %v687_v56 = vmul.f32 %v5905_v51, %v5905_v51 }
 0x11d   :  { %4973 = vmatprep.subr.mxu0 %v7950_v11 }
 0x11e   :  { %4974 = vmatpush3.msra.mxu0 %v5905_v51 }
 0x11f   :  { %4975 = vmatprep.subr.mxu0 %v7950_v11 }
 0x120   :  { %4976 = vmatpush3.msra.mxu0 %v5909_v52 }
 0x121   :  { %4978 = vmatmul.mubr.msk.f32.vlgmr.msra.gmra.mxu0 %vm612_vm10, %v7952_v54  ;;  %4980 = vmatprep.subr.mxu0 %v7950_v11 }
 0x122   :  { %4981 = vmatpush3.msra.mxu0 %v689_v53  ;;  %4988 = vmatprep.mubr.msk.f32.mxu0 %vm5501_vm9, %v7950_v11 }
 0x123   :  { %4982 = vmatprep.subr.mxu0 %v7950_v11 }
 0x124   :  { %4983 = vmatpush3.msra.mxu0 %v688_v55 }
 0x125   :  { %4984 = vmatprep.subr.mxu0 %v7950_v11 }
 0x126   :  { %4985 = vmatpush3.msra.mxu0 %v687_v56 }
 0x127   :  { %4986 = vmatprep.subr.mxu0 %v7950_v11 }
 0x128   :  { %4987 = vmatpush3.msra.mxu0 %v686_v57 }
 0x129   :  { %4989 = vmatmul.mubr.msk.f32.vlgmr.msra.gmra.mxu0 %vm612_vm10, %v7952_v54  ;;  %5026 = vmatprep.subr.mxu0 %v7950_v11 }
 0x12a   :  { %5027 = vmatpush3.msra.mxu0 %v5797_v13  ;;  %5058 = vmatprep.mubr.msk.f32.mxu0 %vm5501_vm9, %v7950_v11  ;;  %v5256_v13 = vld [vmem:[%s8064_s27 + $0x50] sm:$0xff]  }
 0x12b   :  { %5028 = vmatprep.subr.mxu0 %v7950_v11 }
 0x12c   :  { %5029 = vmatpush3.msra.mxu0 %v5802_v14  ;;  %v5257_v14 = vld [vmem:[%s8064_s27] sm:$0xff]  }
 0x12d   :  { %5030 = vmatprep.subr.mxu0 %v7950_v11 }
 0x12e   :  { %5031 = vmatpush3.msra.mxu0 %v5809_v15  ;;  %v5259_v15 = vld [vmem:[%s8064_s27 + $0x48] sm:$0xff]  }
 0x12f   :  { %5032 = vmatprep.subr.mxu0 %v7950_v11 }
 0x130   :  { %5033 = vmatpush3.msra.mxu0 %v5816_v16  ;;  %v5261_v16 = vld [vmem:[%s8064_s27 + $0x40] sm:$0xff]  }
 0x131   :  { %5034 = vmatprep.subr.mxu0 %v7950_v11 }
 0x132   :  { %5035 = vmatpush3.msra.mxu0 %v5823_v17  ;;  %v6020_v17 = vld [vmem:[%s8064_s27 + $0xb8] sm:$0xff]  }
 0x133   :  { %5036 = vmatprep.subr.mxu0 %v7950_v11 }
 0x134   :  { %5037 = vmatpush3.msra.mxu0 %v5830_v19 }
 0x135   :  { %5038 = vmatprep.subr.mxu0 %v7950_v11 }
 0x136   :  { %5039 = vmatpush3.msra.mxu0 %v5837_v20 }
 0x137   :  { %5040 = vmatprep.subr.mxu0 %v7950_v11 }
 0x138   :  { %5041 = vmatpush3.msra.mxu0 %v5844_v21 }
 0x139   :  { %5042 = vmatprep.subr.mxu0 %v7950_v11 }
 0x13a   :  { %5043 = vmatpush3.msra.mxu0 %v5851_v22 }
 0x13b   :  { %5044 = vmatprep.subr.mxu0 %v7950_v11 }
 0x13c   :  { %5045 = vmatpush3.msra.mxu0 %v5858_v23 }
 0x13d   :  { %5046 = vmatprep.subr.mxu0 %v7950_v11 }
 0x13e   :  { %5047 = vmatpush3.msra.mxu0 %v5865_v24 }
 0x13f   :  { %5048 = vmatprep.subr.mxu0 %v7950_v11 }
 0x140   :  { %5049 = vmatpush3.msra.mxu0 %v5872_v25 }
 0x141   :  { %5050 = vmatprep.subr.mxu0 %v7950_v11 }
 0x142   :  { %5051 = vmatpush3.msra.mxu0 %v5879_v26 }
 0x143   :  { %5052 = vmatprep.subr.mxu0 %v7950_v11 }
 0x144   :  { %5053 = vmatpush3.msra.mxu0 %v5886_v27 }
 0x145   :  { %5054 = vmatprep.subr.mxu0 %v7950_v11 }
 0x146   :  { %5055 = vmatpush3.msra.mxu0 %v5893_v28 }
 0x147   :  { %5056 = vmatprep.subr.mxu0 %v7950_v11 }
 0x148   :  { %5057 = vmatpush3.msra.mxu0 %v760_v58 }
 0x149   :  { %5081 = vmatprep.subr.bf16.mxu0 %v5244_v0 }
 0x1e1   :  { %v682_v59 = vpop.f32.mrf.mxu0 }
 0x1e2   :  { %5024 = vmatmul.mubr.f32.vlgmr.msra.gmra.mxu1 %v682_v59 }
 0x1e3   :  { %v4979_v60 = vpop.f32.mrf.mxu0  ;;  %5062 = vmatpush3.bf16.msra.mxu1 %v5246_v1 }
 0x1e4   :  { %5063 = vmatprep.subr.bf16.mxu1 %v5248_v3 }
 0x1e7   :  { %5064 = vmatpush3.bf16.msra.mxu1 %v5248_v3 }
 0x1e8   :  { %5065 = vmatprep.subr.bf16.mxu1 %v5250_v5 }
 0x1e9   :  { %v756_v61 = vpop.f32.mrf.mxu0 }
 0x1ea   :  { %5059 = vmatmul.mubr.f32.vlgmr.msra.gmra.mxu0 %v756_v61 }
 0x1eb   :  { %v4990_v63 = vpop.f32.mrf.mxu0  ;;  %5082 = vmatpush3.bf16.msra.mxu0 %v5244_v0  ;;  %5066 = vmatpush3.bf16.msra.mxu1 %v5250_v5  ;;  %v1009_v5 = vld [vmem:[#allocation2 + $0x20] sm:$0xf] }
 0x1ec   :  { %5083 = vmatprep.subr.bf16.mxu0 %v5245_v62  ;;  %5067 = vmatprep.subr.bf16.mxu1 %v5252_v7 }
 0x1ef   :  { %5084 = vmatpush3.bf16.msra.mxu0 %v5245_v62  ;;  %5068 = vmatpush3.bf16.msra.mxu1 %v5252_v7 }
 0x1f0   :  { %5085 = vmatprep.subr.bf16.mxu0 %v5247_v2  ;;  %5069 = vmatprep.subr.bf16.mxu1 %v5254_v9 }
 0x1f3   :  { %5086 = vmatpush3.bf16.msra.mxu0 %v5247_v2  ;;  %5070 = vmatpush3.bf16.msra.mxu1 %v5254_v9 }
 0x1f4   :  { %5087 = vmatprep.subr.bf16.mxu0 %v5249_v4  ;;  %5071 = vmatprep.subr.bf16.mxu1 %v5256_v13 }
 0x1f7   :  { %5088 = vmatpush3.bf16.msra.mxu0 %v5249_v4  ;;  %5072 = vmatpush3.bf16.msra.mxu1 %v5256_v13 }
 0x1f8   :  { %5089 = vmatprep.subr.bf16.mxu0 %v5251_v6  ;;  %5073 = vmatprep.subr.bf16.mxu1 %v5259_v15 }
 0x1fb   :  { %5090 = vmatpush3.bf16.msra.mxu0 %v5251_v6  ;;  %5074 = vmatpush3.bf16.msra.mxu1 %v5259_v15 }
 0x1fc   :  { %5091 = vmatprep.subr.bf16.mxu0 %v5253_v8  ;;  %5075 = vmatprep.subr.bf16.mxu1 %v5261_v16 }
 0x1ff   :  { %5092 = vmatpush3.bf16.msra.mxu0 %v5253_v8  ;;  %5076 = vmatpush3.bf16.msra.mxu1 %v5261_v16 }
 0x200   :  { %5093 = vmatprep.subr.bf16.mxu0 %v5255_v10  ;;  %5101 = vmatprep.subr.bf16.mxu1 %v6020_v17 }
 0x203   :  { %5094 = vmatpush3.bf16.msra.mxu0 %v5255_v10  ;;  %v1013_v10 = vld [vmem:[#allocation2 + $0x18] sm:$0x1] }
 0x204   :  { %5095 = vmatprep.subr.bf16.mxu0 %v5257_v14 }
 0x207   :  { %5096 = vmatpush3.bf16.msra.mxu0 %v5257_v14 }
 0x208   :  { %5121 = vmatprep.subr.mxu0 %v7950_v11 }
 0x2a2   :  { %v842_v19 = vpop.f32.mrf.mxu1 }
 0x2a3   :  { %v917_v21 = vmul.f32 0.001953125, %v842_v19  ;;  %v1016_v19 = vld [vmem:[#allocation2 + $0x10] sm:$0xf] }
 0x2a4   :  { %v5025_v20 = vpop.f32.mrf.mxu1 }
 0x2a5   :  { %v919_v23 = vmul.f32 %v917_v21, %v917_v21  ;;  %v1020_v20 = vld [vmem:[#allocation2] sm:$0x1] }
 0x2aa   :  { %v912_v22 = vpop.f32.mrf.mxu0 }
 0x2ab   :  { %v918_v24 = vmul.f32 0.001953125, %v912_v22 }
 0x2ac   :  { %v5060_v25 = vpop.f32.mrf.mxu0 }
 0x2ad   :  { %v920_v26 = vsub.f32 %v918_v24, %v919_v23 }
 0x2af   :  { %v921_v27 = vmax.f32 %v920_v26, 0.0 }
 0x2b1   :  { %v922_v28 = vadd.f32 1e-05, %v921_v27 }
 0x2b3   :  { %5488 = vrsqrt.f32 %v922_v28 }
 0x2c0   :  { %v5489_v34 = vpop.eup %5488 }
 0x2c1   :  { %v925_v35 = vmul.f32 %v5489_v34, %v924_v32 }
 0x2c3   :  { %v927_v37 = vmul.f32 %v925_v35, %v917_v21  ;;  %v933_v38 = vrot.slane %v925_v35, %v6029_v33 }
 0x2c5   :  { %v928_v39 = vsub.f32 %v926_v36, %v927_v37  ;;  %v935_v40 = vmul.f32 %v933_v38, %v5909_v52  ;;  %v936_v41 = vmul.f32 %v933_v38, %v5905_v51  ;;  %v937_v44 = vmul.f32 %v933_v38, %v5901_v48 }
 0x2c6   :  { %v938_v46 = vmul.f32 %v933_v38, %v5899_v45 }
 0x2c7   :  { %v943_v47 = vrot.slane %v928_v39, %v6029_v33 }
 0x2c9   :  { %v945_v49 = vadd.f32 %v943_v47, %v935_v40  ;;  %v946_v53 = vadd.f32 %v943_v47, %v936_v41  ;;  %v947_v55 = vadd.f32 %v943_v47, %v937_v44  ;;  %v948_v56 = vadd.f32 %v943_v47, %v938_v46 }
 0x2cb   :  { %v949_v57 = vmax.f32 %v945_v49, 0.0  ;;  %v950_v58 = vmax.f32 %v946_v53, 0.0  ;;  %v951_v59 = vmax.f32 %v947_v55, 0.0  ;;  %v952_v60 = vmax.f32 %v948_v56, 0.0 }
 0x2cd   :  { %953 = vst [vmem:[%s7931_s17] sm:$0xff] %v949_v57  ;;  %954 = vst [vmem:[%s7931_s17 + $0x8] sm:$0xff] %v950_v58  ;;  %v4749_v45 = vpack.c.bf16 %v949_v57, %v949_v57  ;;  %v4750_v48 = vpack.c.bf16 %v950_v58, %v950_v58  ;;  %v4751_v51 = vpack.c.bf16 %v951_v59, %v951_v59 }
 0x2ce   :  { %955 = vst [vmem:[%s7931_s17 + $0x10] sm:$0xff] %v951_v59  ;;  %956 = vst [vmem:[%s7931_s17 + $0x18] sm:$0xff] %v952_v60  ;;  %v4752_v52 = vpack.c.bf16 %v952_v60, %v952_v60 }
 0x2cf   :  { %v970_v61 = vshrl.u32 %v4749_v45, 16  ;;  %v978_v63 = vshrl.u32 %v4750_v48, 16  ;;  %v987_v0 = vshrl.u32 %v4751_v51, 16  ;;  %v973_v2 = vshll.u32 %v4749_v45, 16 }
 0x2d0   :  { %v995_v62 = vshrl.u32 %v4752_v52, 16  ;;  %v981_v4 = vshll.u32 %v4750_v48, 16  ;;  %v990_v7 = vshll.u32 %v4751_v51, 16  ;;  %v998_v9 = vshll.u32 %v4752_v52, 16 }
 0x2d1   :  { %v972_v1 = vrot.slane %v970_v61, 7  ;;  %v980_v3 = vrot.slane %v978_v63, 7  ;;  %v989_v6 = vrot.slane %v987_v0, 7 }
 0x2d2   :  { %v997_v8 = vrot.slane %v995_v62, 7 }
 0x2d3   :  { %v975_v13 = vor.u32 %v973_v2, %v972_v1  ;;  %v976_v14 = vrot.slane %v972_v1, 4  ;;  %v983_v15 = vor.u32 %v981_v4, %v980_v3  ;;  %v985_v16 = vrot.slane %v980_v3, 4 }
 0x2d4   :  { %v992_v21 = vor.u32 %v990_v7, %v989_v6  ;;  %v993_v22 = vrot.slane %v989_v6, 4  ;;  %v1000_v23 = vor.u32 %v998_v9, %v997_v8  ;;  %v1002_v24 = vrot.slane %v997_v8, 4 }
 0x2d5   :  { %v984_v25 = vsel %vm5697_vm14, %v976_v14, %v983_v15  ;;  %v1010_v26 = vsel %vm5706_vm15, %v975_v13, %v1009_v5  ;;  %v1014_v27 = vsel %vm5648_vm4, %v985_v16, %v1013_v10 }
 0x2d6   :  { %v1001_v28 = vsel %vm5697_vm14, %v993_v22, %v1000_v23  ;;  %1012 = vst [vmem:[#allocation2 + $0x28] sm:$0xf] %v984_v25  ;;  %v1017_v29 = vsel %vm5706_vm15, %v992_v21, %v1016_v19  ;;  %v1021_v32 = vsel %vm5648_vm4, %v1002_v24, %v1020_v20  ;;  %1011 = vst [vmem:[#allocation2 + $0x20] sm:$0xf] %v1010_v26 }
 0x2d7   :  { %1015 = vst [vmem:[#allocation2 + $0x18] sm:$0x1] %v1014_v27  ;;  %1019 = vst [vmem:[#allocation2 + $0x8] sm:$0xf] %v1001_v28  ;;  %v5263_v27 = vld [vmem:[%s8064_s27 + $0xb0] sm:$0xff]  }
 0x2d8   :  { %1018 = vst [vmem:[#allocation2 + $0x10] sm:$0xf] %v1017_v29  ;;  %1022 = vst [vmem:[#allocation2] sm:$0x1] %v1021_v32  ;;  %v5264_v29 = vld [vmem:[%s8064_s27 + $0xa8] sm:$0xff]   ;;  %v5265_v32 = vld [vmem:[%s8064_s27 + $0xa0] sm:$0xff]  }
 0x2dd   :  { %v1023_v34 = vld [vmem:[#allocation2 + $0x20] sm:$0xf]  ;;  %v1024_v35 = vld [vmem:[#allocation2 + $0x28] sm:$0xf] }
 0x2de   :  { %v1043_v36 = vld [vmem:[#allocation2 + $0x18] sm:$0x1]  ;;  %v4431_v37 = vcombine.low %v1023_v34, %v1024_v35  ;;  %v6064_v39 = vld [vmem:[#allocation2 + $0x8] sm:$0xf]  ;;  %v1046_v40 = vshrl.u32 %v1023_v34, 16  ;;  %v1049_v41 = vshll.u32 %v1023_v34, 16 }
 0x2df   :  { %v1025_v38 = vld [vmem:[#allocation2 + $0x10] sm:$0xf]  ;;  %v1055_v46 = vshll.u32 %v1024_v35, 16  ;;  %v1059_v47 = vshrl.u32 %v1024_v35, 16  ;;  %v6067_v55 = vld [vmem:[#allocation2] sm:$0x1] }
 0x2e0   :  { %v4432_v44 = vcombine.low %v1025_v38, %v6064_v39  ;;  %5097 = vmatprep.mubr.bf16.mxu0 %v4431_v37  ;;  %v1048_v49 = vrot.slane %v1046_v40, 4  ;;  %v1051_v53 = vrot.slane %v1049_v41, 5  ;;  %v1070_v56 = vshrl.u32 %v1025_v38, 16  ;;  %v1324_v4 = vld [vmem:[#allocation2 + $0x20] sm:$0xe]  ;;  %v5266_v34 = vld [vmem:[%s8064_s27 + $0x98] sm:$0xff]  }
 0x2e1   :  { %v1073_v57 = vshll.u32 %v1025_v38, 16  ;;  %v1057_v58 = vrot.slane %v1055_v46, 5  ;;  %v1061_v59 = vrot.slane %v1059_v47, 4  ;;  %v1065_v60 = vshll.u32 %v1043_v36, 16  ;;  %v5269_v37 = vld [vmem:[%s8064_s27 + $0x80] sm:$0xff]  }
 0x2e2   :  { %5098 = vmatmul.mubr.bf16.vlgmr.msra.gmra.mxu0 %v4432_v44  ;;  %v1079_v45 = vshll.u32 %v6064_v39, 16  ;;  %v1052_v48 = vor.u32 %v1051_v53, %v1048_v49  ;;  %v1072_v51 = vrot.slane %v1070_v56, 4  ;;  %v1083_v61 = vshrl.u32 %v6064_v39, 16  ;;  %v1325_v38 = vld [vmem:[#allocation2 + $0x10] sm:$0xe]  ;;  %v6120_v49 = vld [vmem:[%s7932_s8 + $0x78] sm:$0xff] }
 0x2e3   :  { %v1075_v52 = vrot.slane %v1073_v57, 5  ;;  %5129 = vmatprep.mubr.msk.f32.mxu0 %vm5501_vm9, %v7950_v11  ;;  %v1062_v63 = vor.u32 %v1061_v59, %v1057_v58  ;;  %v1089_v62 = vshll.u32 %v6067_v55, 16  ;;  %v1332_v5 = vrot.slane %v1024_v35, 5  ;;  %v5268_v35 = vld [vmem:[%s8064_s27 + $0x88] sm:$0xff]   ;;  %v6126_v53 = vld [vmem:[%s7932_s8 + $0x70] sm:$0xff]  ;;  %v6140_v56 = vld [vmem:[%s7932_s8 + $0x60] sm:$0xff] }
 0x2e4   :  { %v1081_v0 = vrot.slane %v1079_v45, 5  ;;  %v1053_v1 = vrot.slane %v1052_v48, 4  ;;  %v1085_v3 = vrot.slane %v1083_v61, 4  ;;  %v1067_v7 = vrot.slane %v1065_v60, 5  ;;  %v6147_v57 = vld [vmem:[%s7932_s8 + $0x58] sm:$0xff]  ;;  %v6161_v59 = vld [vmem:[%s7932_s8 + $0x48] sm:$0xff] }
 0x2e5   :  { %v1076_v2 = vor.u32 %v1075_v52, %v1072_v51  ;;  %v1063_v6 = vrot.slane %v1062_v63, 4  ;;  %v4441_v14 = vrot.slane %v1324_v4, 9  ;;  %v1334_v15 = vrot.slane %v1332_v5, 4  ;;  %v6168_v60 = vld [vmem:[%s7932_s8 + $0x40] sm:$0xff]  ;;  %v6175_v45 = vld [vmem:[%s7932_s8 + $0x38] sm:$0xff]  ;;  %v6182_v48 = vld [vmem:[%s7932_s8 + $0x30] sm:$0xff] }
 0x2e6   :  { %v1058_v8 = vsel %vm5735_vm5, %v1053_v1, %v1057_v58  ;;  %v1086_v10 = vor.u32 %v1085_v3, %v1081_v0  ;;  %v1335_v16 = vrot.slane %v1043_v36, 5  ;;  %v1091_v22 = vrot.slane %v1089_v62, 5  ;;  %v6154_v58 = vld [vmem:[%s7932_s8 + $0x50] sm:$0xff]  ;;  %v6189_v51 = vld [vmem:[%s7932_s8 + $0x28] sm:$0xff]  ;;  %v6196_v52 = vld [vmem:[%s7932_s8 + $0x20] sm:$0xff] }
 0x2e7   :  { %v1077_v9 = vrot.slane %v1076_v2, 4  ;;  %v1068_v13 = vsel %vm5735_vm5, %v1063_v6, %v1067_v7  ;;  %v1333_v26 = vsel %vm5744_vm6, %v4441_v14, %v1332_v5  ;;  %v1339_v36 = vrot.slane %v6064_v39, 5  ;;  %v6203_v61 = vld [vmem:[%s7932_s8 + $0x18] sm:$0xff]  ;;  %v6210_v63 = vld [vmem:[%s7932_s8 + $0x10] sm:$0xff] }
 0x2e8   :  { %v4421_v19 = vcombine.low %v1058_v8, %v1068_v13  ;;  %v1087_v21 = vrot.slane %v1086_v10, 4  ;;  %v1336_v23 = vsel %vm5744_vm6, %v1334_v15, %v1335_v16  ;;  %v4442_v41 = vrot.slane %v1325_v38, 9  ;;  %v5273_v38 = vld [vmem:[%s7933_s9 + $0x60] ss:$8 sps:$4 sm:$0xff]  }
 0x2e9   :  { %v1082_v20 = vsel %vm5735_vm5, %v1077_v9, %v1081_v0  ;;  %v4459_v28 = vcombine.low %v1333_v26, %v1336_v23  ;;  %v1341_v40 = vrot.slane %v1339_v36, 4  ;;  %v1342_v44 = vrot.slane %v6067_v55, 5  ;;  %v6133_v55 = vld [vmem:[%s7932_s8 + $0x68] sm:$0xff] }
 0x2ea   :  { %5077 = vmatprep.mubr.bf16.mxu1 %v4421_v19  ;;  %v1092_v24 = vsel %vm5735_vm5, %v1087_v21, %v1091_v22  ;;  %v1340_v39 = vsel %vm5744_vm6, %v4442_v41, %v1339_v36  ;;  %v6217_v0 = vld [vmem:[%s7932_s8 + $0x8] sm:$0xff]  ;;  %v5270_v36 = vld [vmem:[%s7933_s9 + $0x70] ss:$8 sps:$4 sm:$0xff]   ;;  %v5281_v41 = vld [vmem:[%s7933_s9 + $0x54] ss:$8 sps:$4 sm:$0xff]  }
 0x2eb   :  { %v4422_v25 = vcombine.low %v1082_v20, %v1092_v24  ;;  %v1343_v46 = vsel %vm5744_vm6, %v1341_v40, %v1342_v44  ;;  %v5278_v40 = vld [vmem:[%s7933_s9 + $0xf4] ss:$8 sps:$4 sm:$0xff]   ;;  %v5276_v44 = vld [vmem:[%s7933_s9 + $0xf0] ss:$8 sps:$4 sm:$0xff]  }
 0x2ec   :  { %v4460_v47 = vcombine.low %v1340_v39, %v1343_v46  ;;  %v5279_v46 = vld [vmem:[%s7933_s9 + $0x50] ss:$8 sps:$4 sm:$0xff]   ;;  %v5284_v39 = vld [vmem:[%s7933_s9 + $0xe4] ss:$8 sps:$4 sm:$0xff]  }
 0x2ed   :  { %5078 = vmatmul.mubr.bf16.vlgmr.msra.gmra.mxu1 %v4422_v25 }
 0x2ee   :  { %5102 = vmatpush3.bf16.msra.mxu1 %v6020_v17  ;;  %5117 = vmatprep.mubr.bf16.mxu1 %v4459_v28  ;;  %v5267_v17 = vld [vmem:[%s8064_s27 + $0x90] sm:$0xff]   ;;  %v1614_v28 = vld [vmem:[%s7932_s8] sm:$0xff] }
 0x2ef   :  { %5103 = vmatprep.subr.bf16.mxu1 %v5263_v27 }
 0x2f2   :  { %5104 = vmatpush3.bf16.msra.mxu1 %v5263_v27 }
 0x2f3   :  { %5105 = vmatprep.subr.bf16.mxu1 %v5264_v29 }
 0x2f6   :  { %5106 = vmatpush3.bf16.msra.mxu1 %v5264_v29 }
 0x2f7   :  { %5107 = vmatprep.subr.bf16.mxu1 %v5265_v32 }
 0x2fa   :  { %5108 = vmatpush3.bf16.msra.mxu1 %v5265_v32 }
 0x2fb   :  { %5109 = vmatprep.subr.bf16.mxu1 %v5266_v34 }
 0x2fe   :  { %5110 = vmatpush3.bf16.msra.mxu1 %v5266_v34 }
 0x2ff   :  { %5111 = vmatprep.subr.bf16.mxu1 %v5267_v17 }
 0x302   :  { %5112 = vmatpush3.bf16.msra.mxu1 %v5267_v17 }
 0x303   :  { %5113 = vmatprep.subr.bf16.mxu1 %v5268_v35 }
 0x306   :  { %5114 = vmatpush3.bf16.msra.mxu1 %v5268_v35  ;;  %v5272_v35 = vld [vmem:[%s7933_s9 + $0x74] ss:$8 sps:$4 sm:$0xff]  }
 0x307   :  { %5115 = vmatprep.subr.bf16.mxu1 %v5269_v37 }
 0x30a   :  { %5116 = vmatpush3.bf16.msra.mxu1 %v5269_v37  ;;  %v5275_v37 = vld [vmem:[%s7933_s9 + $0x64] ss:$8 sps:$4 sm:$0xff]  }
 0x30b   :  { %5178 = vmatprep.subr.mxu1 %v7950_v11 }
 0x30d   :  { %5118 = vmatmul.mubr.bf16.vlgmr.msra.gmra.mxu1 %v4460_v47  ;;  %v5287_v47 = vld [vmem:[%s7933_s9 + $0x44] ss:$8 sps:$4 sm:$0xff]  }
 0x30e   :  { %5210 = vmatprep.mubr.msk.f32.mxu1 %vm5501_vm9, %v7950_v11  ;;  %5179 = vmatpush3.msra.mxu1 %v6120_v49 }
 0x30f   :  { %5180 = vmatprep.subr.mxu1 %v7950_v11 }
 0x310   :  { %5181 = vmatpush3.msra.mxu1 %v6126_v53 }
 0x311   :  { %5182 = vmatprep.subr.mxu1 %v7950_v11 }
 0x312   :  { %5183 = vmatpush3.msra.mxu1 %v6133_v55 }
 0x313   :  { %5184 = vmatprep.subr.mxu1 %v7950_v11 }
 0x314   :  { %5185 = vmatpush3.msra.mxu1 %v6140_v56 }
 0x315   :  { %5186 = vmatprep.subr.mxu1 %v7950_v11 }
 0x316   :  { %5187 = vmatpush3.msra.mxu1 %v6147_v57 }
 0x317   :  { %5188 = vmatprep.subr.mxu1 %v7950_v11 }
 0x318   :  { %5189 = vmatpush3.msra.mxu1 %v6154_v58 }
 0x319   :  { %5190 = vmatprep.subr.mxu1 %v7950_v11 }
 0x31a   :  { %5191 = vmatpush3.msra.mxu1 %v6161_v59 }
 0x31b   :  { %5192 = vmatprep.subr.mxu1 %v7950_v11 }
 0x31c   :  { %5193 = vmatpush3.msra.mxu1 %v6168_v60 }
 0x31d   :  { %5194 = vmatprep.subr.mxu1 %v7950_v11 }
 0x31e   :  { %5195 = vmatpush3.msra.mxu1 %v6175_v45 }
 0x31f   :  { %5196 = vmatprep.subr.mxu1 %v7950_v11 }
 0x320   :  { %5197 = vmatpush3.msra.mxu1 %v6182_v48 }
 0x321   :  { %5198 = vmatprep.subr.mxu1 %v7950_v11 }
 0x322   :  { %5199 = vmatpush3.msra.mxu1 %v6189_v51 }
 0x323   :  { %5200 = vmatprep.subr.mxu1 %v7950_v11 }
 0x324   :  { %5201 = vmatpush3.msra.mxu1 %v6196_v52 }
 0x325   :  { %5202 = vmatprep.subr.mxu1 %v7950_v11 }
 0x326   :  { %5203 = vmatpush3.msra.mxu1 %v6203_v61 }
 0x327   :  { %5204 = vmatprep.subr.mxu1 %v7950_v11 }
 0x328   :  { %5205 = vmatpush3.msra.mxu1 %v6210_v63 }
 0x329   :  { %5206 = vmatprep.subr.mxu1 %v7950_v11 }
 0x32a   :  { %5207 = vmatpush3.msra.mxu1 %v6217_v0 }
 0x32b   :  { %5208 = vmatprep.subr.mxu1 %v7950_v11 }
 0x32c   :  { %5209 = vmatpush3.msra.mxu1 %v1614_v28 }
 0x32d   :  { %2196 = vmatprep.subr.bf16.mxu1 %v5272_v35 }
 0x3a2   :  { %v5099_v2 = vpop.f32.mrf.mxu0 }
 0x3a4   :  { %v1309_v4 = vpop.f32.mrf.mxu0 }
 0x3a6   :  { %v5100_v7 = vpop.f32.mrf.mxu0 }
 0x3a8   :  { %v1312_v15 = vpop.f32.mrf.mxu0 }
 0x3ad   :  { %v5079_v62 = vpop.f32.mrf.mxu1 }
 0x3ae   :  { %v1318_v13 = vadd.f32 %v5099_v2, %v5079_v62  ;;  %v5311_v62 = vld [vmem:[%s7933_s9 + $0x4] ss:$8 sps:$4 sm:$0xff]   ;;  %v5306_v2 = vld [vmem:[%s7933_s9 + $0xa0] ss:$8 sps:$4 sm:$0xff]  }
 0x3af   :  { %v1200_v1 = vpop.f32.mrf.mxu1 }
 0x3b0   :  { %v1310_v21 = vadd.f32 %v1309_v4, %v1200_v1  ;;  %v5503_v1 = vmov 0   ;;  %v5314_v4 = vld [vmem:[%s7933_s9 + $0x94] ss:$8 sps:$4 sm:$0xff]  }
 0x3b1   :  { %v5080_v3 = vpop.f32.mrf.mxu1 }
 0x3b2   :  { %v1321_v9 = vadd.f32 %v5100_v7, %v5080_v3  ;;  %v5309_v3 = vld [vmem:[%s7933_s9] ss:$8 sps:$4 sm:$0xff]  }
 0x3b3   :  { %v1203_v5 = vpop.f32.mrf.mxu1  ;;  %v5316_v7 = vld [vmem:[%s7933_s9 + $0x80] ss:$8 sps:$4 sm:$0xff]  }
 0x3b4   :  { %v1313_v19 = vadd.f32 %v1312_v15, %v1203_v5  ;;  %v5312_v5 = vld [vmem:[%s7933_s9 + $0x90] ss:$8 sps:$4 sm:$0xff]  }
 0x3cd   :  { %v5119_v6 = vpop.f32.mrf.mxu1 }
 0x3ce   :  { %v6224_v20 = vadd.f32 %v5119_v6, %v1318_v13  ;;  %v5318_v6 = vld [vmem:[%s7933_s9 + $0x84] ss:$8 sps:$4 sm:$0xff]  }
 0x3cf   :  { %v1451_v8 = vpop.f32.mrf.mxu1 }
 0x3d0   :  { %v6232_v23 = vadd.f32 %v1451_v8, %v1310_v21  ;;  %v1542_v25 = vmul.f32 %v6224_v20, %v6224_v20  ;;  %v5322_v8 = vld [vmem:[%s7933_s9 + $0x174] ss:$8 sps:$4 sm:$0xff]  }
 0x3d1   :  { %v5120_v10 = vpop.f32.mrf.mxu1 }
 0x3d2   :  { %v6222_v14 = vadd.f32 %v5120_v10, %v1321_v9  ;;  %v1540_v27 = vmul.f32 %v6232_v23, %v6232_v23 }
 0x3d3   :  { %v1454_v16 = vpop.f32.mrf.mxu1 }
 0x3d4   :  { %5122 = vmatpush3.msra.mxu0 %v6222_v14  ;;  %v6228_v22 = vadd.f32 %v1454_v16, %v1313_v19  ;;  %v1543_v24 = vmul.f32 %v6222_v14, %v6222_v14 }
 0x3d5   :  { %5123 = vmatprep.subr.mxu0 %v7950_v11 }
 0x3d6   :  { %5124 = vmatpush3.msra.mxu0 %v6224_v20  ;;  %v1541_v26 = vmul.f32 %v6228_v22, %v6228_v22 }
 0x3d7   :  { %5125 = vmatprep.subr.mxu0 %v7950_v11 }
 0x3d8   :  { %5126 = vmatpush3.msra.mxu0 %v6228_v22 }
 0x3d9   :  { %5127 = vmatprep.subr.mxu0 %v7950_v11 }
 0x3da   :  { %5128 = vmatpush3.msra.mxu0 %v6232_v23 }
 0x3db   :  { %5130 = vmatmul.mubr.msk.f32.vlgmr.msra.gmra.mxu0 %vm612_vm10, %v7952_v54  ;;  %5132 = vmatprep.subr.mxu0 %v7950_v11 }
 0x3dc   :  { %5133 = vmatpush3.msra.mxu0 %v1543_v24  ;;  %5140 = vmatprep.mubr.msk.f32.mxu0 %vm5501_vm9, %v7950_v11 }
 0x3dd   :  { %5134 = vmatprep.subr.mxu0 %v7950_v11 }
 0x3de   :  { %5135 = vmatpush3.msra.mxu0 %v1542_v25 }
 0x3df   :  { %5136 = vmatprep.subr.mxu0 %v7950_v11 }
 0x3e0   :  { %5137 = vmatpush3.msra.mxu0 %v1541_v26 }
 0x3e1   :  { %5138 = vmatprep.subr.mxu0 %v7950_v11 }
 0x3e2   :  { %5139 = vmatpush3.msra.mxu0 %v1540_v27  ;;  %v1777_v27 = vld [vmem:[%s7934_s6] sm:$0x1] }
 0x3e3   :  { %5141 = vmatmul.mubr.msk.f32.vlgmr.msra.gmra.mxu0 %vm612_vm10, %v7952_v54  ;;  %5143 = vmatprep.subr.mxu0 %v7950_v11  ;;  %v6852_v54 = vld [vmem:[%s7937_s12 + $0x138] sm:$0xff] }
 0x3e4   :  { %5144 = vmatpush3.msra.mxu0 %v6120_v49  ;;  %5175 = vmatprep.mubr.msk.f32.mxu0 %vm5501_vm9, %v7950_v11  ;;  %v5282_v49 = vld [vmem:[%s7933_s9 + $0xe0] ss:$8 sps:$4 sm:$0xff]   ;;  %8095 = vst [vmem:[#allocation37_spill] sm:$0xff] %v6852_v54 }
 0x3e5   :  { %5145 = vmatprep.subr.mxu0 %v7950_v11 }
 0x3e6   :  { %5146 = vmatpush3.msra.mxu0 %v6126_v53  ;;  %v5285_v53 = vld [vmem:[%s7933_s9 + $0x40] ss:$8 sps:$4 sm:$0xff]  }
 0x3e7   :  { %5147 = vmatprep.subr.mxu0 %v7950_v11 }
 0x3e8   :  { %5148 = vmatpush3.msra.mxu0 %v6133_v55  ;;  %v5290_v55 = vld [vmem:[%s7933_s9 + $0xd4] ss:$8 sps:$4 sm:$0xff]  }
 0x3e9   :  { %5149 = vmatprep.subr.mxu0 %v7950_v11 }
 0x3ea   :  { %5150 = vmatpush3.msra.mxu0 %v6140_v56  ;;  %v5293_v56 = vld [vmem:[%s7933_s9 + $0x34] ss:$8 sps:$4 sm:$0xff]  }
 0x3eb   :  { %5151 = vmatprep.subr.mxu0 %v7950_v11 }
 0x3ec   :  { %5152 = vmatpush3.msra.mxu0 %v6147_v57  ;;  %v5288_v57 = vld [vmem:[%s7933_s9 + $0xd0] ss:$8 sps:$4 sm:$0xff]  }
 0x3ed   :  { %5153 = vmatprep.subr.mxu0 %v7950_v11 }
 0x3ee   :  { %5154 = vmatpush3.msra.mxu0 %v6154_v58  ;;  %v5291_v58 = vld [vmem:[%s7933_s9 + $0x30] ss:$8 sps:$4 sm:$0xff]  }
 0x3ef   :  { %5155 = vmatprep.subr.mxu0 %v7950_v11 }
 0x3f0   :  { %5156 = vmatpush3.msra.mxu0 %v6161_v59  ;;  %v5294_v59 = vld [vmem:[%s7933_s9 + $0xc0] ss:$8 sps:$4 sm:$0xff]  }
 0x3f1   :  { %5157 = vmatprep.subr.mxu0 %v7950_v11 }
 0x3f2   :  { %5158 = vmatpush3.msra.mxu0 %v6168_v60  ;;  %v5296_v60 = vld [vmem:[%s7933_s9 + $0xc4] ss:$8 sps:$4 sm:$0xff]  }
 0x3f3   :  { %5159 = vmatprep.subr.mxu0 %v7950_v11 }
 0x3f4   :  { %5160 = vmatpush3.msra.mxu0 %v6175_v45  ;;  %v5297_v45 = vld [vmem:[%s7933_s9 + $0x20] ss:$8 sps:$4 sm:$0xff]  }
 0x3f5   :  { %5161 = vmatprep.subr.mxu0 %v7950_v11 }
 0x3f6   :  { %5162 = vmatpush3.msra.mxu0 %v6182_v48  ;;  %v5299_v48 = vld [vmem:[%s7933_s9 + $0x24] ss:$8 sps:$4 sm:$0xff]  }
 0x3f7   :  { %5163 = vmatprep.subr.mxu0 %v7950_v11 }
 0x3f8   :  { %5164 = vmatpush3.msra.mxu0 %v6189_v51  ;;  %v5302_v51 = vld [vmem:[%s7933_s9 + $0xb4] ss:$8 sps:$4 sm:$0xff]  }
 0x3f9   :  { %5165 = vmatprep.subr.mxu0 %v7950_v11 }
 0x3fa   :  { %5166 = vmatpush3.msra.mxu0 %v6196_v52  ;;  %v5305_v52 = vld [vmem:[%s7933_s9 + $0x14] ss:$8 sps:$4 sm:$0xff]  }
 0x3fb   :  { %5167 = vmatprep.subr.mxu0 %v7950_v11 }
 0x3fc   :  { %5168 = vmatpush3.msra.mxu0 %v6203_v61  ;;  %v5300_v61 = vld [vmem:[%s7933_s9 + $0xb0] ss:$8 sps:$4 sm:$0xff]  }
 0x3fd   :  { %5169 = vmatprep.subr.mxu0 %v7950_v11 }
 0x3fe   :  { %5170 = vmatpush3.msra.mxu0 %v6210_v63  ;;  %v5303_v63 = vld [vmem:[%s7933_s9 + $0x10] ss:$8 sps:$4 sm:$0xff]  }
 0x3ff   :  { %5171 = vmatprep.subr.mxu0 %v7950_v11 }
 0x400   :  { %5172 = vmatpush3.msra.mxu0 %v6217_v0  ;;  %v5308_v0 = vld [vmem:[%s7933_s9 + $0xa4] ss:$8 sps:$4 sm:$0xff]  }
 0x401   :  { %5173 = vmatprep.subr.mxu0 %v7950_v11 }
 0x402   :  { %5174 = vmatpush3.msra.mxu0 %v1614_v28 }
 0x403   :  { %2051 = vmatprep.subr.bf16.mxu0 %v5278_v40 }
 0x49b   :  { %v1536_v29 = vpop.f32.mrf.mxu0 }
 0x49c   :  { %5176 = vmatmul.mubr.f32.vlgmr.msra.gmra.mxu0 %v1536_v29 }
 0x49d   :  { %v5131_v32 = vpop.f32.mrf.mxu0  ;;  %2052 = vmatpush1.bf16.msra.mxu0 %v5276_v44  ;;  %2083 = vmatprep.mubr.bf16.mxu0 %v5503_v1 }
 0x49e   :  { %2053 = vmatprep.subr.bf16.mxu0 %v5284_v39  ;;  %v1779_v32 = vld [vmem:[%s7935_s7] sm:$0x1] }
 0x4a1   :  { %2054 = vmatpush1.bf16.msra.mxu0 %v5282_v49 }
 0x4a2   :  { %2055 = vmatprep.subr.bf16.mxu0 %v5290_v55 }
 0x4a3   :  { %v1610_v34 = vpop.f32.mrf.mxu0 }
 0x4a4   :  { %5211 = vmatmul.mubr.f32.vlgmr.msra.gmra.mxu1 %v1610_v34 }
 0x4a5   :  { %v5142_v17 = vpop.f32.mrf.mxu0  ;;  %2197 = vmatpush1.bf16.msra.mxu1 %v5270_v36  ;;  %2056 = vmatpush1.bf16.msra.mxu0 %v5288_v57 }
 0x4a6   :  { %2198 = vmatprep.subr.bf16.mxu1 %v5275_v37  ;;  %2057 = vmatprep.subr.bf16.mxu0 %v5296_v60 }
 0x4a7   :  { %2228 = vmatprep.mubr.bf16.mxu1 %v5503_v1 }
 0x4a9   :  { %2199 = vmatpush1.bf16.msra.mxu1 %v5273_v38  ;;  %2058 = vmatpush1.bf16.msra.mxu0 %v5294_v59 }
 0x4aa   :  { %2200 = vmatprep.subr.bf16.mxu1 %v5281_v41  ;;  %2059 = vmatprep.subr.bf16.mxu0 %v5302_v51 }
 0x4ad   :  { %2201 = vmatpush1.bf16.msra.mxu1 %v5279_v46  ;;  %2060 = vmatpush1.bf16.msra.mxu0 %v5300_v61 }
 0x4ae   :  { %2202 = vmatprep.subr.bf16.mxu1 %v5287_v47  ;;  %2061 = vmatprep.subr.bf16.mxu0 %v5308_v0 }
 0x4b1   :  { %2203 = vmatpush1.bf16.msra.mxu1 %v5285_v53  ;;  %2062 = vmatpush1.bf16.msra.mxu0 %v5306_v2 }
 0x4b2   :  { %2204 = vmatprep.subr.bf16.mxu1 %v5293_v56  ;;  %2063 = vmatprep.subr.bf16.mxu0 %v5314_v4 }
 0x4b5   :  { %2205 = vmatpush1.bf16.msra.mxu1 %v5291_v58  ;;  %2064 = vmatpush1.bf16.msra.mxu0 %v5312_v5 }
 0x4b6   :  { %2206 = vmatprep.subr.bf16.mxu1 %v5299_v48  ;;  %2065 = vmatprep.subr.bf16.mxu0 %v5318_v6 }
 0x4b9   :  { %2207 = vmatpush1.bf16.msra.mxu1 %v5297_v45  ;;  %2066 = vmatpush1.bf16.msra.mxu0 %v5316_v7 }
 0x4ba   :  { %2208 = vmatprep.subr.bf16.mxu1 %v5305_v52  ;;  %2374 = vmatprep.subr.bf16.mxu0 %v5322_v8 }
 0x4bd   :  { %2209 = vmatpush1.bf16.msra.mxu1 %v5303_v63 }
 0x4be   :  { %2210 = vmatprep.subr.bf16.mxu1 %v5311_v62 }
 0x4c1   :  { %2211 = vmatpush1.bf16.msra.mxu1 %v5309_v3 }
 0x55c   :  { %v1696_v9 = vpop.f32.mrf.mxu0 }
 0x55d   :  { %v1770_v13 = vmul.f32 0.001953125, %v1696_v9 }
 0x55e   :  { %v5177_v10 = vpop.f32.mrf.mxu0 }
 0x55f   :  { %v1772_v16 = vmul.f32 %v1770_v13, %v1770_v13  ;;  %v1862_v10 = vld [vmem:[#allocation2 + $0x20] sm:$0xf] }
 0x564   :  { %v1766_v15 = vpop.f32.mrf.mxu1 }
 0x565   :  { %v1771_v19 = vmul.f32 0.001953125, %v1766_v15 }
 0x566   :  { %v5212_v21 = vpop.f32.mrf.mxu1 }
 0x567   :  { %v1773_v24 = vsub.f32 %v1771_v19, %v1772_v16  ;;  %v1869_v21 = vld [vmem:[#allocation2 + $0x10] sm:$0xf] }
 0x569   :  { %v1774_v25 = vmax.f32 %v1773_v24, 0.0  ;;  %v1873_v24 = vld [vmem:[#allocation2] sm:$0x1] }
 0x56b   :  { %v1775_v26 = vadd.f32 1e-05, %v1774_v25 }
 0x56d   :  { %5490 = vrsqrt.f32 %v1775_v26 }
 0x57a   :  { %v5491_v28 = vpop.eup %5490 }
 0x57b   :  { %v1778_v29 = vmul.f32 %v5491_v28, %v1777_v27 }
 0x57d   :  { %v1780_v34 = vmul.f32 %v1778_v29, %v1770_v13  ;;  %v1786_v17 = vrot.slane %v1778_v29, %v6029_v33  ;;  %v1866_v13 = vld [vmem:[#allocation2 + $0x18] sm:$0x1] }
 0x57f   :  { %v1781_v35 = vsub.f32 %v1779_v32, %v1780_v34  ;;  %v1788_v36 = vmul.f32 %v1786_v17, %v6232_v23  ;;  %v1789_v37 = vmul.f32 %v1786_v17, %v6228_v22  ;;  %v1790_v38 = vmul.f32 %v1786_v17, %v6224_v20 }
 0x580   :  { %v1791_v40 = vmul.f32 %v1786_v17, %v6222_v14 }
 0x581   :  { %v1796_v41 = vrot.slane %v1781_v35, %v6029_v33 }
 0x583   :  { %v1798_v44 = vadd.f32 %v1796_v41, %v1788_v36  ;;  %v1799_v46 = vadd.f32 %v1796_v41, %v1789_v37  ;;  %v1800_v39 = vadd.f32 %v1796_v41, %v1790_v38  ;;  %v1801_v47 = vadd.f32 %v1796_v41, %v1791_v40 }
 0x585   :  { %v1802_v49 = vmax.f32 %v1798_v44, 0.0  ;;  %v1803_v53 = vmax.f32 %v1799_v46, 0.0  ;;  %v1804_v55 = vmax.f32 %v1800_v39, 0.0  ;;  %v1805_v56 = vmax.f32 %v1801_v47, 0.0 }
 0x587   :  { %1806 = vst [vmem:[%s7936_s18] sm:$0xff] %v1802_v49  ;;  %1807 = vst [vmem:[%s7936_s18 + $0x8] sm:$0xff] %v1803_v53  ;;  %v4753_v14 = vpack.c.bf16 %v1802_v49, %v1802_v49  ;;  %v4754_v20 = vpack.c.bf16 %v1803_v53, %v1803_v53  ;;  %v4755_v22 = vpack.c.bf16 %v1804_v55, %v1804_v55 }
 0x588   :  { %1808 = vst [vmem:[%s7936_s18 + $0x10] sm:$0xff] %v1804_v55  ;;  %1809 = vst [vmem:[%s7936_s18 + $0x18] sm:$0xff] %v1805_v56  ;;  %v4756_v23 = vpack.c.bf16 %v1805_v56, %v1805_v56 }
 0x589   :  { %v1823_v57 = vshrl.u32 %v4753_v14, 16  ;;  %v1831_v58 = vshrl.u32 %v4754_v20, 16  ;;  %v1840_v59 = vshrl.u32 %v4755_v22, 16  ;;  %v1826_v48 = vshll.u32 %v4753_v14, 16 }
 0x58a   :  { %v1848_v60 = vshrl.u32 %v4756_v23, 16  ;;  %v1834_v52 = vshll.u32 %v4754_v20, 16  ;;  %v1843_v63 = vshll.u32 %v4755_v22, 16  ;;  %v1851_v62 = vshll.u32 %v4756_v23, 16 }
 0x58b   :  { %v1825_v45 = vrot.slane %v1823_v57, 7  ;;  %v1833_v51 = vrot.slane %v1831_v58, 7  ;;  %v1842_v61 = vrot.slane %v1840_v59, 7 }
 0x58c   :  { %v1850_v0 = vrot.slane %v1848_v60, 7 }
 0x58d   :  { %v1828_v2 = vor.u32 %v1826_v48, %v1825_v45  ;;  %v1829_v3 = vrot.slane %v1825_v45, 4  ;;  %v1836_v4 = vor.u32 %v1834_v52, %v1833_v51  ;;  %v1838_v5 = vrot.slane %v1833_v51, 4 }
 0x58e   :  { %v1845_v6 = vor.u32 %v1843_v63, %v1842_v61  ;;  %v1846_v7 = vrot.slane %v1842_v61, 4  ;;  %v1853_v8 = vor.u32 %v1851_v62, %v1850_v0  ;;  %v1855_v9 = vrot.slane %v1850_v0, 4  ;;  %v5320_v63 = vld [vmem:[%s7933_s9 + $0x170] ss:$8 sps:$4 sm:$0xff]  }
 0x58f   :  { %v1837_v15 = vsel %vm5697_vm14, %v1829_v3, %v1836_v4  ;;  %v1863_v16 = vsel %vm5706_vm15, %v1828_v2, %v1862_v10  ;;  %v1867_v19 = vsel %vm5648_vm4, %v1838_v5, %v1866_v13  ;;  %v5325_v3 = vld [vmem:[%s7933_s9 + $0x164] ss:$8 sps:$4 sm:$0xff]   ;;  %v5326_v13 = vld [vmem:[%s7933_s9 + $0x150] ss:$8 sps:$4 sm:$0xff]  }
 0x590   :  { %v1854_v25 = vsel %vm5697_vm14, %v1846_v7, %v1853_v8  ;;  %1865 = vst [vmem:[#allocation2 + $0x28] sm:$0xf] %v1837_v15  ;;  %v1870_v26 = vsel %vm5706_vm15, %v1845_v6, %v1869_v21  ;;  %v1874_v27 = vsel %vm5648_vm4, %v1855_v9, %v1873_v24  ;;  %1864 = vst [vmem:[#allocation2 + $0x20] sm:$0xf] %v1863_v16  ;;  %v5323_v6 = vld [vmem:[%s7933_s9 + $0x160] ss:$8 sps:$4 sm:$0xff]  }
 0x591   :  { %1868 = vst [vmem:[#allocation2 + $0x18] sm:$0x1] %v1867_v19  ;;  %1871 = vst [vmem:[#allocation2 + $0x10] sm:$0xf] %v1870_v26  ;;  %v5328_v8 = vld [vmem:[%s7933_s9 + $0x154] ss:$8 sps:$4 sm:$0xff]  }
 0x592   :  { %1872 = vst [vmem:[#allocation2 + $0x8] sm:$0xf] %v1854_v25  ;;  %1875 = vst [vmem:[#allocation2] sm:$0x1] %v1874_v27  ;;  %v5331_v16 = vld [vmem:[%s7933_s9 + $0x144] ss:$8 sps:$4 sm:$0xff]  }
 0x593   :  { %v5329_v19 = vld [vmem:[%s7933_s9 + $0x140] ss:$8 sps:$4 sm:$0xff]   ;;  %v5334_v21 = vld [vmem:[%s7933_s9 + $0x134] ss:$8 sps:$4 sm:$0xff]   ;;  %v5332_v24 = vld [vmem:[%s7933_s9 + $0x130] ss:$8 sps:$4 sm:$0xff]  }
 0x594   :  { %v5337_v25 = vld [vmem:[%s7933_s9 + $0x124] ss:$8 sps:$4 sm:$0xff]   ;;  %v5335_v26 = vld [vmem:[%s7933_s9 + $0x120] ss:$8 sps:$4 sm:$0xff]   ;;  %v5340_v27 = vld [vmem:[%s7933_s9 + $0x114] ss:$8 sps:$4 sm:$0xff]  }
 0x595   :  { %vm2961_vm4 = vcmask 1047556  }
 0x596   :  { %vm7240_vm11 = vmand %vm2961_vm4, %vm76_vm7 }
 0x597   :  { %v1876_v28 = vld [vmem:[#allocation2 + $0x20] sm:$0xf]  ;;  %v6428_v29 = vld [vmem:[#allocation2 + $0x28] sm:$0xf]  ;;  %vm2963_vm7 = vmor %vm7240_vm11, %vm5706_vm15 }
 0x598   :  { %v6430_v32 = vld [vmem:[#allocation2 + $0x18] sm:$0x1]  ;;  %v1899_v34 = vshrl.u32 %v1876_v28, 16  ;;  %v1902_v17 = vshll.u32 %v1876_v28, 16  ;;  %v4509_v35 = vcombine.low %v1876_v28, %v6428_v29  ;;  %v1878_v36 = vld [vmem:[#allocation2 + $0x10] sm:$0xf] }
 0x599   :  { %v6433_v37 = vld [vmem:[#allocation2 + $0x8] sm:$0xf]  ;;  %v1923_v38 = vshrl.u32 %v1878_v36, 16  ;;  %v1926_v12 = vshll.u32 %v1878_v36, 16  ;;  %v1908_v40 = vshll.u32 %v6428_v29, 16  ;;  %v1912_v46 = vshrl.u32 %v6428_v29, 16 }
 0x59a   :  { %2229 = vmatmul.mubr.bf16.vlgmr.msra.gmra.mxu1 %v4509_v35  ;;  %v1901_v41 = vrot.slane %v1899_v34, 4  ;;  %v1904_v44 = vrot.slane %v1902_v17, 5  ;;  %v1918_v47 = vshll.u32 %v6430_v32, 16  ;;  %v1932_v53 = vshll.u32 %v6433_v37, 16  ;;  %v6442_v45 = vld [vmem:[#allocation2] sm:$0x1] }
 0x59b   :  { %2238 = vmatprep.mubr.bf16.mxu1 %v5503_v1  ;;  %v1910_v39 = vrot.slane %v1908_v40, 5  ;;  %v1925_v49 = vrot.slane %v1923_v38, 4  ;;  %v1914_v56 = vrot.slane %v1912_v46, 4  ;;  %v1928_v14 = vrot.slane %v1926_v12, 5  ;;  %v5338_v34 = vld [vmem:[%s7933_s9 + $0x110] ss:$8 sps:$4 sm:$0xff]  }
 0x59c   :  { %v1905_v55 = vor.u32 %v1904_v44, %v1901_v41  ;;  %v1936_v20 = vshrl.u32 %v6433_v37, 16  ;;  %v1934_v22 = vrot.slane %v1932_v53, 5  ;;  %v4510_v59 = vcombine.low %v1878_v36, %v6433_v37  ;;  %v5343_v17 = vld [vmem:[%s7933_s9 + $0x104] ss:$8 sps:$4 sm:$0xff]   ;;  %v2249_v35 = vld [vmem:[#allocation2 + $0x20] sm:$0xe] }
 0x59d   :  { %v1915_v57 = vor.u32 %v1914_v56, %v1910_v39  ;;  %v1920_v60 = vrot.slane %v1918_v47, 5  ;;  %v1929_v52 = vor.u32 %v1928_v14, %v1925_v49  ;;  %v1942_v62 = vshll.u32 %v6442_v45, 16  ;;  %v5341_v38 = vld [vmem:[%s7933_s9 + $0x100] ss:$8 sps:$4 sm:$0xff]   ;;  %v6517_v56 = vld [vmem:[%s7937_s12 + $0xf8] sm:$0xff] }
 0x59e   :  { %v1906_v23 = vrot.slane %v1905_v55, 4  ;;  %v1938_v58 = vrot.slane %v1936_v20, 4  ;;  %v2257_v28 = vrot.slane %v6428_v29, 5  ;;  %v4527_v12 = vrot.slane %v2249_v35, 9  ;;  %v6528_v14 = vld [vmem:[%s7937_s12 + $0xe8] sm:$0xff]  ;;  %v6534_v20 = vld [vmem:[%s7937_s12 + $0xe0] sm:$0xff] }
 0x59f   :  { %v1916_v51 = vrot.slane %v1915_v57, 4  ;;  %v1930_v4 = vrot.slane %v1929_v52, 4  ;;  %v1944_v7 = vrot.slane %v1942_v62, 5  ;;  %v2260_v29 = vrot.slane %v6430_v32, 5  ;;  %v6552_v57 = vld [vmem:[%s7937_s12 + $0xc8] sm:$0xff]  ;;  %v6594_v52 = vld [vmem:[%s7937_s12 + $0x90] sm:$0xff] }
 0x5a0   :  { %v1911_v48 = vsel %vm5735_vm5, %v1906_v23, %v1910_v39  ;;  %v1939_v61 = vor.u32 %v1938_v58, %v1934_v22  ;;  %v2259_v36 = vrot.slane %v2257_v28, 4  ;;  %v2264_v41 = vrot.slane %v6433_v37, 5  ;;  %v2250_v39 = vld [vmem:[#allocation2 + $0x10] sm:$0xe]  ;;  %v6558_v58 = vld [vmem:[%s7937_s12 + $0xc0] sm:$0xff] }
 0x5a1   :  { %v1921_v0 = vsel %vm5735_vm5, %v1916_v51, %v1920_v60  ;;  %v1935_v9 = vsel %vm5735_vm5, %v1930_v4, %v1934_v22  ;;  %v2258_v44 = vsel %vm5744_vm6, %v4527_v12, %v2257_v28  ;;  %v4528_v49 = vrot.slane %v2250_v39, 9  ;;  %v6540_v22 = vld [vmem:[%s7937_s12 + $0xd8] sm:$0xff]  ;;  %v6546_v23 = vld [vmem:[%s7937_s12 + $0xd0] sm:$0xff]  ;;  %v6750_v35 = vld [vmem:[%s7937_s12 + $0x1c0] sm:$0xff] }
 0x5a2   :  { %2239 = vmatmul.mubr.bf16.gmra.mxu1 %v4510_v59  ;;  %v4491_v2 = vcombine.low %v1911_v48, %v1921_v0  ;;  %v1940_v5 = vrot.slane %v1939_v61, 4  ;;  %v2261_v40 = vsel %vm5744_vm6, %v2259_v36, %v2260_v29  ;;  %v2266_v47 = vrot.slane %v2264_v41, 4  ;;  %v6564_v59 = vld [vmem:[%s7937_s12 + $0xb8] sm:$0xff]  ;;  %v6570_v60 = vld [vmem:[%s7937_s12 + $0xb0] sm:$0xff]  ;;  %v6582_v48 = vld [vmem:[%s7937_s12 + $0xa0] sm:$0xff]  ;;  %8078 = vst [vmem:[#allocation20_spill] sm:$0xff] %v6750_v35 }
 0x5a3   :  { %2499 = vmatprep.mubr.f32.mxu1 %v7950_v11  ;;  %v4545_v46 = vcombine.low %v2258_v44, %v2261_v40  ;;  %v2267_v53 = vrot.slane %v6442_v45, 5  ;;  %v2265_v55 = vsel %vm5744_vm6, %v4528_v49, %v2264_v41  ;;  %v6576_v45 = vld [vmem:[%s7937_s12 + $0xa8] sm:$0xff]  ;;  %v6588_v51 = vld [vmem:[%s7937_s12 + $0x98] sm:$0xff]  ;;  %v6618_v62 = vld [vmem:[%s7937_s12 + $0x70] sm:$0xff] }
 0x5a4   :  { %2084 = vmatmul.mubr.bf16.vlgmr.msra.gmra.mxu0 %v4491_v2  ;;  %v1945_v10 = vsel %vm5735_vm5, %v1940_v5, %v1944_v7  ;;  %v6600_v61 = vld [vmem:[%s7937_s12 + $0x88] sm:$0xff]  ;;  %v6612_v0 = vld [vmem:[%s7937_s12 + $0x78] sm:$0xff]  ;;  %v6642_v5 = vld [vmem:[%s7937_s12 + $0x50] sm:$0xff] }
 0x5a5   :  { %2375 = vmatpush1.bf16.msra.mxu0 %v5320_v63  ;;  %2093 = vmatprep.mubr.bf16.mxu0 %v5503_v1  ;;  %v4492_v15 = vcombine.low %v1935_v9, %v1945_v10  ;;  %v2268_v32 = vsel %vm5744_vm6, %v2266_v47, %v2267_v53  ;;  %v6606_v63 = vld [vmem:[%s7937_s12 + $0x80] sm:$0xff]  ;;  %v6624_v2 = vld [vmem:[%s7937_s12 + $0x68] sm:$0xff]  ;;  %v6636_v4 = vld [vmem:[%s7937_s12 + $0x58] sm:$0xff] }
 0x5a6   :  { %2376 = vmatprep.subr.bf16.mxu0 %v5325_v3  ;;  %v4546_v37 = vcombine.low %v2265_v55, %v2268_v32  ;;  %v6630_v3 = vld [vmem:[%s7937_s12 + $0x60] sm:$0xff]  ;;  %v6666_v9 = vld [vmem:[%s7937_s12 + $0x30] sm:$0xff]  ;;  %v6672_v10 = vld [vmem:[%s7937_s12 + $0x28] sm:$0xff] }
 0x5a7   :  { %v6654_v7 = vld [vmem:[%s7937_s12 + $0x40] sm:$0xff]  ;;  %v6732_v28 = vld [vmem:[%s7937_s12 + $0x1d8] sm:$0xff]  ;;  %v6768_v12 = vld [vmem:[%s7937_s12 + $0x1a8] sm:$0xff] }
 0x5a8   :  { %8075 = vst [vmem:[#allocation17_spill] sm:$0xff] %v6732_v28  ;;  %v6756_v36 = vld [vmem:[%s7937_s12 + $0x1b8] sm:$0xff]  ;;  %8081 = vst [vmem:[#allocation23_spill] sm:$0xff] %v6768_v12  ;;  %v6774_v29 = vld [vmem:[%s7937_s12 + $0x1a0] sm:$0xff] }
 0x5a9   :  { %2377 = vmatpush1.bf16.msra.mxu0 %v5323_v6  ;;  %v6648_v6 = vld [vmem:[%s7937_s12 + $0x48] sm:$0xff]  ;;  %8079 = vst [vmem:[#allocation21_spill] sm:$0xff] %v6756_v36  ;;  %8082 = vst [vmem:[#allocation24_spill] sm:$0xff] %v6774_v29  ;;  %v6780_v40 = vld [vmem:[%s7937_s12 + $0x198] sm:$0xff] }
 0x5aa   :  { %2378 = vmatprep.subr.bf16.mxu0 %v5328_v8  ;;  %v6660_v8 = vld [vmem:[%s7937_s12 + $0x38] sm:$0xff]  ;;  %8083 = vst [vmem:[#allocation25_spill] sm:$0xff] %v6780_v40  ;;  %v6786_v41 = vld [vmem:[%s7937_s12 + $0x190] sm:$0xff]  ;;  %v6792_v44 = vld [vmem:[%s7937_s12 + $0x188] sm:$0xff] }
 0x5ab   :  { %8084 = vst [vmem:[#allocation26_spill] sm:$0xff] %v6786_v41  ;;  %8085 = vst [vmem:[#allocation27_spill] sm:$0xff] %v6792_v44  ;;  %v6804_v39 = vld [vmem:[%s7937_s12 + $0x178] sm:$0xff]  ;;  %v6810_v47 = vld [vmem:[%s7937_s12 + $0x170] sm:$0xff] }
 0x5ac   :  { %2094 = vmatmul.mubr.bf16.gmra.mxu0 %v4492_v15  ;;  %v6684_v15 = vld [vmem:[%s7937_s12 + $0x18] sm:$0xff]  ;;  %8087 = vst [vmem:[#allocation29_spill] sm:$0xff] %v6804_v39  ;;  %8088 = vst [vmem:[#allocation30_spill] sm:$0xff] %v6810_v47  ;;  %v6816_v49 = vld [vmem:[%s7937_s12 + $0x168] sm:$0xff] }
 0x5ad   :  { %2379 = vmatpush1.bf16.msra.mxu0 %v5326_v13  ;;  %2406 = vmatprep.mubr.bf16.mxu0 %v5503_v1  ;;  %v6678_v13 = vld [vmem:[%s7937_s12 + $0x20] sm:$0xff]  ;;  %8089 = vst [vmem:[#allocation31_spill] sm:$0xff] %v6816_v49  ;;  %v6828_v32 = vld [vmem:[%s7937_s12 + $0x158] sm:$0xff]  ;;  %v6834_v55 = vld [vmem:[%s7937_s12 + $0x150] sm:$0xff] }
 0x5ae   :  { %2380 = vmatprep.subr.bf16.mxu0 %v5331_v16  ;;  %v6690_v16 = vld [vmem:[%s7937_s12 + $0x10] sm:$0xff]  ;;  %v6822_v53 = vld [vmem:[%s7937_s12 + $0x160] sm:$0xff]  ;;  %8091 = vst [vmem:[#allocation33_spill] sm:$0xff] %v6828_v32  ;;  %8092 = vst [vmem:[#allocation34_spill] sm:$0xff] %v6834_v55 }
 0x5af   :  { %8068 = vst [vmem:[#allocation10_spill] sm:$0xff] %v6690_v16  ;;  %8090 = vst [vmem:[#allocation32_spill] sm:$0xff] %v6822_v53  ;;  %v6846_v11 = vld [vmem:[%s7937_s12 + $0x140] sm:$0xff] }
 0x5b0   :  { %8094 = vst [vmem:[#allocation36_spill] sm:$0xff] %v6846_v11 }
 0x5b1   :  { %2381 = vmatpush1.bf16.msra.mxu0 %v5329_v19  ;;  %v6696_v19 = vld [vmem:[%s7937_s12 + $0x8] sm:$0xff] }
 0x5b2   :  { %2382 = vmatprep.subr.bf16.mxu0 %v5334_v21  ;;  %8069 = vst [vmem:[#allocation11_spill] sm:$0xff] %v6696_v19  ;;  %v6702_v21 = vld [vmem:[%s7937_s12] sm:$0xff] }
 0x5b3   :  { %8070 = vst [vmem:[#allocation12_spill] sm:$0xff] %v6702_v21 }
 0x5b5   :  { %2383 = vmatpush1.bf16.msra.mxu0 %v5332_v24  ;;  %v6708_v24 = vld [vmem:[%s7937_s12 + $0x1f8] sm:$0xff] }
 0x5b6   :  { %2384 = vmatprep.subr.bf16.mxu0 %v5337_v25  ;;  %8071 = vst [vmem:[#allocation13_spill] sm:$0xff] %v6708_v24  ;;  %v6714_v25 = vld [vmem:[%s7937_s12 + $0x1f0] sm:$0xff] }
 0x5b7   :  { %8072 = vst [vmem:[#allocation14_spill] sm:$0xff] %v6714_v25 }
 0x5b9   :  { %2385 = vmatpush1.bf16.msra.mxu0 %v5335_v26  ;;  %v6720_v26 = vld [vmem:[%s7937_s12 + $0x1e8] sm:$0xff] }
 0x5ba   :  { %2386 = vmatprep.subr.bf16.mxu0 %v5340_v27  ;;  %8073 = vst [vmem:[#allocation15_spill] sm:$0xff] %v6720_v26  ;;  %v6726_v27 = vld [vmem:[%s7937_s12 + $0x1e0] sm:$0xff] }
 0x5bb   :  { %8074 = vst [vmem:[#allocation16_spill] sm:$0xff] %v6726_v27 }
 0x5bd   :  { %2387 = vmatpush1.bf16.msra.mxu0 %v5338_v34  ;;  %v6738_v34 = vld [vmem:[%s7937_s12 + $0x1d0] sm:$0xff] }
 0x5be   :  { %2388 = vmatprep.subr.bf16.mxu0 %v5343_v17  ;;  %8076 = vst [vmem:[#allocation18_spill] sm:$0xff] %v6738_v34  ;;  %v6744_v17 = vld [vmem:[%s7937_s12 + $0x1c8] sm:$0xff] }
 0x5bf   :  { %8077 = vst [vmem:[#allocation19_spill] sm:$0xff] %v6744_v17 }
 0x5c1   :  { %2389 = vmatpush1.bf16.msra.mxu0 %v5341_v38  ;;  %v6762_v38 = vld [vmem:[%s7937_s12 + $0x1b0] sm:$0xff] }
 0x5c2   :  { %2720 = vmatprep.subr.mxu0 %v6517_v56  ;;  %8080 = vst [vmem:[#allocation22_spill] sm:$0xff] %v6762_v38 }
 0x5c4   :  { %2407 = vmatmul.mubr.bf16.vlgmr.msra.gmra.mxu0 %v4545_v46  ;;  %v6798_v46 = vld [vmem:[%s7937_s12 + $0x180] sm:$0xff] }
 0x5c5   :  { %2416 = vmatprep.mubr.bf16.mxu0 %v5503_v1  ;;  %v6522_v1 = vld [vmem:[%s7937_s12 + $0xf0] sm:$0xff]  ;;  %8086 = vst [vmem:[#allocation28_spill] sm:$0xff] %v6798_v46 }
 0x5c6   :  { %2721 = vmatpush1.msra.mxu0 %v6522_v1 }
 0x5c7   :  { %2722 = vmatprep.subr.mxu0 %v6528_v14 }
 0x5c8   :  { %2723 = vmatpush1.msra.mxu0 %v6534_v20 }
 0x5c9   :  { %2724 = vmatprep.subr.mxu0 %v6540_v22 }
 0x5ca   :  { %2725 = vmatpush1.msra.mxu0 %v6546_v23 }
 0x5cb   :  { %2726 = vmatprep.subr.mxu0 %v6552_v57 }
 0x5cc   :  { %2417 = vmatmul.mubr.bf16.gmra.mxu0 %v4546_v37  ;;  %v6840_v37 = vld [vmem:[%s7937_s12 + $0x148] sm:$0xff] }
 0x5cd   :  { %2727 = vmatpush1.msra.mxu0 %v6558_v58  ;;  %8093 = vst [vmem:[#allocation35_spill] sm:$0xff] %v6840_v37 }
 0x5ce   :  { %2728 = vmatprep.subr.mxu0 %v6564_v59 }
 0x5cf   :  { %2729 = vmatpush1.msra.mxu0 %v6570_v60 }
 0x5d0   :  { %2730 = vmatprep.subr.mxu0 %v6576_v45 }
 0x5d1   :  { %2731 = vmatpush1.msra.mxu0 %v6582_v48 }
 0x5d2   :  { %2732 = vmatprep.subr.mxu0 %v6588_v51 }
 0x5d3   :  { %2733 = vmatpush1.msra.mxu0 %v6594_v52 }
 0x5d4   :  { %2734 = vmatprep.subr.mxu0 %v6600_v61 }
 0x5d5   :  { %2735 = vmatpush1.msra.mxu0 %v6606_v63 }
 0x5d6   :  { %2736 = vmatprep.subr.mxu0 %v6612_v0 }
 0x5d7   :  { %2737 = vmatpush1.msra.mxu0 %v6618_v62 }
 0x5d8   :  { %2738 = vmatprep.subr.mxu0 %v6624_v2 }
 0x5d9   :  { %2739 = vmatpush1.msra.mxu0 %v6630_v3 }
 0x5da   :  { %2740 = vmatprep.subr.mxu0 %v6636_v4 }
 0x5db   :  { %2741 = vmatpush1.msra.mxu0 %v6642_v5 }
 0x5dc   :  { %2742 = vmatprep.subr.mxu0 %v6648_v6 }
 0x5dd   :  { %2743 = vmatpush1.msra.mxu0 %v6654_v7 }
 0x5de   :  { %2744 = vmatprep.subr.mxu0 %v6660_v8 }
 0x5df   :  { %2745 = vmatpush1.msra.mxu0 %v6666_v9 }
 0x5e0   :  { %2746 = vmatprep.subr.mxu0 %v6672_v10 }
 0x5e1   :  { %2747 = vmatpush1.msra.mxu0 %v6678_v13 }
 0x5e2   :  { %2748 = vmatprep.subr.mxu0 %v6684_v15 }
 0x5e3   :  { %2749 = vmatpush1.msra.mxu0 %v6690_v16 }
 0x5e4   :  { %2750 = vmatprep.subr.mxu0 %v6696_v19 }
 0x5e5   :  { %2751 = vmatpush1.msra.mxu0 %v6702_v21 }
 0x5e6   :  { %2752 = vmatprep.subr.mxu0 %v6708_v24 }
 0x5e7   :  { %2753 = vmatpush2.msra.mxu0 %v6714_v25 }
 0x5e8   :  { %2754 = vmatprep.subr.mxu0 %v6720_v26 }
 0x5e9   :  { %2755 = vmatpush2.msra.mxu0 %v6726_v27 }
 0x5ea   :  { %2756 = vmatprep.subr.mxu0 %v6732_v28 }
 0x5eb   :  { %2757 = vmatpush2.msra.mxu0 %v6738_v34 }
 0x5ec   :  { %2758 = vmatprep.subr.mxu0 %v6744_v17 }
 0x5ed   :  { %2759 = vmatpush2.msra.mxu0 %v6750_v35 }
 0x5ee   :  { %2760 = vmatprep.subr.mxu0 %v6756_v36 }
 0x5ef   :  { %2761 = vmatpush2.msra.mxu0 %v6762_v38 }
 0x5f0   :  { %2762 = vmatprep.subr.mxu0 %v6768_v12 }
 0x5f1   :  { %2763 = vmatpush2.msra.mxu0 %v6774_v29 }
 0x5f2   :  { %2764 = vmatprep.subr.mxu0 %v6780_v40 }
 0x5f3   :  { %2765 = vmatpush2.msra.mxu0 %v6786_v41 }
 0x5f4   :  { %2766 = vmatprep.subr.mxu0 %v6792_v44 }
 0x5f5   :  { %2767 = vmatpush2.msra.mxu0 %v6798_v46 }
 0x5f6   :  { %2768 = vmatprep.subr.mxu0 %v6804_v39 }
 0x5f7   :  { %2769 = vmatpush2.msra.mxu0 %v6810_v47 }
 0x5f8   :  { %2770 = vmatprep.subr.mxu0 %v6816_v49 }
 0x5f9   :  { %2771 = vmatpush2.msra.mxu0 %v6822_v53 }
 0x5fa   :  { %2772 = vmatprep.subr.mxu0 %v6828_v32 }
 0x5fb   :  { %2773 = vmatpush2.msra.mxu0 %v6834_v55 }
 0x5fc   :  { %2774 = vmatprep.subr.mxu0 %v6840_v37 }
 0x5fd   :  { %2775 = vmatpush2.msra.mxu0 %v6846_v11 }
 0x5fe   :  { %2776 = vmatprep.subr.mxu0 %v6852_v54 }
 0x5ff   :  { %2777 = vmatpush2.msra.mxu0 %v6858_v42 }
 0x600   :  { %2778 = vmatprep.subr.mxu0 %v6864_v30 }
 0x601   :  { %2779 = vmatpush2.msra.mxu0 %v6870_v43 }
 0x65a   :  { %v2230_v54 = vpop.f32.mrf.mxu1 }
 0x65c   :  { %v2232_v37 = vpop.f32.mrf.mxu1 }
 0x65e   :  { %v2234_v32 = vpop.f32.mrf.mxu1 }
 0x660   :  { %v2236_v42 = vpop.f32.mrf.mxu1 }
 0x662   :  { %v2240_v47 = vpop.f32.mrf.mxu1 }
 0x664   :  { %v2085_v18 = vpop.f32.mrf.mxu0  ;;  %v2242_v44 = vpop.f32.mrf.mxu1 }
 0x666   :  { %v2087_v50 = vpop.f32.mrf.mxu0  ;;  %v2244_v40 = vpop.f32.mrf.mxu1 }
 0x667   :  { %v2233_v16 = vadd.f32 %v2232_v37, %v2087_v50  ;;  %v8099_v50 = vmov 1.0   ;;  %v5353_v37 = vld [vmem:[%s7938_s13 + $0x50] ss:$8 sps:$4 sm:$0xff]  }
 0x668   :  { %v2089_v33 = vpop.f32.mrf.mxu0  ;;  %v2246_v12 = vpop.f32.mrf.mxu1 }
 0x669   :  { %v2235_v21 = vadd.f32 %v2234_v32, %v2089_v33  ;;  %v5347_v32 = vld [vmem:[%s7938_s13 + $0x60] ss:$8 sps:$4 sm:$0xff]  }
 0x66a   :  { %v2091_v31 = vpop.f32.mrf.mxu0 }
 0x66b   :  { %v2237_v25 = vadd.f32 %v2236_v42, %v2091_v31  ;;  %v8100_v31 = vmov 0.0  }
 0x66c   :  { %v2095_v11 = vpop.f32.mrf.mxu0 }
 0x66d   :  { %v2241_v27 = vadd.f32 %v2240_v47, %v2095_v11  ;;  %v5346_v47 = vld [vmem:[%s7938_s13 + $0x74] ss:$8 sps:$4 sm:$0xff]  }
 0x66e   :  { %v2097_v55 = vpop.f32.mrf.mxu0 }
 0x66f   :  { %v2243_v34 = vadd.f32 %v2242_v44, %v2097_v55  ;;  %v5355_v55 = vld [vmem:[%s7938_s13 + $0x54] ss:$8 sps:$4 sm:$0xff]  }
 0x670   :  { %v2099_v53 = vpop.f32.mrf.mxu0 }
 0x671   :  { %v2245_v35 = vadd.f32 %v2244_v40, %v2099_v53  ;;  %v2617_v40 = vld [vmem:[%s7937_s12 + $0x100] sm:$0xff] }
 0x672   :  { %v2101_v49 = vpop.f32.mrf.mxu0  ;;  %v5349_v53 = vld [vmem:[%s7938_s13 + $0x64] ss:$8 sps:$4 sm:$0xff]  }
 0x673   :  { %v2247_v36 = vadd.f32 %v2246_v12, %v2101_v49  ;;  %v5344_v49 = vld [vmem:[%s7938_s13 + $0x70] ss:$8 sps:$4 sm:$0xff]  }
 0x684   :  { %v2408_v39 = vpop.f32.mrf.mxu0 }
 0x686   :  { %v2410_v46 = vpop.f32.mrf.mxu0 }
 0x687   :  { %v6890_v42 = vadd.f32 %v2410_v46, %v2233_v16 }
 0x688   :  { %v2412_v41 = vpop.f32.mrf.mxu0 }
 0x68a   :  { %v2414_v30 = vpop.f32.mrf.mxu0 }
 0x68b   :  { %v6884_v12 = vadd.f32 %v2414_v30, %v2237_v25 }
 0x68c   :  { %v2418_v43 = vpop.f32.mrf.mxu0 }
 0x68d   :  { %v6881_v19 = vadd.f32 %v2418_v43, %v2241_v27  ;;  %v2509_v33 = vmul.f32 %v6884_v12, %v6884_v12  ;;  %v8129_v27 = vld [vmem:[#allocation38_spill] sm:$0xff] }
 0x68e   :  { %v2420_v29 = vpop.f32.mrf.mxu0 }
 0x68f   :  { %v6878_v24 = vadd.f32 %v2420_v29, %v2243_v34  ;;  %v2619_v34 = vld [vmem:[%s7937_s12 + $0x110] sm:$0xff]  ;;  %v8131_v29 = vld [vmem:[#allocation40_spill] sm:$0xff] }
 0x690   :  { %v2422_v38 = vpop.f32.mrf.mxu0 }
 0x691   :  { %v6876_v26 = vadd.f32 %v2422_v38, %v2245_v35  ;;  %v2511_v30 = vmul.f32 %v6878_v24, %v6878_v24  ;;  %v8130_v35 = vld [vmem:[#allocation39_spill] sm:$0xff]  ;;  %v2618_v38 = vld [vmem:[%s7937_s12 + $0x108] sm:$0xff] }
 0x692   :  { %v2424_v17 = vpop.f32.mrf.mxu0 }
 0x693   :  { %v6874_v28 = vadd.f32 %v2424_v17, %v2247_v36  ;;  %v2231_v17 = vadd.f32 %v2230_v54, %v2085_v18  ;;  %v6887_v36 = vadd.f32 %v2412_v41, %v2235_v21  ;;  %v2512_v18 = vmul.f32 %v6876_v26, %v6876_v26 }
 0x694   :  { %v2510_v54 = vmul.f32 %v6881_v19, %v6881_v19  ;;  %v2507_v21 = vmul.f32 %v6890_v42, %v6890_v42 }
 0x695   :  { %2459 = vmatprep.subr.mxu1 %v6874_v28  ;;  %v6893_v11 = vadd.f32 %v2408_v39, %v2231_v17  ;;  %v2513_v43 = vmul.f32 %v6874_v28, %v6874_v28  ;;  %v2508_v16 = vmul.f32 %v6887_v36, %v6887_v36  ;;  %v5352_v17 = vld [vmem:[%s7938_s13 + $0x174] ss:$8 sps:$4 sm:$0xff]  }
 0x696   :  { %2460 = vmatpush1.msra.mxu1 %v6876_v26 }
 0x697   :  { %2461 = vmatprep.subr.mxu1 %v6878_v24  ;;  %v2506_v25 = vmul.f32 %v6893_v11, %v6893_v11 }
 0x698   :  { %2462 = vmatpush1.msra.mxu1 %v6881_v19 }
 0x699   :  { %2463 = vmatprep.subr.mxu1 %v6884_v12 }
 0x69a   :  { %2464 = vmatpush1.msra.mxu1 %v6887_v36 }
 0x69b   :  { %2465 = vmatprep.subr.mxu1 %v6890_v42 }
 0x69c   :  { %2466 = vmatpush1.msra.mxu1 %v6893_v11 }
 0x69d   :  { %4563 = vmatmul.mubr.msk.f32.vlgmr.msra.gmra.mxu1 %vm612_vm10, %v8099_v50  ;;  %2538 = vmatprep.subr.mxu1 %v2513_v43  ;;  %v5361_v43 = vld [vmem:[%s7938_s13 + $0x44] ss:$8 sps:$4 sm:$0xff]  }
 0x69e   :  { %2539 = vmatpush1.msra.mxu1 %v2512_v18  ;;  %2578 = vmatprep.mubr.f32.mxu1 %v8100_v31  ;;  %v5350_v18 = vld [vmem:[%s7938_s13 + $0x170] ss:$8 sps:$4 sm:$0xff]  }
 0x69f   :  { %2540 = vmatprep.subr.mxu1 %v2511_v30  ;;  %v5359_v30 = vld [vmem:[%s7938_s13 + $0x40] ss:$8 sps:$4 sm:$0xff]  }
 0x6a0   :  { %2541 = vmatpush1.msra.mxu1 %v2510_v54  ;;  %v5358_v54 = vld [vmem:[%s7938_s13 + $0x164] ss:$8 sps:$4 sm:$0xff]  }
 0x6a1   :  { %2542 = vmatprep.subr.mxu1 %v2509_v33  ;;  %v5367_v33 = vld [vmem:[%s7938_s13 + $0x34] ss:$8 sps:$4 sm:$0xff]  }
 0x6a2   :  { %2543 = vmatpush1.msra.mxu1 %v2508_v16  ;;  %v5356_v16 = vld [vmem:[%s7938_s13 + $0x160] ss:$8 sps:$4 sm:$0xff]  }
 0x6a3   :  { %2544 = vmatprep.subr.mxu1 %v2507_v21  ;;  %v5365_v21 = vld [vmem:[%s7938_s13 + $0x30] ss:$8 sps:$4 sm:$0xff]  }
 0x6a4   :  { %2545 = vmatpush1.msra.mxu1 %v2506_v25  ;;  %v5364_v25 = vld [vmem:[%s7938_s13 + $0x154] ss:$8 sps:$4 sm:$0xff]  }
 0x6a5   :  { %4564 = vmatmul.mubr.msk.f32.vlgmr.msra.gmra.mxu1 %vm612_vm10, %v8099_v50  ;;  %2649 = vmatprep.subr.mxu1 %v6517_v56  ;;  %v8101_v56 = vld [vmem:[#allocation10_spill] sm:$0xff] }
 0x6a6   :  { %2650 = vmatpush1.msra.mxu1 %v6522_v1  ;;  %v8102_v1 = vld [vmem:[#allocation11_spill] sm:$0xff] }
 0x6a7   :  { %2651 = vmatprep.subr.mxu1 %v6528_v14  ;;  %v8103_v14 = vld [vmem:[#allocation12_spill] sm:$0xff] }
 0x6a8   :  { %2652 = vmatpush1.msra.mxu1 %v6534_v20  ;;  %v8104_v20 = vld [vmem:[#allocation13_spill] sm:$0xff] }
 0x6a9   :  { %2653 = vmatprep.subr.mxu1 %v6540_v22  ;;  %v8105_v22 = vld [vmem:[#allocation14_spill] sm:$0xff] }
 0x6aa   :  { %2654 = vmatpush1.msra.mxu1 %v6546_v23  ;;  %v8106_v23 = vld [vmem:[#allocation15_spill] sm:$0xff] }
 0x6ab   :  { %2655 = vmatprep.subr.mxu1 %v6552_v57  ;;  %v8107_v57 = vld [vmem:[#allocation16_spill] sm:$0xff] }
 0x6ac   :  { %2656 = vmatpush1.msra.mxu1 %v6558_v58  ;;  %v8108_v58 = vld [vmem:[#allocation17_spill] sm:$0xff] }
 0x6ad   :  { %2657 = vmatprep.subr.mxu1 %v6564_v59  ;;  %v8109_v59 = vld [vmem:[#allocation18_spill] sm:$0xff] }
 0x6ae   :  { %2658 = vmatpush1.msra.mxu1 %v6570_v60  ;;  %v8110_v60 = vld [vmem:[#allocation19_spill] sm:$0xff] }
 0x6af   :  { %2659 = vmatprep.subr.mxu1 %v6576_v45  ;;  %v8111_v45 = vld [vmem:[#allocation20_spill] sm:$0xff] }
 0x6b0   :  { %2660 = vmatpush1.msra.mxu1 %v6582_v48  ;;  %v8112_v48 = vld [vmem:[#allocation21_spill] sm:$0xff] }
 0x6b1   :  { %2661 = vmatprep.subr.mxu1 %v6588_v51  ;;  %v8113_v51 = vld [vmem:[#allocation22_spill] sm:$0xff] }
 0x6b2   :  { %2662 = vmatpush1.msra.mxu1 %v6594_v52  ;;  %v8114_v52 = vld [vmem:[#allocation23_spill] sm:$0xff] }
 0x6b3   :  { %2663 = vmatprep.subr.mxu1 %v6600_v61  ;;  %v8115_v61 = vld [vmem:[#allocation24_spill] sm:$0xff] }
 0x6b4   :  { %2664 = vmatpush1.msra.mxu1 %v6606_v63  ;;  %v8116_v63 = vld [vmem:[#allocation25_spill] sm:$0xff] }
 0x6b5   :  { %2665 = vmatprep.subr.mxu1 %v6612_v0  ;;  %v8117_v0 = vld [vmem:[#allocation26_spill] sm:$0xff] }
 0x6b6   :  { %2666 = vmatpush1.msra.mxu1 %v6618_v62  ;;  %v8118_v62 = vld [vmem:[#allocation27_spill] sm:$0xff] }
 0x6b7   :  { %2667 = vmatprep.subr.mxu1 %v6624_v2  ;;  %v8119_v2 = vld [vmem:[#allocation28_spill] sm:$0xff] }
 0x6b8   :  { %2668 = vmatpush1.msra.mxu1 %v6630_v3  ;;  %v8120_v3 = vld [vmem:[#allocation29_spill] sm:$0xff] }
 0x6b9   :  { %2669 = vmatprep.subr.mxu1 %v6636_v4  ;;  %v8121_v4 = vld [vmem:[#allocation30_spill] sm:$0xff] }
 0x6ba   :  { %2670 = vmatpush1.msra.mxu1 %v6642_v5  ;;  %v8122_v5 = vld [vmem:[#allocation31_spill] sm:$0xff] }
 0x6bb   :  { %2671 = vmatprep.subr.mxu1 %v6648_v6  ;;  %v8123_v6 = vld [vmem:[#allocation32_spill] sm:$0xff] }
 0x6bc   :  { %2672 = vmatpush1.msra.mxu1 %v6654_v7  ;;  %v8124_v7 = vld [vmem:[#allocation33_spill] sm:$0xff] }
 0x6bd   :  { %2673 = vmatprep.subr.mxu1 %v6660_v8  ;;  %v8125_v8 = vld [vmem:[#allocation34_spill] sm:$0xff] }
 0x6be   :  { %2674 = vmatpush1.msra.mxu1 %v6666_v9  ;;  %v8126_v9 = vld [vmem:[#allocation35_spill] sm:$0xff] }
 0x6bf   :  { %2675 = vmatprep.subr.mxu1 %v6672_v10  ;;  %v8127_v10 = vld [vmem:[#allocation36_spill] sm:$0xff] }
 0x6c0   :  { %2676 = vmatpush1.msra.mxu1 %v6678_v13  ;;  %v8128_v13 = vld [vmem:[#allocation37_spill] sm:$0xff] }
 0x6c1   :  { %2677 = vmatprep.subr.mxu1 %v6684_v15  ;;  %v2620_v15 = vld [vmem:[%s7937_s12 + $0x118] sm:$0xff] }
 0x6c2   :  { %2678 = vmatpush1.msra.mxu1 %v8101_v56  ;;  %2780 = vmatprep.subr.mxu0 %v2620_v15  ;;  %v5373_v56 = vld [vmem:[%s7938_s13 + $0x24] ss:$8 sps:$4 sm:$0xff]  }
 0x6c3   :  { %2679 = vmatprep.subr.mxu1 %v8102_v1  ;;  %2781 = vmatpush2.msra.mxu0 %v2619_v34  ;;  %v5362_v1 = vld [vmem:[%s7938_s13 + $0x150] ss:$8 sps:$4 sm:$0xff]  }
 0x6c4   :  { %2680 = vmatpush1.msra.mxu1 %v8103_v14  ;;  %2782 = vmatprep.subr.mxu0 %v2618_v38  ;;  %v5371_v14 = vld [vmem:[%s7938_s13 + $0x20] ss:$8 sps:$4 sm:$0xff]  }
 0x6c5   :  { %2681 = vmatprep.subr.mxu1 %v8104_v20  ;;  %2783 = vmatpush2.msra.mxu0 %v2617_v40  ;;  %v5370_v20 = vld [vmem:[%s7938_s13 + $0x144] ss:$8 sps:$4 sm:$0xff]  }
 0x6c6   :  { %2682 = vmatpush2.msra.mxu1 %v8105_v22  ;;  %3506 = vmatprep.subr.bf16.mxu0 %v5346_v47  ;;  %v5379_v22 = vld [vmem:[%s7938_s13 + $0x14] ss:$8 sps:$4 sm:$0xff]  }
 0x6c7   :  { %2683 = vmatprep.subr.mxu1 %v8106_v23  ;;  %v5368_v23 = vld [vmem:[%s7938_s13 + $0x140] ss:$8 sps:$4 sm:$0xff]   ;;  %v5424_v47 = vld [vmem:[%s7938_s13 + $0x1b4] ss:$8 sps:$4 sm:$0xff]  }
 0x6c8   :  { %2684 = vmatpush2.msra.mxu1 %v8107_v57  ;;  %v5377_v57 = vld [vmem:[%s7938_s13 + $0x10] ss:$8 sps:$4 sm:$0xff]  }
 0x6c9   :  { %2685 = vmatprep.subr.mxu1 %v8108_v58  ;;  %v5376_v58 = vld [vmem:[%s7938_s13 + $0x134] ss:$8 sps:$4 sm:$0xff]  }
 0x6ca   :  { %2686 = vmatpush2.msra.mxu1 %v8109_v59  ;;  %v5385_v59 = vld [vmem:[%s7938_s13 + $0x4] ss:$8 sps:$4 sm:$0xff]  }
 0x6cb   :  { %2687 = vmatprep.subr.mxu1 %v8110_v60  ;;  %v5374_v60 = vld [vmem:[%s7938_s13 + $0x130] ss:$8 sps:$4 sm:$0xff]  }
 0x6cc   :  { %2688 = vmatpush2.msra.mxu1 %v8111_v45  ;;  %v5383_v45 = vld [vmem:[%s7938_s13] ss:$8 sps:$4 sm:$0xff]  }
 0x6cd   :  { %2689 = vmatprep.subr.mxu1 %v8112_v48  ;;  %v5382_v48 = vld [vmem:[%s7938_s13 + $0x124] ss:$8 sps:$4 sm:$0xff]  }
 0x6ce   :  { %2690 = vmatpush2.msra.mxu1 %v8113_v51  ;;  %v5391_v51 = vld [vmem:[%s7938_s13 + $0xf4] ss:$8 sps:$4 sm:$0xff]  }
 0x6cf   :  { %2691 = vmatprep.subr.mxu1 %v8114_v52  ;;  %v5380_v52 = vld [vmem:[%s7938_s13 + $0x120] ss:$8 sps:$4 sm:$0xff]  }
 0x6d0   :  { %2692 = vmatpush2.msra.mxu1 %v8115_v61  ;;  %v5389_v61 = vld [vmem:[%s7938_s13 + $0xf0] ss:$8 sps:$4 sm:$0xff]  }
 0x6d1   :  { %2693 = vmatprep.subr.mxu1 %v8116_v63  ;;  %v5388_v63 = vld [vmem:[%s7938_s13 + $0x114] ss:$8 sps:$4 sm:$0xff]  }
 0x6d2   :  { %2694 = vmatpush2.msra.mxu1 %v8117_v0  ;;  %v5397_v0 = vld [vmem:[%s7938_s13 + $0xe4] ss:$8 sps:$4 sm:$0xff]  }
 0x6d3   :  { %2695 = vmatprep.subr.mxu1 %v8118_v62  ;;  %v5386_v62 = vld [vmem:[%s7938_s13 + $0x110] ss:$8 sps:$4 sm:$0xff]  }
 0x6d4   :  { %2696 = vmatpush2.msra.mxu1 %v8119_v2  ;;  %v5395_v2 = vld [vmem:[%s7938_s13 + $0xe0] ss:$8 sps:$4 sm:$0xff]  }
 0x6d5   :  { %2697 = vmatprep.subr.mxu1 %v8120_v3  ;;  %v5394_v3 = vld [vmem:[%s7938_s13 + $0x104] ss:$8 sps:$4 sm:$0xff]  }
 0x6d6   :  { %2698 = vmatpush2.msra.mxu1 %v8121_v4  ;;  %v5403_v4 = vld [vmem:[%s7938_s13 + $0xd4] ss:$8 sps:$4 sm:$0xff]  }
 0x6d7   :  { %2699 = vmatprep.subr.mxu1 %v8122_v5  ;;  %v5392_v5 = vld [vmem:[%s7938_s13 + $0x100] ss:$8 sps:$4 sm:$0xff]  }
 0x6d8   :  { %2700 = vmatpush2.msra.mxu1 %v8123_v6  ;;  %v5401_v6 = vld [vmem:[%s7938_s13 + $0xd0] ss:$8 sps:$4 sm:$0xff]  }
 0x6d9   :  { %2701 = vmatprep.subr.mxu1 %v8124_v7  ;;  %v5400_v7 = vld [vmem:[%s7938_s13 + $0x1f4] ss:$8 sps:$4 sm:$0xff]  }
 0x6da   :  { %2702 = vmatpush2.msra.mxu1 %v8125_v8  ;;  %v5409_v8 = vld [vmem:[%s7938_s13 + $0xc4] ss:$8 sps:$4 sm:$0xff]  }
 0x6db   :  { %2703 = vmatprep.subr.mxu1 %v8126_v9  ;;  %v5398_v9 = vld [vmem:[%s7938_s13 + $0x1f0] ss:$8 sps:$4 sm:$0xff]  }
 0x6dc   :  { %2704 = vmatpush2.msra.mxu1 %v8127_v10  ;;  %v5407_v10 = vld [vmem:[%s7938_s13 + $0xc0] ss:$8 sps:$4 sm:$0xff]  }
 0x6dd   :  { %2705 = vmatprep.subr.mxu1 %v8128_v13  ;;  %v5406_v13 = vld [vmem:[%s7938_s13 + $0x1e4] ss:$8 sps:$4 sm:$0xff]  }
 0x6de   :  { %2706 = vmatpush2.msra.mxu1 %v8129_v27  ;;  %v5404_v27 = vld [vmem:[%s7938_s13 + $0x1e0] ss:$8 sps:$4 sm:$0xff]  }
 0x6df   :  { %2707 = vmatprep.subr.mxu1 %v8130_v35  ;;  %v5412_v35 = vld [vmem:[%s7938_s13 + $0x1d4] ss:$8 sps:$4 sm:$0xff]  }
 0x6e0   :  { %2708 = vmatpush2.msra.mxu1 %v8131_v29  ;;  %v5410_v29 = vld [vmem:[%s7938_s13 + $0x1d0] ss:$8 sps:$4 sm:$0xff]  }
 0x6e1   :  { %2709 = vmatprep.subr.mxu1 %v2620_v15  ;;  %v5415_v15 = vld [vmem:[%s7938_s13 + $0xb4] ss:$8 sps:$4 sm:$0xff]  }
 0x6e2   :  { %2710 = vmatpush2.msra.mxu1 %v2619_v34  ;;  %v5413_v34 = vld [vmem:[%s7938_s13 + $0xb0] ss:$8 sps:$4 sm:$0xff]  }
 0x6e3   :  { %2711 = vmatprep.subr.mxu1 %v2618_v38  ;;  %v5421_v38 = vld [vmem:[%s7938_s13 + $0xa4] ss:$8 sps:$4 sm:$0xff]  }
 0x6e4   :  { %2712 = vmatpush2.msra.mxu1 %v2617_v40  ;;  %v5419_v40 = vld [vmem:[%s7938_s13 + $0xa0] ss:$8 sps:$4 sm:$0xff]  }
 0x6e5   :  { %3273 = vmatprep.subr.bf16.mxu1 %v5352_v17  ;;  %v5436_v17 = vld [vmem:[%s7938_s13 + $0x194] ss:$8 sps:$4 sm:$0xff]  }
 0x75d   :  { %v2501_v41 = vpop.f32.mrf.mxu1 }
 0x75f   :  { %v2503_v44 = vpop.f32.mrf.mxu1 }
 0x760   :  { %2713 = vmatprep.mubr.f32.mxu1 %v2503_v44  ;;  %v5427_v44 = vld [vmem:[%s7938_s13 + $0x94] ss:$8 sps:$4 sm:$0xff]  }
 0x761   :  { %2714 = vmatmul.mubr.f32.vlgmr.msra.gmra.mxu1 %v2501_v41  ;;  %v5418_v41 = vld [vmem:[%s7938_s13 + $0x1c4] ss:$8 sps:$4 sm:$0xff]  }
 0x762   :  { %3274 = vmatpush1.bf16.msra.mxu1 %v5350_v18  ;;  %v5439_v18 = vld [vmem:[%s7938_s13 + $0x184] ss:$8 sps:$4 sm:$0xff]  }
 0x763   :  { %3275 = vmatprep.subr.bf16.mxu1 %v5358_v54  ;;  %v5442_v54 = vld [vmem:[%s7938_s13 + $0x274] ss:$8 sps:$4 sm:$0xff]  }
 0x765   :  { %v2580_v46 = vpop.f32.mrf.mxu1 }
 0x766   :  { %3276 = vmatpush1.bf16.msra.mxu1 %v5356_v16 }
 0x767   :  { %v2582_v39 = vpop.f32.mrf.mxu1  ;;  %3277 = vmatprep.subr.bf16.mxu1 %v5364_v25 }
 0x768   :  { %2784 = vmatprep.mubr.f32.mxu0 %v2582_v39  ;;  %v5425_v39 = vld [vmem:[%s7938_s13 + $0x90] ss:$8 sps:$4 sm:$0xff]  }
 0x769   :  { %2785 = vmatmul.mubr.f32.vlgmr.msra.gmra.mxu0 %v2580_v46  ;;  %v5416_v46 = vld [vmem:[%s7938_s13 + $0x1c0] ss:$8 sps:$4 sm:$0xff]  }
 0x76a   :  { %3507 = vmatpush1.bf16.msra.mxu0 %v5344_v49  ;;  %3278 = vmatpush1.bf16.msra.mxu1 %v5362_v1  ;;  %v5422_v49 = vld [vmem:[%s7938_s13 + $0x1b0] ss:$8 sps:$4 sm:$0xff]  }
 0x76b   :  { %3508 = vmatprep.subr.bf16.mxu0 %v5349_v53  ;;  %3279 = vmatprep.subr.bf16.mxu1 %v5370_v20  ;;  %v5431_v53 = vld [vmem:[%s7938_s13 + $0x80] ss:$8 sps:$4 sm:$0xff]  }
 0x76e   :  { %3509 = vmatpush1.bf16.msra.mxu0 %v5347_v32  ;;  %3280 = vmatpush1.bf16.msra.mxu1 %v5368_v23  ;;  %v5433_v32 = vld [vmem:[%s7938_s13 + $0x84] ss:$8 sps:$4 sm:$0xff]  }
 0x76f   :  { %3510 = vmatprep.subr.bf16.mxu0 %v5355_v55  ;;  %3281 = vmatprep.subr.bf16.mxu1 %v5376_v58  ;;  %v5430_v55 = vld [vmem:[%s7938_s13 + $0x1a4] ss:$8 sps:$4 sm:$0xff]  }
 0x772   :  { %3511 = vmatpush1.bf16.msra.mxu0 %v5353_v37  ;;  %3282 = vmatpush1.bf16.msra.mxu1 %v5374_v60  ;;  %v5428_v37 = vld [vmem:[%s7938_s13 + $0x1a0] ss:$8 sps:$4 sm:$0xff]  }
 0x773   :  { %3512 = vmatprep.subr.bf16.mxu0 %v5361_v43  ;;  %3283 = vmatprep.subr.bf16.mxu1 %v5382_v48  ;;  %v5434_v43 = vld [vmem:[%s7938_s13 + $0x190] ss:$8 sps:$4 sm:$0xff]  }
 0x776   :  { %3513 = vmatpush1.bf16.msra.mxu0 %v5359_v30  ;;  %3284 = vmatpush1.bf16.msra.mxu1 %v5380_v52  ;;  %v5437_v30 = vld [vmem:[%s7938_s13 + $0x180] ss:$8 sps:$4 sm:$0xff]  }
 0x777   :  { %3514 = vmatprep.subr.bf16.mxu0 %v5367_v33  ;;  %3285 = vmatprep.subr.bf16.mxu1 %v5388_v63 }
 0x77a   :  { %3515 = vmatpush1.bf16.msra.mxu0 %v5365_v21  ;;  %3286 = vmatpush1.bf16.msra.mxu1 %v5386_v62 }
 0x77b   :  { %3516 = vmatprep.subr.bf16.mxu0 %v5373_v56  ;;  %3287 = vmatprep.subr.bf16.mxu1 %v5394_v3 }
 0x77e   :  { %3517 = vmatpush1.bf16.msra.mxu0 %v5371_v14  ;;  %3288 = vmatpush1.bf16.msra.mxu1 %v5392_v5  ;;  %v2805_v5 = vld [vmem:[%s7939_s10] sm:$0x3] }
 0x77f   :  { %3518 = vmatprep.subr.bf16.mxu0 %v5379_v22  ;;  %3289 = vmatprep.subr.bf16.mxu1 %v5400_v7 }
 0x782   :  { %3519 = vmatpush1.bf16.msra.mxu0 %v5377_v57  ;;  %3290 = vmatpush2.bf16.msra.mxu1 %v5398_v9  ;;  %v8135_v9 = vld [vmem:[#allocation9_spill] sm:$0xff] }
 0x783   :  { %3520 = vmatprep.subr.bf16.mxu0 %v5385_v59  ;;  %3291 = vmatprep.subr.bf16.mxu1 %v5406_v13 }
 0x786   :  { %3521 = vmatpush1.bf16.msra.mxu0 %v5383_v45  ;;  %3292 = vmatpush2.bf16.msra.mxu1 %v5404_v27 }
 0x787   :  { %3522 = vmatprep.subr.bf16.mxu0 %v5391_v51  ;;  %3293 = vmatprep.subr.bf16.mxu1 %v5412_v35  ;;  %v5504_v51 = vmov 1966171168  }
 0x788   :  { %v2810_v52 = vunpack.c.l.s4 %v5504_v51 }
 0x78a   :  { %3523 = vmatpush2.bf16.msra.mxu0 %v5389_v61  ;;  %3294 = vmatpush2.bf16.msra.mxu1 %v5410_v29  ;;  %v2811_v61 = vunpack.c.0.s8 %v2810_v52 }
 0x78b   :  { %3524 = vmatprep.subr.bf16.mxu0 %v5397_v0  ;;  %3295 = vmatprep.subr.bf16.mxu1 %v5418_v41  ;;  %v8132_v0 = vld [vmem:[#allocation8_spill] sm:$0xff] }
 0x78c   :  { %v7187_v62 = vsub.s32 %v2811_v61, %v8132_v0  ;;  %v7195_v7 = vsub.s32 1, %v8132_v0 }
 0x78e   :  { %3525 = vmatpush2.bf16.msra.mxu0 %v5395_v2  ;;  %3296 = vmatpush2.bf16.msra.mxu1 %v5416_v46  ;;  %8133 = vst [vmem:[#allocation10_spill] sm:$0xff] %v7187_v62  ;;  %8134 = vst [vmem:[#allocation11_spill] sm:$0xff] %v7195_v7 }
 0x78f   :  { %3526 = vmatprep.subr.bf16.mxu0 %v5403_v4  ;;  %3297 = vmatprep.subr.bf16.mxu1 %v5424_v47 }
 0x792   :  { %3527 = vmatpush2.bf16.msra.mxu0 %v5401_v6  ;;  %3298 = vmatpush2.bf16.msra.mxu1 %v5422_v49 }
 0x793   :  { %3528 = vmatprep.subr.bf16.mxu0 %v5409_v8  ;;  %3299 = vmatprep.subr.bf16.mxu1 %v5430_v55 }
 0x796   :  { %3529 = vmatpush2.bf16.msra.mxu0 %v5407_v10  ;;  %3300 = vmatpush2.bf16.msra.mxu1 %v5428_v37 }
 0x797   :  { %3530 = vmatprep.subr.bf16.mxu0 %v5415_v15  ;;  %3301 = vmatprep.subr.bf16.mxu1 %v5436_v17 }
 0x79a   :  { %3531 = vmatpush2.bf16.msra.mxu0 %v5413_v34  ;;  %3302 = vmatpush2.bf16.msra.mxu1 %v5434_v43 }
 0x79b   :  { %3532 = vmatprep.subr.bf16.mxu0 %v5421_v38  ;;  %3303 = vmatprep.subr.bf16.mxu1 %v5439_v18  ;;  %v2825_v38 = vld [vmem:[%s7940_s11] sm:$0x3] }
 0x79e   :  { %3533 = vmatpush2.bf16.msra.mxu0 %v5419_v40  ;;  %3304 = vmatpush2.bf16.msra.mxu1 %v5437_v30 }
 0x79f   :  { %3534 = vmatprep.subr.bf16.mxu0 %v5427_v44  ;;  %3788 = vmatprep.subr.bf16.mxu1 %v5442_v54 }
 0x7a2   :  { %3535 = vmatpush2.bf16.msra.mxu0 %v5425_v39 }
 0x7a3   :  { %3536 = vmatprep.subr.bf16.mxu0 %v5433_v32 }
 0x7a6   :  { %3537 = vmatpush2.bf16.msra.mxu0 %v5431_v53 }
 0x821   :  { %v2715_v33 = vpop.f32.mrf.mxu1 }
 0x822   :  { %v2791_v21 = vmul.f32 0.001953125, %v2715_v33 }
 0x823   :  { %v2717_v16 = vpop.f32.mrf.mxu1 }
 0x824   :  { %v2792_v25 = vmul.f32 0.001953125, %v2717_v16  ;;  %v2795_v1 = vmul.f32 %v2791_v21, %v2791_v21 }
 0x826   :  { %v2796_v22 = vmul.f32 %v2792_v25, %v2792_v25 }
 0x829   :  { %v2786_v56 = vpop.f32.mrf.mxu0 }
 0x82a   :  { %v2793_v14 = vmul.f32 0.001953125, %v2786_v56 }
 0x82b   :  { %v2788_v20 = vpop.f32.mrf.mxu0 }
 0x82c   :  { %v2797_v23 = vsub.f32 %v2793_v14, %v2795_v1  ;;  %v2794_v57 = vmul.f32 0.001953125, %v2788_v20 }
 0x82e   :  { %v2799_v58 = vmax.f32 %v2797_v23, 0.0  ;;  %v2798_v59 = vsub.f32 %v2794_v57, %v2796_v22 }
 0x830   :  { %v2801_v60 = vadd.f32 1e-05, %v2799_v58  ;;  %v2800_v45 = vmax.f32 %v2798_v59, 0.0 }
 0x832   :  { %v2802_v48 = vadd.f32 1e-05, %v2800_v45  ;;  %5492 = vrsqrt.f32 %v2801_v60 }
 0x834   :  { %5494 = vrsqrt.f32 %v2802_v48 }
 0x83f   :  { %v5493_v63 = vpop.eup %5492 }
 0x841   :  { %v5495_v2 = vpop.eup %5494 }
 0x842   :  { %v2808_v3 = vcombine.low %v5493_v63, %v5495_v2 }
 0x844   :  { %v2815_v4 = vrot.slane %v2808_v3, %v7187_v62 }
 0x846   :  { %v2822_v6 = vrot.slane %v2815_v4, %v7187_v62 }
 0x848   :  { %v2824_v8 = vmul.f32 %v2822_v6, %v2805_v5 }
 0x84a   :  { %v2830_v10 = vrot.slane %v2824_v8, %v8135_v9  ;;  %v2834_v13 = vrot.slane %v2824_v8, %v7195_v7 }
 0x84c   :  { %v2837_v15 = vmul.f32 %v2830_v10, %v2791_v21  ;;  %v2838_v27 = vmul.f32 %v2834_v13, %v2792_v25  ;;  %v2858_v41 = vmul.f32 %v2830_v10, %v6893_v11  ;;  %v2859_v44 = vmul.f32 %v2834_v13, %v6890_v42 }
 0x84d   :  { %v2860_v46 = vmul.f32 %v2830_v10, %v6887_v36  ;;  %v2861_v39 = vmul.f32 %v2834_v13, %v6884_v12  ;;  %v2862_v53 = vmul.f32 %v2830_v10, %v6881_v19  ;;  %v2863_v32 = vmul.f32 %v2834_v13, %v6878_v24 }
 0x84e   :  { %v2841_v34 = vcombine.low %v2837_v15, %v2838_v27  ;;  %v2864_v55 = vmul.f32 %v2830_v10, %v6876_v26  ;;  %v2865_v37 = vmul.f32 %v2834_v13, %v6874_v28  ;;  %v2964_v15 = vld [vmem:[#allocation2 + $0x20] sm:$0xff]  ;;  %v2968_v27 = vld [vmem:[#allocation2 + $0x18] sm:$0x11] }
 0x850   :  { %v2848_v35 = vrot.slane %v2841_v34, %v7187_v62 }
 0x852   :  { %v2855_v29 = vrot.slane %v2848_v35, %v7187_v62 }
 0x854   :  { %v2857_v40 = vsub.f32 %v2825_v38, %v2855_v29  ;;  %v2971_v29 = vld [vmem:[#allocation2 + $0x10] sm:$0xff] }
 0x856   :  { %v2870_v47 = vrot.slane %v2857_v40, %v8135_v9  ;;  %v2874_v49 = vrot.slane %v2857_v40, %v7195_v7  ;;  %v2975_v40 = vld [vmem:[#allocation2] sm:$0x11] }
 0x857   :  { %v7758_v7 = vld [vmem:[%s7942_s16 + $0x120] sm:$0xff] }
 0x858   :  { %v2877_v17 = vadd.f32 %v2870_v47, %v2858_v41  ;;  %v2878_v11 = vadd.f32 %v2874_v49, %v2859_v44  ;;  %v2879_v43 = vadd.f32 %v2870_v47, %v2860_v46  ;;  %v2880_v42 = vadd.f32 %v2874_v49, %v2861_v39  ;;  %8175 = vst [vmem:[#allocation4_spill] sm:$0xff] %v7758_v7 }
 0x859   :  { %v2881_v18 = vadd.f32 %v2870_v47, %v2862_v53  ;;  %v2882_v36 = vadd.f32 %v2874_v49, %v2863_v32  ;;  %v2883_v30 = vadd.f32 %v2870_v47, %v2864_v55  ;;  %v2884_v12 = vadd.f32 %v2874_v49, %v2865_v37 }
 0x85a   :  { %v2885_v54 = vmax.f32 %v2877_v17, 0.0  ;;  %v2886_v33 = vmax.f32 %v2878_v11, 0.0  ;;  %v2887_v16 = vmax.f32 %v2879_v43, 0.0  ;;  %v2888_v21 = vmax.f32 %v2880_v42, 0.0 }
 0x85b   :  { %v2889_v25 = vmax.f32 %v2881_v18, 0.0  ;;  %v2890_v19 = vmax.f32 %v2882_v36, 0.0  ;;  %v2891_v56 = vmax.f32 %v2883_v30, 0.0  ;;  %v2892_v24 = vmax.f32 %v2884_v12, 0.0 }
 0x85c   :  { %2893 = vst [vmem:[%s7941_s19] sm:$0xff] %v2885_v54  ;;  %2894 = vst [vmem:[%s7941_s19 + $0x8] sm:$0xff] %v2886_v33  ;;  %v4757_v26 = vpack.c.bf16 %v2886_v33, %v2885_v54  ;;  %v4758_v28 = vpack.c.bf16 %v2888_v21, %v2887_v16 }
 0x85d   :  { %2895 = vst [vmem:[%s7941_s19 + $0x10] sm:$0xff] %v2887_v16  ;;  %2896 = vst [vmem:[%s7941_s19 + $0x18] sm:$0xff] %v2888_v21  ;;  %v4759_v1 = vpack.c.bf16 %v2890_v19, %v2889_v25  ;;  %v4760_v14 = vpack.c.bf16 %v2892_v24, %v2891_v56 }
 0x85e   :  { %2897 = vst [vmem:[%s7941_s19 + $0x20] sm:$0xff] %v2889_v25  ;;  %2898 = vst [vmem:[%s7941_s19 + $0x28] sm:$0xff] %v2890_v19  ;;  %v2922_v22 = vshrl.u32 %v4757_v26, 16  ;;  %v2930_v23 = vshrl.u32 %v4758_v28, 16  ;;  %v2925_v60 = vshll.u32 %v4757_v26, 16  ;;  %v2933_v48 = vshll.u32 %v4758_v28, 16 }
 0x85f   :  { %2899 = vst [vmem:[%s7941_s19 + $0x30] sm:$0xff] %v2891_v56  ;;  %2900 = vst [vmem:[%s7941_s19 + $0x38] sm:$0xff] %v2892_v24  ;;  %v2939_v57 = vshrl.u32 %v4759_v1, 16  ;;  %v2947_v58 = vshrl.u32 %v4760_v14, 16  ;;  %v2942_v52 = vshll.u32 %v4759_v1, 16  ;;  %v2950_v63 = vshll.u32 %v4760_v14, 16 }
 0x860   :  { %v2924_v59 = vrot.slane %v2922_v22, 7  ;;  %v2932_v45 = vrot.slane %v2930_v23, 7 }
 0x861   :  { %v2941_v51 = vrot.slane %v2939_v57, 7  ;;  %v2949_v61 = vrot.slane %v2947_v58, 7 }
 0x862   :  { %v2927_v2 = vor.u32 %v2925_v60, %v2924_v59  ;;  %v2928_v3 = vrot.slane %v2924_v59, 4  ;;  %v2935_v4 = vor.u32 %v2933_v48, %v2932_v45  ;;  %v2937_v5 = vrot.slane %v2932_v45, 4 }
 0x863   :  { %v2944_v6 = vor.u32 %v2942_v52, %v2941_v51  ;;  %v2945_v8 = vrot.slane %v2941_v51, 4  ;;  %v2952_v10 = vor.u32 %v2950_v63, %v2949_v61  ;;  %v2954_v13 = vrot.slane %v2949_v61, 4 }
 0x864   :  { %v2965_v34 = vsel %vm2963_vm7, %v2927_v2, %v2964_v15  ;;  %v2969_v38 = vsel %vm5659_vm8, %v2937_v5, %v2968_v27  ;;  %v7257_v44 = vsel %vm5697_vm14, %v2928_v3, %v2935_v4  ;;  %v7434_v2 = vld [vmem:[%s7942_s16 + $0xd0] sm:$0xff]  ;;  %v7452_v5 = vld [vmem:[%s7942_s16 + $0xb8] sm:$0xff] }
 0x865   :  { %v2972_v46 = vsel %vm2963_vm7, %v2944_v6, %v2971_v29  ;;  %v2976_v39 = vsel %vm5659_vm8, %v2954_v13, %v2975_v40  ;;  %2966 = vst [vmem:[#allocation2 + $0x20] sm:$0xff] %v2965_v34  ;;  %2970 = vst [vmem:[#allocation2 + $0x18] sm:$0x11] %v2969_v38  ;;  %v3017_v47 = vshrl.u32 %v2965_v34, 16  ;;  %v3020_v49 = vshll.u32 %v2965_v34, 16 }
 0x866   :  { %2967 = vst [vmem:[#allocation2 + $0x28] sm:$0xff] %v7257_v44  ;;  %2973 = vst [vmem:[#allocation2 + $0x10] sm:$0xff] %v2972_v46  ;;  %v4638_v53 = vcombine.high %v2965_v34, %v7257_v44  ;;  %v4637_v32 = vcombine.low %v2965_v34, %v7257_v44  ;;  %v2953_v55 = vsel %vm5697_vm14, %v2945_v8, %v2952_v10  ;;  %v3041_v37 = vshrl.u32 %v2972_v46, 16  ;;  %v5440_v13 = vld [vmem:[%s7938_s13 + $0x270] ss:$8 sps:$4 sm:$0xff]  }
 0x867   :  { %2977 = vst [vmem:[#allocation2] sm:$0x11] %v2976_v39  ;;  %2974 = vst [vmem:[#allocation2 + $0x8] sm:$0xff] %v2953_v55  ;;  %v3044_v17 = vshll.u32 %v2972_v46, 16  ;;  %v3019_v11 = vrot.slane %v3017_v47, 4  ;;  %v3022_v43 = vrot.slane %v3020_v49, 5  ;;  %v4640_v42 = vcombine.high %v2972_v46, %v2953_v55 }
 0x868   :  { %3538 = vmatprep.mubr.bf16.mxu0 %v4638_v53  ;;  %v3026_v18 = vshll.u32 %v7257_v44, 16  ;;  %v3030_v36 = vshrl.u32 %v7257_v44, 16  ;;  %v3043_v30 = vrot.slane %v3041_v37, 4  ;;  %v3050_v33 = vshll.u32 %v2953_v55, 16  ;;  %v5445_v38 = vld [vmem:[%s7938_s13 + $0x264] ss:$8 sps:$4 sm:$0xff]  }
 0x869   :  { %3539 = vmatmul.mubr.bf16.vlgmr.msra.gmra.mxu0 %v4637_v32  ;;  %v3023_v12 = vor.u32 %v3022_v43, %v3019_v11  ;;  %v3046_v54 = vrot.slane %v3044_v17, 5  ;;  %v3054_v16 = vshrl.u32 %v2953_v55, 16  ;;  %v3574_v1 = vrot.slane %v2953_v55, 5  ;;  %v5443_v49 = vld [vmem:[%s7938_s13 + $0x260] ss:$8 sps:$4 sm:$0xff]  }
 0x86a   :  { %3548 = vmatprep.mubr.bf16.mxu0 %v4640_v42  ;;  %v3028_v21 = vrot.slane %v3026_v18, 5  ;;  %v3032_v25 = vrot.slane %v3030_v36, 4  ;;  %v3052_v56 = vrot.slane %v3050_v33, 5  ;;  %v4639_v58 = vcombine.low %v2972_v46, %v2953_v55  ;;  %v5446_v37 = vld [vmem:[%s7938_s13 + $0x250] ss:$8 sps:$4 sm:$0xff]  }
 0x86b   :  { %v3047_v19 = vor.u32 %v3046_v54, %v3043_v30  ;;  %v3056_v24 = vrot.slane %v3054_v16, 4  ;;  %v3024_v14 = vrot.slane %v3023_v12, 4  ;;  %v3576_v63 = vrot.slane %v3574_v1, 4  ;;  %v5451_v11 = vld [vmem:[%s7938_s13 + $0x244] ss:$8 sps:$4 sm:$0xff]  }
 0x86c   :  { %v3014_v26 = vld [vmem:[#allocation2 + $0x18] sm:$0x11]  ;;  %v3033_v28 = vor.u32 %v3032_v25, %v3028_v21  ;;  %v3559_v27 = vld [vmem:[#allocation2 + $0x20] sm:$0xee]  ;;  %v3567_v29 = vrot.slane %v7257_v44, 5 }
 0x86d   :  { %v3036_v20 = vshll.u32 %v3014_v26, 16  ;;  %v3057_v23 = vor.u32 %v3056_v24, %v3052_v56  ;;  %v3560_v57 = vld [vmem:[#allocation2 + $0x10] sm:$0xee]  ;;  %v3048_v48 = vrot.slane %v3047_v19, 4  ;;  %v3029_v3 = vsel %vm5735_vm5, %v3024_v14, %v3028_v21  ;;  %v5449_v42 = vld [vmem:[%s7938_s13 + $0x240] ss:$8 sps:$4 sm:$0xff]  }
 0x86e   :  { %v3015_v22 = vld [vmem:[#allocation2] sm:$0x11]  ;;  %v3034_v60 = vrot.slane %v3033_v28, 4  ;;  %v4674_v51 = vrot.slane %v3560_v57, 9  ;;  %v4673_v39 = vrot.slane %v3559_v27, 9  ;;  %v3570_v47 = vrot.slane %v3014_v26, 5 }
 0x86f   :  { %v3060_v59 = vshll.u32 %v3015_v22, 16  ;;  %v3038_v45 = vrot.slane %v3036_v20, 5  ;;  %v3058_v52 = vrot.slane %v3057_v23, 4  ;;  %v3577_v0 = vrot.slane %v3015_v22, 5  ;;  %v5448_v44 = vld [vmem:[%s7938_s13 + $0x254] ss:$8 sps:$4 sm:$0xff]  }
 0x870   :  { %v7279_v6 = vsel %vm5744_vm6, %v4674_v51, %v3574_v1  ;;  %v3053_v35 = vsel %vm5735_vm5, %v3048_v48, %v3052_v56  ;;  %v3569_v53 = vrot.slane %v3567_v29, 4  ;;  %v7309_v32 = vsel %vm5744_vm6, %v4673_v39, %v3567_v29  ;;  %v5454_v18 = vld [vmem:[%s7938_s13 + $0x234] ss:$8 sps:$4 sm:$0xff]   ;;  %v5452_v36 = vld [vmem:[%s7938_s13 + $0x230] ss:$8 sps:$4 sm:$0xff]   ;;  %v7488_v27 = vld [vmem:[%s7942_s16 + $0x88] sm:$0xff] }
 0x871   :  { %v3062_v61 = vrot.slane %v3060_v59, 5  ;;  %v3039_v4 = vsel %vm5735_vm5, %v3034_v60, %v3038_v45  ;;  %3549 = vmatmul.mubr.bf16.gmra.mxu0 %v4639_v58  ;;  %v7288_v34 = vsel %vm5744_vm6, %v3576_v63, %v3577_v0  ;;  %v5457_v30 = vld [vmem:[%s7938_s13 + $0x224] ss:$8 sps:$4 sm:$0xff]   ;;  %v5455_v12 = vld [vmem:[%s7938_s13 + $0x220] ss:$8 sps:$4 sm:$0xff]   ;;  %v7405_v51 = vld [vmem:[%s7942_s16 + $0xf8] sm:$0xff] }
 0x872   :  { %v4601_v8 = vcombine.low %v3029_v3, %v3039_v4  ;;  %v4602_v10 = vcombine.high %v3029_v3, %v3039_v4  ;;  %3913 = vmatprep.mubr.f32.mxu0 %v8100_v31  ;;  %v4710_v40 = vcombine.high %v7279_v6, %v7288_v34  ;;  %v4709_v41 = vcombine.low %v7279_v6, %v7288_v34  ;;  %v5460_v54 = vld [vmem:[%s7938_s13 + $0x214] ss:$8 sps:$4 sm:$0xff]   ;;  %v5458_v33 = vld [vmem:[%s7938_s13 + $0x210] ss:$8 sps:$4 sm:$0xff]   ;;  %v5463_v16 = vld [vmem:[%s7938_s13 + $0x204] ss:$8 sps:$4 sm:$0xff]  }
 0x873   :  { %v3063_v15 = vsel %vm5735_vm5, %v3058_v52, %v3062_v61  ;;  %v3571_v55 = vsel %vm5744_vm6, %v3569_v53, %v3570_v47  ;;  %v5461_v21 = vld [vmem:[%s7938_s13 + $0x200] ss:$8 sps:$4 sm:$0xff]   ;;  %v5466_v25 = vld [vmem:[%s7938_s13 + $0x2f4] ss:$8 sps:$4 sm:$0xff]   ;;  %v5464_v19 = vld [vmem:[%s7938_s13 + $0x2f0] ss:$8 sps:$4 sm:$0xff]  }
 0x874   :  { %3305 = vmatprep.mubr.bf16.mxu1 %v4602_v10  ;;  %v4604_v46 = vcombine.high %v3053_v35, %v3063_v15  ;;  %v4603_v17 = vcombine.low %v3053_v35, %v3063_v15  ;;  %v4708_v43 = vcombine.high %v7309_v32, %v3571_v55  ;;  %v5469_v56 = vld [vmem:[%s7938_s13 + $0x2e4] ss:$8 sps:$4 sm:$0xff]   ;;  %v5467_v24 = vld [vmem:[%s7938_s13 + $0x2e0] ss:$8 sps:$4 sm:$0xff]   ;;  %v5472_v26 = vld [vmem:[%s7938_s13 + $0x2d4] ss:$8 sps:$4 sm:$0xff]   ;;  %v4707_v48 = vcombine.low %v7309_v32, %v3571_v55 }
 0x875   :  { %3306 = vmatmul.mubr.bf16.vlgmr.msra.gmra.mxu1 %v4601_v8  ;;  %v5470_v28 = vld [vmem:[%s7938_s13 + $0x2d0] ss:$8 sps:$4 sm:$0xff]   ;;  %v5475_v1 = vld [vmem:[%s7938_s13 + $0x2c4] ss:$8 sps:$4 sm:$0xff]   ;;  %v5473_v14 = vld [vmem:[%s7938_s13 + $0x2c0] ss:$8 sps:$4 sm:$0xff]  }
 0x876   :  { %3789 = vmatpush1.bf16.msra.mxu1 %v5440_v13  ;;  %3315 = vmatprep.mubr.bf16.mxu1 %v4604_v46  ;;  %v5478_v20 = vld [vmem:[%s7938_s13 + $0x2b4] ss:$8 sps:$4 sm:$0xff]   ;;  %v5476_v22 = vld [vmem:[%s7938_s13 + $0x2b0] ss:$8 sps:$4 sm:$0xff]   ;;  %v5481_v23 = vld [vmem:[%s7938_s13 + $0x2a4] ss:$8 sps:$4 sm:$0xff]  }
 0x877   :  { %3790 = vmatprep.subr.bf16.mxu1 %v5445_v38  ;;  %v5479_v57 = vld [vmem:[%s7938_s13 + $0x2a0] ss:$8 sps:$4 sm:$0xff]   ;;  %v5484_v58 = vld [vmem:[%s7938_s13 + $0x294] ss:$8 sps:$4 sm:$0xff]   ;;  %v5482_v59 = vld [vmem:[%s7938_s13 + $0x290] ss:$8 sps:$4 sm:$0xff]  }
 0x878   :  { %v5487_v60 = vld [vmem:[%s7938_s13 + $0x284] ss:$8 sps:$4 sm:$0xff]   ;;  %v5485_v45 = vld [vmem:[%s7938_s13 + $0x280] ss:$8 sps:$4 sm:$0xff]   ;;  %v7410_v52 = vld [vmem:[%s7942_s16 + $0xf0] sm:$0xff] }
 0x879   :  { %v7416_v61 = vld [vmem:[%s7942_s16 + $0xe8] sm:$0xff]  ;;  %v7422_v63 = vld [vmem:[%s7942_s16 + $0xe0] sm:$0xff]  ;;  %v7428_v0 = vld [vmem:[%s7942_s16 + $0xd8] sm:$0xff] }
 0x87a   :  { %3791 = vmatpush1.bf16.msra.mxu1 %v5443_v49  ;;  %v7440_v3 = vld [vmem:[%s7942_s16 + $0xc8] sm:$0xff]  ;;  %v7446_v4 = vld [vmem:[%s7942_s16 + $0xc0] sm:$0xff]  ;;  %v7458_v6 = vld [vmem:[%s7942_s16 + $0xb0] sm:$0xff] }
 0x87b   :  { %3792 = vmatprep.subr.bf16.mxu1 %v5448_v44  ;;  %v7464_v8 = vld [vmem:[%s7942_s16 + $0xa8] sm:$0xff]  ;;  %v7470_v10 = vld [vmem:[%s7942_s16 + $0xa0] sm:$0xff]  ;;  %v7476_v13 = vld [vmem:[%s7942_s16 + $0x98] sm:$0xff] }
 0x87c   :  { %v7482_v15 = vld [vmem:[%s7942_s16 + $0x90] sm:$0xff]  ;;  %v7494_v34 = vld [vmem:[%s7942_s16 + $0x80] sm:$0xff]  ;;  %v7500_v35 = vld [vmem:[%s7942_s16 + $0x78] sm:$0xff] }
 0x87d   :  { %3316 = vmatmul.mubr.bf16.gmra.mxu1 %v4603_v17  ;;  %v7506_v38 = vld [vmem:[%s7942_s16 + $0x70] sm:$0xff]  ;;  %v7512_v29 = vld [vmem:[%s7942_s16 + $0x68] sm:$0xff]  ;;  %v7542_v47 = vld [vmem:[%s7942_s16 + $0x40] sm:$0xff] }
 0x87e   :  { %3793 = vmatpush1.bf16.msra.mxu1 %v5446_v37  ;;  %3820 = vmatprep.mubr.bf16.mxu1 %v4708_v43  ;;  %v7530_v46 = vld [vmem:[%s7942_s16 + $0x50] sm:$0xff]  ;;  %v7536_v39 = vld [vmem:[%s7942_s16 + $0x48] sm:$0xff]  ;;  %v7548_v49 = vld [vmem:[%s7942_s16 + $0x38] sm:$0xff] }
 0x87f   :  { %3794 = vmatprep.subr.bf16.mxu1 %v5451_v11  ;;  %v7554_v44 = vld [vmem:[%s7942_s16 + $0x30] sm:$0xff]  ;;  %v7560_v53 = vld [vmem:[%s7942_s16 + $0x28] sm:$0xff]  ;;  %v7566_v32 = vld [vmem:[%s7942_s16 + $0x20] sm:$0xff] }
 0x880   :  { %8143 = vst [vmem:[#allocation12_spill] sm:$0xff] %v7566_v32  ;;  %v7572_v55 = vld [vmem:[%s7942_s16 + $0x18] sm:$0xff]  ;;  %v7578_v37 = vld [vmem:[%s7942_s16 + $0x10] sm:$0xff]  ;;  %v7584_v17 = vld [vmem:[%s7942_s16 + $0x8] sm:$0xff] }
 0x881   :  { %8144 = vst [vmem:[#allocation13_spill] sm:$0xff] %v7572_v55  ;;  %8145 = vst [vmem:[#allocation14_spill] sm:$0xff] %v7578_v37  ;;  %v7590_v11 = vld [vmem:[%s7942_s16] sm:$0xff]  ;;  %v7596_v43 = vld [vmem:[%s7942_s16 + $0x1f8] sm:$0xff] }
 0x882   :  { %3795 = vmatpush1.bf16.msra.mxu1 %v5449_v42  ;;  %8146 = vst [vmem:[#allocation15_spill] sm:$0xff] %v7584_v17  ;;  %8147 = vst [vmem:[#allocation16_spill] sm:$0xff] %v7590_v11  ;;  %v7602_v42 = vld [vmem:[%s7942_s16 + $0x1f0] sm:$0xff] }
 0x883   :  { %3796 = vmatprep.subr.bf16.mxu1 %v5454_v18  ;;  %8148 = vst [vmem:[#allocation17_spill] sm:$0xff] %v7596_v43  ;;  %8149 = vst [vmem:[#allocation18_spill] sm:$0xff] %v7602_v42  ;;  %v7608_v18 = vld [vmem:[%s7942_s16 + $0x1e8] sm:$0xff] }
 0x884   :  { %8150 = vst [vmem:[#allocation19_spill] sm:$0xff] %v7608_v18 }
 0x886   :  { %3797 = vmatpush1.bf16.msra.mxu1 %v5452_v36  ;;  %v7614_v36 = vld [vmem:[%s7942_s16 + $0x1e0] sm:$0xff] }
 0x887   :  { %3798 = vmatprep.subr.bf16.mxu1 %v5457_v30  ;;  %8151 = vst [vmem:[#allocation20_spill] sm:$0xff] %v7614_v36  ;;  %v7620_v30 = vld [vmem:[%s7942_s16 + $0x1d8] sm:$0xff] }
 0x888   :  { %8152 = vst [vmem:[#allocation21_spill] sm:$0xff] %v7620_v30 }
 0x88a   :  { %3799 = vmatpush1.bf16.msra.mxu1 %v5455_v12  ;;  %v7626_v12 = vld [vmem:[%s7942_s16 + $0x1d0] sm:$0xff] }
 0x88b   :  { %3800 = vmatprep.subr.bf16.mxu1 %v5460_v54  ;;  %8153 = vst [vmem:[#allocation22_spill] sm:$0xff] %v7626_v12  ;;  %v7632_v54 = vld [vmem:[%s7942_s16 + $0x1c8] sm:$0xff] }
 0x88c   :  { %8154 = vst [vmem:[#allocation23_spill] sm:$0xff] %v7632_v54 }
 0x88e   :  { %3801 = vmatpush1.bf16.msra.mxu1 %v5458_v33  ;;  %v7638_v33 = vld [vmem:[%s7942_s16 + $0x1c0] sm:$0xff] }
 0x88f   :  { %3802 = vmatprep.subr.bf16.mxu1 %v5463_v16  ;;  %8155 = vst [vmem:[#allocation24_spill] sm:$0xff] %v7638_v33  ;;  %v7644_v16 = vld [vmem:[%s7942_s16 + $0x1b8] sm:$0xff] }
 0x890   :  { %8156 = vst [vmem:[#allocation25_spill] sm:$0xff] %v7644_v16 }
 0x892   :  { %3803 = vmatpush1.bf16.msra.mxu1 %v5461_v21  ;;  %v7650_v21 = vld [vmem:[%s7942_s16 + $0x1b0] sm:$0xff] }
 0x893   :  { %3804 = vmatprep.subr.bf16.mxu1 %v5466_v25  ;;  %8157 = vst [vmem:[#allocation26_spill] sm:$0xff] %v7650_v21  ;;  %v7656_v25 = vld [vmem:[%s7942_s16 + $0x1a8] sm:$0xff] }
 0x894   :  { %8158 = vst [vmem:[#allocation27_spill] sm:$0xff] %v7656_v25 }
 0x896   :  { %3805 = vmatpush2.bf16.msra.mxu1 %v5464_v19  ;;  %v7662_v19 = vld [vmem:[%s7942_s16 + $0x1a0] sm:$0xff] }
 0x897   :  { %3806 = vmatprep.subr.bf16.mxu1 %v5469_v56  ;;  %8159 = vst [vmem:[#allocation28_spill] sm:$0xff] %v7662_v19  ;;  %v7668_v56 = vld [vmem:[%s7942_s16 + $0x198] sm:$0xff] }
 0x898   :  { %8160 = vst [vmem:[#allocation29_spill] sm:$0xff] %v7668_v56 }
 0x89a   :  { %3807 = vmatpush2.bf16.msra.mxu1 %v5467_v24  ;;  %v7674_v24 = vld [vmem:[%s7942_s16 + $0x190] sm:$0xff] }
 0x89b   :  { %3808 = vmatprep.subr.bf16.mxu1 %v5472_v26  ;;  %8161 = vst [vmem:[#allocation30_spill] sm:$0xff] %v7674_v24  ;;  %v7680_v26 = vld [vmem:[%s7942_s16 + $0x188] sm:$0xff] }
 0x89c   :  { %8162 = vst [vmem:[#allocation31_spill] sm:$0xff] %v7680_v26 }
 0x89e   :  { %3809 = vmatpush2.bf16.msra.mxu1 %v5470_v28  ;;  %v7686_v28 = vld [vmem:[%s7942_s16 + $0x180] sm:$0xff] }
 0x89f   :  { %3810 = vmatprep.subr.bf16.mxu1 %v5475_v1  ;;  %8163 = vst [vmem:[#allocation32_spill] sm:$0xff] %v7686_v28  ;;  %v7692_v1 = vld [vmem:[%s7942_s16 + $0x178] sm:$0xff] }
 0x8a0   :  { %8164 = vst [vmem:[#allocation33_spill] sm:$0xff] %v7692_v1 }
 0x8a2   :  { %3811 = vmatpush2.bf16.msra.mxu1 %v5473_v14  ;;  %v7698_v14 = vld [vmem:[%s7942_s16 + $0x170] sm:$0xff] }
 0x8a3   :  { %3812 = vmatprep.subr.bf16.mxu1 %v5478_v20  ;;  %8165 = vst [vmem:[#allocation34_spill] sm:$0xff] %v7698_v14  ;;  %v7704_v20 = vld [vmem:[%s7942_s16 + $0x168] sm:$0xff] }
 0x8a4   :  { %8166 = vst [vmem:[#allocation35_spill] sm:$0xff] %v7704_v20 }
 0x8a6   :  { %3813 = vmatpush2.bf16.msra.mxu1 %v5476_v22  ;;  %v7710_v22 = vld [vmem:[%s7942_s16 + $0x160] sm:$0xff] }
 0x8a7   :  { %3814 = vmatprep.subr.bf16.mxu1 %v5481_v23  ;;  %8167 = vst [vmem:[#allocation36_spill] sm:$0xff] %v7710_v22  ;;  %v7716_v23 = vld [vmem:[%s7942_s16 + $0x158] sm:$0xff] }
 0x8a8   :  { %8168 = vst [vmem:[#allocation37_spill] sm:$0xff] %v7716_v23 }
 0x8aa   :  { %3815 = vmatpush2.bf16.msra.mxu1 %v5479_v57  ;;  %v7722_v57 = vld [vmem:[%s7942_s16 + $0x150] sm:$0xff] }
 0x8ab   :  { %3816 = vmatprep.subr.bf16.mxu1 %v5484_v58  ;;  %8169 = vst [vmem:[#allocation38_spill] sm:$0xff] %v7722_v57  ;;  %v7728_v58 = vld [vmem:[%s7942_s16 + $0x148] sm:$0xff] }
 0x8ac   :  { %8170 = vst [vmem:[#allocation39_spill] sm:$0xff] %v7728_v58 }
 0x8ae   :  { %3817 = vmatpush2.bf16.msra.mxu1 %v5482_v59  ;;  %v7734_v59 = vld [vmem:[%s7942_s16 + $0x140] sm:$0xff] }
 0x8af   :  { %3818 = vmatprep.subr.bf16.mxu1 %v5487_v60  ;;  %8171 = vst [vmem:[#allocation40_spill] sm:$0xff] %v7734_v59  ;;  %v7740_v60 = vld [vmem:[%s7942_s16 + $0x138] sm:$0xff] }
 0x8b0   :  { %8172 = vst [vmem:[#allocation8_spill] sm:$0xff] %v7740_v60 }
 0x8b2   :  { %3819 = vmatpush2.bf16.msra.mxu1 %v5485_v45  ;;  %v7746_v45 = vld [vmem:[%s7942_s16 + $0x130] sm:$0xff] }
 0x8b3   :  { %4134 = vmatprep.subr.mxu1 %v7405_v51  ;;  %8173 = vst [vmem:[#allocation5_spill] sm:$0xff] %v7746_v45 }
 0x8b5   :  { %3821 = vmatmul.mubr.bf16.vlgmr.msra.gmra.mxu1 %v4707_v48  ;;  %v7752_v48 = vld [vmem:[%s7942_s16 + $0x128] sm:$0xff] }
 0x8b6   :  { %3830 = vmatprep.mubr.bf16.mxu1 %v4710_v40  ;;  %4135 = vmatpush1.msra.mxu1 %v7410_v52  ;;  %v7518_v40 = vld [vmem:[%s7942_s16 + $0x60] sm:$0xff]  ;;  %8174 = vst [vmem:[#allocation3_spill] sm:$0xff] %v7752_v48 }
 0x8b7   :  { %4136 = vmatprep.subr.mxu1 %v7416_v61 }
 0x8b8   :  { %4137 = vmatpush1.msra.mxu1 %v7422_v63 }
 0x8b9   :  { %4138 = vmatprep.subr.mxu1 %v7428_v0 }
 0x8ba   :  { %4139 = vmatpush1.msra.mxu1 %v7434_v2 }
 0x8bb   :  { %4140 = vmatprep.subr.mxu1 %v7440_v3 }
 0x8bc   :  { %4141 = vmatpush1.msra.mxu1 %v7446_v4 }
 0x8bd   :  { %3831 = vmatmul.mubr.bf16.gmra.mxu1 %v4709_v41  ;;  %4142 = vmatprep.subr.mxu1 %v7452_v5  ;;  %v7524_v41 = vld [vmem:[%s7942_s16 + $0x58] sm:$0xff] }
 0x8be   :  { %4143 = vmatpush1.msra.mxu1 %v7458_v6 }
 0x8bf   :  { %4144 = vmatprep.subr.mxu1 %v7464_v8 }
 0x8c0   :  { %4145 = vmatpush1.msra.mxu1 %v7470_v10 }
 0x8c1   :  { %4146 = vmatprep.subr.mxu1 %v7476_v13 }
 0x8c2   :  { %4147 = vmatpush1.msra.mxu1 %v7482_v15 }
 0x8c3   :  { %4148 = vmatprep.subr.mxu1 %v7488_v27 }
 0x8c4   :  { %4149 = vmatpush1.msra.mxu1 %v7494_v34 }
 0x8c5   :  { %4150 = vmatprep.subr.mxu1 %v7500_v35 }
 0x8c6   :  { %4151 = vmatpush1.msra.mxu1 %v7506_v38 }
 0x8c7   :  { %4152 = vmatprep.subr.mxu1 %v7512_v29 }
 0x8c8   :  { %4153 = vmatpush1.msra.mxu1 %v7518_v40 }
 0x8c9   :  { %4154 = vmatprep.subr.mxu1 %v7524_v41 }
 0x8ca   :  { %4155 = vmatpush1.msra.mxu1 %v7530_v46 }
 0x8cb   :  { %4156 = vmatprep.subr.mxu1 %v7536_v39 }
 0x8cc   :  { %4157 = vmatpush1.msra.mxu1 %v7542_v47 }
 0x8cd   :  { %4158 = vmatprep.subr.mxu1 %v7548_v49 }
 0x8ce   :  { %4159 = vmatpush1.msra.mxu1 %v7554_v44 }
 0x8cf   :  { %4160 = vmatprep.subr.mxu1 %v7560_v53 }
 0x8d0   :  { %4161 = vmatpush1.msra.mxu1 %v7566_v32 }
 0x8d1   :  { %4162 = vmatprep.subr.mxu1 %v7572_v55 }
 0x8d2   :  { %4163 = vmatpush1.msra.mxu1 %v7578_v37 }
 0x8d3   :  { %4164 = vmatprep.subr.mxu1 %v7584_v17 }
 0x8d4   :  { %4165 = vmatpush1.msra.mxu1 %v7590_v11 }
 0x8d5   :  { %4166 = vmatprep.subr.mxu1 %v7596_v43 }
 0x8d6   :  { %4167 = vmatpush2.msra.mxu1 %v7602_v42 }
 0x8d7   :  { %4168 = vmatprep.subr.mxu1 %v7608_v18 }
 0x8d8   :  { %4169 = vmatpush2.msra.mxu1 %v7614_v36 }
 0x8d9   :  { %4170 = vmatprep.subr.mxu1 %v7620_v30 }
 0x8da   :  { %4171 = vmatpush2.msra.mxu1 %v7626_v12 }
 0x8db   :  { %4172 = vmatprep.subr.mxu1 %v7632_v54 }
 0x8dc   :  { %4173 = vmatpush2.msra.mxu1 %v7638_v33 }
 0x8dd   :  { %4174 = vmatprep.subr.mxu1 %v7644_v16 }
 0x8de   :  { %4175 = vmatpush2.msra.mxu1 %v7650_v21 }
 0x8df   :  { %4176 = vmatprep.subr.mxu1 %v7656_v25 }
 0x8e0   :  { %4177 = vmatpush2.msra.mxu1 %v7662_v19 }
 0x8e1   :  { %4178 = vmatprep.subr.mxu1 %v7668_v56 }
 0x8e2   :  { %4179 = vmatpush2.msra.mxu1 %v7674_v24 }
 0x8e3   :  { %4180 = vmatprep.subr.mxu1 %v7680_v26 }
 0x8e4   :  { %4181 = vmatpush2.msra.mxu1 %v7686_v28 }
 0x8e5   :  { %4182 = vmatprep.subr.mxu1 %v7692_v1 }
 0x8e6   :  { %4183 = vmatpush2.msra.mxu1 %v7698_v14 }
 0x8e7   :  { %4184 = vmatprep.subr.mxu1 %v7704_v20 }
 0x8e8   :  { %4185 = vmatpush2.msra.mxu1 %v7710_v22 }
 0x8e9   :  { %4186 = vmatprep.subr.mxu1 %v7716_v23 }
 0x8ea   :  { %4187 = vmatpush2.msra.mxu1 %v7722_v57 }
 0x8eb   :  { %4188 = vmatprep.subr.mxu1 %v7728_v58 }
 0x8ec   :  { %4189 = vmatpush2.msra.mxu1 %v7734_v59 }
 0x8ed   :  { %4190 = vmatprep.subr.mxu1 %v7740_v60 }
 0x8ee   :  { %4191 = vmatpush2.msra.mxu1 %v7746_v45 }
 0x8ef   :  { %4192 = vmatprep.subr.mxu1 %v7752_v48 }
 0x8f0   :  { %4193 = vmatpush2.msra.mxu1 %v7758_v7 }
 0x929   :  { %v3540_v58 = vpop.f32.mrf.mxu0 }
 0x92b   :  { %v3542_v23 = vpop.f32.mrf.mxu0 }
 0x92d   :  { %v3544_v20 = vpop.f32.mrf.mxu0 }
 0x92f   :  { %v3546_v45 = vpop.f32.mrf.mxu0 }
 0x931   :  { %v3550_v28 = vpop.f32.mrf.mxu0 }
 0x933   :  { %v3552_v56 = vpop.f32.mrf.mxu0 }
 0x935   :  { %v3307_v9 = vpop.f32.mrf.mxu1  ;;  %v3554_v25 = vpop.f32.mrf.mxu0 }
 0x937   :  { %v3309_v62 = vpop.f32.mrf.mxu1  ;;  %v3556_v16 = vpop.f32.mrf.mxu0 }
 0x938   :  { %v3543_v32 = vadd.f32 %v3542_v23, %v3309_v62 }
 0x939   :  { %v3311_v59 = vpop.f32.mrf.mxu1 }
 0x93a   :  { %v3545_v37 = vadd.f32 %v3544_v20, %v3311_v59 }
 0x93b   :  { %v3313_v60 = vpop.f32.mrf.mxu1 }
 0x93c   :  { %v3547_v11 = vadd.f32 %v3546_v45, %v3313_v60 }
 0x93d   :  { %v3317_v57 = vpop.f32.mrf.mxu1 }
 0x93e   :  { %v3551_v42 = vadd.f32 %v3550_v28, %v3317_v57  ;;  %v8208_v28 = vld [vmem:[#allocation4_spill] sm:$0xff] }
 0x93f   :  { %v3319_v22 = vpop.f32.mrf.mxu1 }
 0x940   :  { %v3553_v36 = vadd.f32 %v3552_v56, %v3319_v22  ;;  %v4033_v56 = vld [vmem:[%s7942_s16 + $0x110] sm:$0xff] }
 0x941   :  { %v3321_v14 = vpop.f32.mrf.mxu1 }
 0x942   :  { %v3555_v12 = vadd.f32 %v3554_v25, %v3321_v14  ;;  %v4034_v25 = vld [vmem:[%s7942_s16 + $0x118] sm:$0xff] }
 0x943   :  { %v3323_v1 = vpop.f32.mrf.mxu1  ;;  %4194 = vmatprep.subr.mxu1 %v4034_v25 }
 0x944   :  { %v3557_v54 = vadd.f32 %v3556_v16, %v3323_v1  ;;  %4195 = vmatpush2.msra.mxu1 %v4033_v56  ;;  %v4031_v1 = vld [vmem:[%s7942_s16 + $0x100] sm:$0xff] }
 0x975   :  { %v3822_v26 = vpop.f32.mrf.mxu1 }
 0x977   :  { %v3824_v24 = vpop.f32.mrf.mxu1 }
 0x979   :  { %v3826_v19 = vpop.f32.mrf.mxu1 }
 0x97b   :  { %v3828_v48 = vpop.f32.mrf.mxu1 }
 0x97c   :  { %v7772_v16 = vadd.f32 %v3828_v48, %v3547_v11 }
 0x97d   :  { %v3832_v7 = vpop.f32.mrf.mxu1 }
 0x97e   :  { %v7769_v55 = vadd.f32 %v3832_v7, %v3551_v42 }
 0x97f   :  { %v3834_v21 = vpop.f32.mrf.mxu1 }
 0x980   :  { %v7766_v17 = vadd.f32 %v3834_v21, %v3553_v36  ;;  %v8205_v21 = vld [vmem:[#allocation8_spill] sm:$0xff] }
 0x981   :  { %v3836_v33 = vpop.f32.mrf.mxu1 }
 0x982   :  { %v7764_v43 = vadd.f32 %v3836_v33, %v3555_v12  ;;  %v7778_v12 = vadd.f32 %v3824_v24, %v3543_v32  ;;  %v3924_v32 = vmul.f32 %v7769_v55, %v7769_v55  ;;  %v8207_v24 = vld [vmem:[#allocation3_spill] sm:$0xff] }
 0x983   :  { %v3838_v30 = vpop.f32.mrf.mxu1 }
 0x984   :  { %v7762_v18 = vadd.f32 %v3838_v30, %v3557_v54  ;;  %v3541_v30 = vadd.f32 %v3540_v58, %v3307_v9  ;;  %v7775_v54 = vadd.f32 %v3826_v19, %v3545_v37  ;;  %v3926_v7 = vmul.f32 %v7764_v43, %v7764_v43  ;;  %v8206_v19 = vld [vmem:[#allocation5_spill] sm:$0xff] }
 0x985   :  { %v3925_v9 = vmul.f32 %v7766_v17, %v7766_v17  ;;  %v3923_v37 = vmul.f32 %v7772_v16, %v7772_v16  ;;  %v3921_v42 = vmul.f32 %v7778_v12, %v7778_v12 }
 0x986   :  { %3873 = vmatprep.subr.mxu0 %v7762_v18  ;;  %v7781_v36 = vadd.f32 %v3822_v26, %v3541_v30  ;;  %v3927_v62 = vmul.f32 %v7762_v18, %v7762_v18  ;;  %v3922_v11 = vmul.f32 %v7775_v54, %v7775_v54  ;;  %v4032_v26 = vld [vmem:[%s7942_s16 + $0x108] sm:$0xff] }
 0x987   :  { %3874 = vmatpush1.msra.mxu0 %v7764_v43  ;;  %4196 = vmatprep.subr.mxu1 %v4032_v26 }
 0x988   :  { %3875 = vmatprep.subr.mxu0 %v7766_v17  ;;  %v3920_v33 = vmul.f32 %v7781_v36, %v7781_v36  ;;  %4197 = vmatpush2.msra.mxu1 %v4031_v1 }
 0x989   :  { %3876 = vmatpush1.msra.mxu0 %v7769_v55 }
 0x98a   :  { %3877 = vmatprep.subr.mxu0 %v7772_v16 }
 0x98b   :  { %3878 = vmatpush1.msra.mxu0 %v7775_v54 }
 0x98c   :  { %3879 = vmatprep.subr.mxu0 %v7778_v12 }
 0x98d   :  { %3880 = vmatpush1.msra.mxu0 %v7781_v36 }
 0x98e   :  { %3952 = vmatprep.subr.mxu0 %v3927_v62  ;;  %4743 = vmatmul.mubr.msk.f32.vlgmr.msra.gmra.mxu0 %vm612_vm10, %v8099_v50 }
 0x98f   :  { %3953 = vmatpush1.msra.mxu0 %v3926_v7  ;;  %3992 = vmatprep.mubr.f32.mxu0 %v8100_v31  ;;  %v8177_v31 = vld [vmem:[#allocation13_spill] sm:$0xff] }
 0x990   :  { %3954 = vmatprep.subr.mxu0 %v3925_v9 }
 0x991   :  { %3955 = vmatpush1.msra.mxu0 %v3924_v32 }
 0x992   :  { %3956 = vmatprep.subr.mxu0 %v3923_v37 }
 0x993   :  { %3957 = vmatpush1.msra.mxu0 %v3922_v11 }
 0x994   :  { %3958 = vmatprep.subr.mxu0 %v3921_v42 }
 0x995   :  { %3959 = vmatpush1.msra.mxu0 %v3920_v33 }
 0x996   :  { %4744 = vmatmul.mubr.msk.f32.vlgmr.msra.gmra.mxu0 %vm612_vm10, %v8099_v50  ;;  %4063 = vmatprep.subr.mxu0 %v7405_v51  ;;  %v8176_v50 = vld [vmem:[#allocation12_spill] sm:$0xff]  ;;  %v8178_v51 = vld [vmem:[#allocation14_spill] sm:$0xff] }
 0x997   :  { %4064 = vmatpush1.msra.mxu0 %v7410_v52  ;;  %v8179_v52 = vld [vmem:[#allocation15_spill] sm:$0xff] }
 0x998   :  { %4065 = vmatprep.subr.mxu0 %v7416_v61  ;;  %v8180_v61 = vld [vmem:[#allocation16_spill] sm:$0xff] }
 0x999   :  { %4066 = vmatpush1.msra.mxu0 %v7422_v63  ;;  %v8181_v63 = vld [vmem:[#allocation17_spill] sm:$0xff] }
 0x99a   :  { %4067 = vmatprep.subr.mxu0 %v7428_v0  ;;  %v8182_v0 = vld [vmem:[#allocation18_spill] sm:$0xff] }
 0x99b   :  { %4068 = vmatpush1.msra.mxu0 %v7434_v2  ;;  %v8183_v2 = vld [vmem:[#allocation19_spill] sm:$0xff] }
 0x99c   :  { %4069 = vmatprep.subr.mxu0 %v7440_v3  ;;  %v8184_v3 = vld [vmem:[#allocation20_spill] sm:$0xff] }
 0x99d   :  { %4070 = vmatpush1.msra.mxu0 %v7446_v4  ;;  %v8185_v4 = vld [vmem:[#allocation21_spill] sm:$0xff] }
 0x99e   :  { %4071 = vmatprep.subr.mxu0 %v7452_v5  ;;  %v8186_v5 = vld [vmem:[#allocation22_spill] sm:$0xff] }
 0x99f   :  { %4072 = vmatpush1.msra.mxu0 %v7458_v6  ;;  %v8187_v6 = vld [vmem:[#allocation23_spill] sm:$0xff] }
 0x9a0   :  { %4073 = vmatprep.subr.mxu0 %v7464_v8  ;;  %v8188_v8 = vld [vmem:[#allocation24_spill] sm:$0xff] }
 0x9a1   :  { %4074 = vmatpush1.msra.mxu0 %v7470_v10  ;;  %v8189_v10 = vld [vmem:[#allocation25_spill] sm:$0xff] }
 0x9a2   :  { %4075 = vmatprep.subr.mxu0 %v7476_v13  ;;  %v8190_v13 = vld [vmem:[#allocation26_spill] sm:$0xff] }
 0x9a3   :  { %4076 = vmatpush1.msra.mxu0 %v7482_v15  ;;  %v8191_v15 = vld [vmem:[#allocation27_spill] sm:$0xff] }
 0x9a4   :  { %4077 = vmatprep.subr.mxu0 %v7488_v27  ;;  %v8192_v27 = vld [vmem:[#allocation28_spill] sm:$0xff] }
 0x9a5   :  { %4078 = vmatpush1.msra.mxu0 %v7494_v34  ;;  %v8193_v34 = vld [vmem:[#allocation29_spill] sm:$0xff] }
 0x9a6   :  { %4079 = vmatprep.subr.mxu0 %v7500_v35  ;;  %v8194_v35 = vld [vmem:[#allocation30_spill] sm:$0xff] }
 0x9a7   :  { %4080 = vmatpush1.msra.mxu0 %v7506_v38  ;;  %v8195_v38 = vld [vmem:[#allocation31_spill] sm:$0xff] }
 0x9a8   :  { %4081 = vmatprep.subr.mxu0 %v7512_v29  ;;  %v8196_v29 = vld [vmem:[#allocation32_spill] sm:$0xff] }
 0x9a9   :  { %4082 = vmatpush1.msra.mxu0 %v7518_v40  ;;  %v8197_v40 = vld [vmem:[#allocation33_spill] sm:$0xff] }
 0x9aa   :  { %4083 = vmatprep.subr.mxu0 %v7524_v41  ;;  %v8198_v41 = vld [vmem:[#allocation34_spill] sm:$0xff] }
 0x9ab   :  { %4084 = vmatpush1.msra.mxu0 %v7530_v46  ;;  %v8199_v46 = vld [vmem:[#allocation35_spill] sm:$0xff] }
 0x9ac   :  { %4085 = vmatprep.subr.mxu0 %v7536_v39  ;;  %v8200_v39 = vld [vmem:[#allocation36_spill] sm:$0xff] }
 0x9ad   :  { %4086 = vmatpush1.msra.mxu0 %v7542_v47  ;;  %v8201_v47 = vld [vmem:[#allocation37_spill] sm:$0xff] }
 0x9ae   :  { %4087 = vmatprep.subr.mxu0 %v7548_v49  ;;  %v8202_v49 = vld [vmem:[#allocation38_spill] sm:$0xff] }
 0x9af   :  { %4088 = vmatpush1.msra.mxu0 %v7554_v44  ;;  %v8203_v44 = vld [vmem:[#allocation39_spill] sm:$0xff] }
 0x9b0   :  { %4089 = vmatprep.subr.mxu0 %v7560_v53  ;;  %v8204_v53 = vld [vmem:[#allocation40_spill] sm:$0xff] }
 0x9b1   :  { %4090 = vmatpush1.msra.mxu0 %v8176_v50 }
 0x9b2   :  { %4091 = vmatprep.subr.mxu0 %v8177_v31 }
 0x9b3   :  { %4092 = vmatpush1.msra.mxu0 %v8178_v51 }
 0x9b4   :  { %4093 = vmatprep.subr.mxu0 %v8179_v52 }
 0x9b5   :  { %4094 = vmatpush1.msra.mxu0 %v8180_v61  ;;  %v8209_v61 = vld [vmem:[#allocation10_spill] sm:$0xff] }
 0x9b6   :  { %4095 = vmatprep.subr.mxu0 %v8181_v63 }
 0x9b7   :  { %4096 = vmatpush2.msra.mxu0 %v8182_v0  ;;  %v4219_v0 = vld [vmem:[%s7943_s14] sm:$0x3] }
 0x9b8   :  { %4097 = vmatprep.subr.mxu0 %v8183_v2 }
 0x9b9   :  { %4098 = vmatpush2.msra.mxu0 %v8184_v3 }
 0x9ba   :  { %4099 = vmatprep.subr.mxu0 %v8185_v4  ;;  %v8210_v4 = vld [vmem:[#allocation9_spill] sm:$0xff] }
 0x9bb   :  { %4100 = vmatpush2.msra.mxu0 %v8186_v5 }
 0x9bc   :  { %4101 = vmatprep.subr.mxu0 %v8187_v6  ;;  %v8211_v6 = vld [vmem:[#allocation11_spill] sm:$0xff] }
 0x9bd   :  { %4102 = vmatpush2.msra.mxu0 %v8188_v8 }
 0x9be   :  { %4103 = vmatprep.subr.mxu0 %v8189_v10 }
 0x9bf   :  { %4104 = vmatpush2.msra.mxu0 %v8190_v13 }
 0x9c0   :  { %4105 = vmatprep.subr.mxu0 %v8191_v15 }
 0x9c1   :  { %4106 = vmatpush2.msra.mxu0 %v8192_v27 }
 0x9c2   :  { %4107 = vmatprep.subr.mxu0 %v8193_v34  ;;  %v4239_v34 = vld [vmem:[%s7944_s15] sm:$0x3] }
 0x9c3   :  { %4108 = vmatpush2.msra.mxu0 %v8194_v35 }
 0x9c4   :  { %4109 = vmatprep.subr.mxu0 %v8195_v38 }
 0x9c5   :  { %4110 = vmatpush2.msra.mxu0 %v8196_v29 }
 0x9c6   :  { %4111 = vmatprep.subr.mxu0 %v8197_v40 }
 0x9c7   :  { %4112 = vmatpush2.msra.mxu0 %v8198_v41 }
 0x9c8   :  { %4113 = vmatprep.subr.mxu0 %v8199_v46 }
 0x9c9   :  { %4114 = vmatpush2.msra.mxu0 %v8200_v39 }
 0x9ca   :  { %4115 = vmatprep.subr.mxu0 %v8201_v47 }
 0x9cb   :  { %4116 = vmatpush2.msra.mxu0 %v8202_v49 }
 0x9cc   :  { %4117 = vmatprep.subr.mxu0 %v8203_v44 }
 0x9cd   :  { %4118 = vmatpush2.msra.mxu0 %v8204_v53 }
 0x9ce   :  { %4119 = vmatprep.subr.mxu0 %v8205_v21 }
 0x9cf   :  { %4120 = vmatpush2.msra.mxu0 %v8206_v19 }
 0x9d0   :  { %4121 = vmatprep.subr.mxu0 %v8207_v24 }
 0x9d1   :  { %4122 = vmatpush2.msra.mxu0 %v8208_v28 }
 0x9d2   :  { %4123 = vmatprep.subr.mxu0 %v4034_v25 }
 0x9d3   :  { %4124 = vmatpush2.msra.mxu0 %v4033_v56 }
 0x9d4   :  { %4125 = vmatprep.subr.mxu0 %v4032_v26 }
 0x9d5   :  { %4126 = vmatpush2.msra.mxu0 %v4031_v1 }
 0xa4e   :  { %v3915_v14 = vpop.f32.mrf.mxu0 }
 0xa50   :  { %v3917_v20 = vpop.f32.mrf.mxu0 }
 0xa51   :  { %4127 = vmatprep.mubr.f32.mxu0 %v3917_v20 }
 0xa52   :  { %4128 = vmatmul.mubr.f32.vlgmr.msra.gmra.mxu0 %v3915_v14 }
 0xa56   :  { %v3994_v22 = vpop.f32.mrf.mxu0 }
 0xa58   :  { %v3996_v23 = vpop.f32.mrf.mxu0 }
 0xa59   :  { %4198 = vmatprep.mubr.f32.mxu1 %v3996_v23 }
 0xa5a   :  { %4199 = vmatmul.mubr.f32.vlgmr.msra.gmra.mxu1 %v3994_v22 }
 0xb12   :  { %v4129_v57 = vpop.f32.mrf.mxu0 }
 0xb13   :  { %v4205_v59 = vmul.f32 0.001953125, %v4129_v57 }
 0xb14   :  { %v4131_v58 = vpop.f32.mrf.mxu0 }
 0xb15   :  { %v4206_v60 = vmul.f32 0.001953125, %v4131_v58  ;;  %v4209_v48 = vmul.f32 %v4205_v59, %v4205_v59 }
 0xb17   :  { %v4210_v7 = vmul.f32 %v4206_v60, %v4206_v60 }
 0xb1a   :  { %v4200_v45 = vpop.f32.mrf.mxu1 }
 0xb1b   :  { %v4207_v30 = vmul.f32 0.001953125, %v4200_v45 }
 0xb1c   :  { %v4202_v62 = vpop.f32.mrf.mxu1 }
 0xb1d   :  { %v4211_v9 = vsub.f32 %v4207_v30, %v4209_v48  ;;  %v4208_v32 = vmul.f32 0.001953125, %v4202_v62 }
 0xb1f   :  { %v4213_v37 = vmax.f32 %v4211_v9, 0.0  ;;  %v4212_v11 = vsub.f32 %v4208_v32, %v4210_v7 }
 0xb21   :  { %v4215_v42 = vadd.f32 1e-05, %v4213_v37  ;;  %v4214_v33 = vmax.f32 %v4212_v11, 0.0 }
 0xb23   :  { %v4216_v50 = vadd.f32 1e-05, %v4214_v33  ;;  %5496 = vrsqrt.f32 %v4215_v42 }
 0xb25   :  { %5498 = vrsqrt.f32 %v4216_v50 }
 0xb30   :  { %v5497_v31 = vpop.eup %5496 }
 0xb32   :  { %v5499_v51 = vpop.eup %5498 }
 0xb33   :  { %v4222_v52 = vcombine.low %v5497_v31, %v5499_v51 }
 0xb35   :  { %v4229_v63 = vrot.slane %v4222_v52, %v8209_v61 }
 0xb37   :  { %v4236_v2 = vrot.slane %v4229_v63, %v8209_v61 }
 0xb39   :  { %v4238_v3 = vmul.f32 %v4236_v2, %v4219_v0 }
 0xb3b   :  { %v4244_v5 = vrot.slane %v4238_v3, %v8210_v4  ;;  %v4248_v8 = vrot.slane %v4238_v3, %v8211_v6 }
 0xb3d   :  { %v4251_v10 = vmul.f32 %v4244_v5, %v4205_v59  ;;  %v4252_v13 = vmul.f32 %v4248_v8, %v4206_v60  ;;  %v4272_v29 = vmul.f32 %v4244_v5, %v7781_v36  ;;  %v4273_v40 = vmul.f32 %v4248_v8, %v7778_v12 }
 0xb3e   :  { %v4274_v41 = vmul.f32 %v4244_v5, %v7775_v54  ;;  %v4275_v46 = vmul.f32 %v4248_v8, %v7772_v16  ;;  %v4276_v49 = vmul.f32 %v4244_v5, %v7769_v55  ;;  %v4277_v44 = vmul.f32 %v4248_v8, %v7766_v17 }
 0xb3f   :  { %v4255_v15 = vcombine.low %v4251_v10, %v4252_v13  ;;  %v4278_v53 = vmul.f32 %v4244_v5, %v7764_v43  ;;  %v4279_v21 = vmul.f32 %v4248_v8, %v7762_v18 }
 0xb41   :  { %v4262_v27 = vrot.slane %v4255_v15, %v8209_v61 }
 0xb43   :  { %v4269_v35 = vrot.slane %v4262_v27, %v8209_v61 }
 0xb45   :  { %v4271_v38 = vsub.f32 %v4239_v34, %v4269_v35 }
 0xb47   :  { %v4284_v39 = vrot.slane %v4271_v38, %v8210_v4  ;;  %v4288_v47 = vrot.slane %v4271_v38, %v8211_v6 }
 0xb49   :  { %v4291_v25 = vadd.f32 %v4284_v39, %v4272_v29  ;;  %v4292_v36 = vadd.f32 %v4288_v47, %v4273_v40  ;;  %v4293_v19 = vadd.f32 %v4284_v39, %v4274_v41  ;;  %v4294_v12 = vadd.f32 %v4288_v47, %v4275_v46 }
 0xb4a   :  { %v4295_v56 = vadd.f32 %v4284_v39, %v4276_v49  ;;  %v4296_v54 = vadd.f32 %v4288_v47, %v4277_v44  ;;  %v4297_v24 = vadd.f32 %v4284_v39, %v4278_v53  ;;  %v4298_v16 = vadd.f32 %v4288_v47, %v4279_v21 }
 0xb4b   :  { %v4299_v26 = vmax.f32 %v4291_v25, 0.0  ;;  %v4300_v28 = vmax.f32 %v4292_v36, 0.0  ;;  %v4301_v1 = vmax.f32 %v4293_v19, 0.0  ;;  %v4302_v14 = vmax.f32 %v4294_v12, 0.0 }
 0xb4c   :  { %v4303_v20 = vmax.f32 %v4295_v56, 0.0  ;;  %v4304_v55 = vmax.f32 %v4296_v54, 0.0  ;;  %v4305_v22 = vmax.f32 %v4297_v24, 0.0  ;;  %v4306_v17 = vmax.f32 %v4298_v16, 0.0 }
 0xb4d   :  { %4307 = vst [vmem:[%s7945_s20] sm:$0xff] %v4299_v26  ;;  %4308 = vst [vmem:[%s7945_s20 + $0x8] sm:$0xff] %v4300_v28 }
 0xb4e   :  { %4309 = vst [vmem:[%s7945_s20 + $0x10] sm:$0xff] %v4301_v1  ;;  %4310 = vst [vmem:[%s7945_s20 + $0x18] sm:$0xff] %v4302_v14 }
 0xb4f   :  { %4311 = vst [vmem:[%s7945_s20 + $0x20] sm:$0xff] %v4303_v20  ;;  %4312 = vst [vmem:[%s7945_s20 + $0x28] sm:$0xff] %v4304_v55 }
 0xb50   :  { %4313 = vst [vmem:[%s7945_s20 + $0x30] sm:$0xff] %v4305_v22  ;;  %4314 = vst [vmem:[%s7945_s20 + $0x38] sm:$0xff] %v4306_v17 }

</bundles_post_ra>
